<compile_context>
chip_gen: v7x
topology: tpu7x:2x2x1
jax: 0.10.0
libtpu: 0.0.40
codegen_flags: <defaults>
</compile_context>

<pallas_src>
import functools

import jax
import jax.numpy as jnp
from jax import lax
from jax.experimental import pallas as pl
from jax.experimental.pallas import tpu as pltpu


# ----------------------------------------------------------------------------
# static configuration / tiling helpers (kept OUT of the traced params dict)
# ----------------------------------------------------------------------------
def _round_up(x, m):
    return (x + m - 1) // m * m


def _pick_row_tile(m, cap=512):
    """Largest divisor of m that is a multiple of 8 and <= cap (else full m)."""
    if m % 8 != 0:
        return m
    t = min(cap, m)
    t -= t % 8
    while t > 8 and m % t != 0:
        t -= 8
    return t if (t > 0 and m % t == 0) else m


def _pick_col_tile(n, cap=512):
    """Largest divisor of n that is a multiple of 128 and <= cap (else full n)."""
    if n % 128 != 0:
        return n
    t = min(cap, n)
    t -= t % 128
    while t > 128 and n % t != 0:
        t -= 128
    return t if (t > 0 and n % t == 0) else n


def _pad2(x, rows, cols):
    r, c = x.shape
    if r == rows and c == cols:
        return x
    return jnp.pad(x, ((0, rows - r), (0, cols - c)))


CORR_LEVELS = 4
CORR_RADIUS = 4
CORR_DIM = CORR_LEVELS * (2 * CORR_RADIUS + 1) ** 2      # 324
CFP_DIM = _round_up(CORR_DIM + 2, 128)                   # 384: [flow|corr|pad]
FDIM = 256
HDIM = 128
CDIM = 128
MDIM = 128                                               # motion feat width


# ----------------------------------------------------------------------------
# Pallas kernel 1: matmul (bf16 operands).  Single-K-tile fast path (no f32
# scratch / no pl.when phases) plus a general K-tiled path for large K.
# ----------------------------------------------------------------------------
def _mm_single_kernel(a_ref, b_ref, o_ref, *, act):
    acc = jnp.dot(a_ref[...], b_ref[...], preferred_element_type=jnp.float32)
    if act == "relu":
        acc = jnp.maximum(acc, 0.0)
    elif act == "tanh":
        acc = jnp.tanh(acc)
    o_ref[...] = acc.astype(o_ref.dtype)


def _mm_tiled_kernel(a_ref, b_ref, o_ref, acc_ref, *, act):
    @pl.when(pl.program_id(2) == 0)
    def _init():
        acc_ref[...] = jnp.zeros_like(acc_ref)

    acc_ref[...] += jnp.dot(a_ref[...], b_ref[...],
                            preferred_element_type=jnp.float32)

    @pl.when(pl.program_id(2) == pl.num_programs(2) - 1)
    def _finish():
        acc = acc_ref[...]
        if act == "relu":
            acc = jnp.maximum(acc, 0.0)
        elif act == "tanh":
            acc = jnp.tanh(acc)
        o_ref[...] = acc.astype(o_ref.dtype)


def pallas_matmul(a, b, act=None, out_dtype=jnp.float32):
    M, K = a.shape
    K2, N = b.shape
    assert K == K2
    a = a.astype(jnp.bfloat16)
    b = b.astype(jnp.bfloat16)
    tm = _pick_row_tile(M)
    tn = _pick_col_tile(N)
    if K <= 1024:
        return pl.pallas_call(
            functools.partial(_mm_single_kernel, act=act),
            out_shape=jax.ShapeDtypeStruct((M, N), out_dtype),
            grid=(M // tm, N // tn),
            in_specs=[pl.BlockSpec((tm, K), lambda i, j: (i, 0)),
                      pl.BlockSpec((K, tn), lambda i, j: (0, j))],
            out_specs=pl.BlockSpec((tm, tn), lambda i, j: (i, j)),
            compiler_params=pltpu.CompilerParams(
                dimension_semantics=("parallel", "parallel")),
        )(a, b)
    tk = 512
    Kp = _round_up(K, tk)
    a_p = _pad2(a, M, Kp)
    b_p = _pad2(b, Kp, N)
    return pl.pallas_call(
        functools.partial(_mm_tiled_kernel, act=act),
        out_shape=jax.ShapeDtypeStruct((M, N), out_dtype),
        grid=(M // tm, N // tn, Kp // tk),
        in_specs=[pl.BlockSpec((tm, tk), lambda i, j, k: (i, k)),
                  pl.BlockSpec((tk, tn), lambda i, j, k: (k, j))],
        out_specs=pl.BlockSpec((tm, tn), lambda i, j, k: (i, j)),
        scratch_shapes=[pltpu.VMEM((tm, tn), jnp.float32)],
        compiler_params=pltpu.CompilerParams(
            dimension_semantics=("parallel", "parallel", "arbitrary")),
    )(a_p, b_p)


# ----------------------------------------------------------------------------
# Pallas kernel 2: fused frame-1 encoder (fnet + cnet in ONE matmul over p1)
# epilogue: identity -> fmap1 (bf16), tanh -> net (f32), relu -> inp (bf16)
# ----------------------------------------------------------------------------
def _enc1_kernel(a_ref, w_ref, f_o, net_o, inp_o, *, fdim, hdim):
    acc = jnp.dot(a_ref[...], w_ref[...], preferred_element_type=jnp.float32)
    f_o[...] = acc[:, :fdim].astype(f_o.dtype)
    net_o[...] = jnp.tanh(acc[:, fdim:fdim + hdim])
    inp_o[...] = jnp.maximum(acc[:, fdim + hdim:], 0.0).astype(inp_o.dtype)


def encode_frame1(p1, w_fnet, w_cnet, hdim):
    M, K = p1.shape
    fdim = w_fnet.shape[1]
    cdim = w_cnet.shape[1] - hdim
    w = jnp.concatenate([w_fnet, w_cnet], axis=1).astype(jnp.bfloat16)
    a = p1.astype(jnp.bfloat16)
    tm = _pick_row_tile(M)
    out_shape = (jax.ShapeDtypeStruct((M, fdim), jnp.bfloat16),
                 jax.ShapeDtypeStruct((M, hdim), jnp.float32),
                 jax.ShapeDtypeStruct((M, cdim), jnp.bfloat16))
    return pl.pallas_call(
        functools.partial(_enc1_kernel, fdim=fdim, hdim=hdim),
        out_shape=out_shape,
        grid=(M // tm,),
        in_specs=[pl.BlockSpec((tm, K), lambda i: (i, 0)),
                  pl.BlockSpec((K, fdim + hdim + cdim), lambda i: (0, 0))],
        out_specs=(pl.BlockSpec((tm, fdim), lambda i: (i, 0)),
                   pl.BlockSpec((tm, hdim), lambda i: (i, 0)),
                   pl.BlockSpec((tm, cdim), lambda i: (i, 0))),
        compiler_params=pltpu.CompilerParams(dimension_semantics=("parallel",)),
    )(a, w)


# ----------------------------------------------------------------------------
# Pallas kernel 3: batched all-pairs correlation (row AND column tiled,
# 1/sqrt(D) and the bf16 cast fused into the store)
# ----------------------------------------------------------------------------
def _corr_kernel(f1_ref, f2_ref, o_ref, *, inv_sqrt_d):
    acc = lax.dot_general(f1_ref[0], f2_ref[0], (((1,), (1,)), ((), ())),
                          preferred_element_type=jnp.float32)
    o_ref[0] = (acc * inv_sqrt_d).astype(o_ref.dtype)


def all_pairs_corr(f1b, f2b):
    N, HW, D = f1b.shape
    ti = _pick_row_tile(HW)
    tj = _pick_col_tile(HW)
    return pl.pallas_call(
        functools.partial(_corr_kernel, inv_sqrt_d=float(D) ** -0.5),
        out_shape=jax.ShapeDtypeStruct((N, HW, HW), jnp.bfloat16),
        grid=(N, HW // ti, HW // tj),
        in_specs=[pl.BlockSpec((1, ti, D), lambda n, i, j: (n, i, 0)),
                  pl.BlockSpec((1, tj, D), lambda n, i, j: (n, j, 0))],
        out_specs=pl.BlockSpec((1, ti, tj), lambda n, i, j: (n, i, j)),
        compiler_params=pltpu.CompilerParams(
            dimension_semantics=("parallel", "parallel", "parallel")),
    )(f1b, f2b)


# ----------------------------------------------------------------------------
# Pallas kernel 4: fully fused per-iteration update
#   motion encoder (384x128) + fused ConvGRU gates ((tm,384)x(384,384)) +
#   flow head (128x2) + IN-KERNEL coords integration (io-aliased).
# ----------------------------------------------------------------------------
_GRU_WEIGHT_KEYS = ("w_menc", "w_gate", "w_fgate", "wqh", "wfh")


def _update_kernel(net_ref, inp_ref, cfp_ref, coords_ref,
                   wmenc_ref, wgate_ref, wfgate_ref, wqh_ref, wfh_ref,
                   net_o, coords_o, *, hdim):
    f32, bf16 = jnp.float32, jnp.bfloat16

    net = net_ref[...]                                   # (tm, 128) f32
    inp_b = inp_ref[...]                                 # (tm, 128) bf16
    cfp_b = cfp_ref[...]                                 # (tm, 384) bf16 [flow|corr|pad]
    flow = cfp_b[:, 0:2].astype(f32)                     # (tm, 2) read from cfp

    # motion encoder: relu((flow|corr) @ w_menc), lane-dense K padded to 384
    mf = jnp.maximum(
        jnp.dot(cfp_b, wmenc_ref[...], preferred_element_type=f32), 0.0)

    # fused gates: [net|inp|mf] (tm,384) @ w_gate (384,384) -> [z_pre|r_pre|qx_pre]
    x_cat = jnp.concatenate([net.astype(bf16), inp_b, mf.astype(bf16)], axis=1)
    gates = jnp.dot(x_cat, wgate_ref[...], preferred_element_type=f32)
    wfg = wfgate_ref[...]                                # (2, 384) f32, fused flow gates
    gates = gates + flow[:, 0:1] * wfg[0:1, :] + flow[:, 1:2] * wfg[1:2, :]

    z = jax.nn.sigmoid(gates[:, 0:hdim])
    r = jax.nn.sigmoid(gates[:, hdim:2 * hdim])
    q = jnp.tanh(
        jnp.dot((r * net).astype(bf16), wqh_ref[...], preferred_element_type=f32)
        + gates[:, 2 * hdim:])
    new_net = (1.0 - z) * net + z * q
    net_o[...] = new_net

    # 2-wide flow head; coords integrated in-kernel (aliased output)
    delta = jnp.dot(new_net.astype(bf16), wfh_ref[...],
                    preferred_element_type=f32)          # (tm, 2)
    coords_o[...] = coords_ref[...] + delta


def gru_update(net, inp_b, cfp_b, coords, params):
    M, hd = net.shape
    tm = _pick_row_tile(M)
    weights = [params[k] for k in _GRU_WEIGHT_KEYS]

    def rows(c):
        return pl.BlockSpec((tm, c), lambda i: (i, 0))

    def resident(w):
        return pl.BlockSpec(w.shape, lambda i: (0, 0))

    in_specs = [rows(hd), rows(inp_b.shape[1]), rows(cfp_b.shape[1]), rows(2)]
    in_specs += [resident(w) for w in weights]
    out_shape = (jax.ShapeDtypeStruct((M, hd), jnp.float32),
                 jax.ShapeDtypeStruct((M, 2), jnp.float32))
    out_specs = (rows(hd), rows(2))
    return pl.pallas_call(
        functools.partial(_update_kernel, hdim=hd),
        out_shape=out_shape,
        grid=(M // tm,),
        in_specs=in_specs,
        out_specs=out_specs,
        input_output_aliases={0: 0, 3: 1},    # net and coords updated in place
        compiler_params=pltpu.CompilerParams(dimension_semantics=("parallel",)),
    )(net, inp_b, cfp_b, coords, *weights)


# ----------------------------------------------------------------------------
# JAX glue: coords grid, correlation pyramid + bilinear lookup (gather-heavy)
# TODO(synk): corr_lookup could be a Pallas VMEM-resident gather fused with
#             the motion encoder; kept in XLA here.
# ----------------------------------------------------------------------------
def coords_grid_cl(N, H, W):
    y, x = jnp.meshgrid(jnp.arange(H, dtype=jnp.float32),
                        jnp.arange(W, dtype=jnp.float32), indexing="ij")
    g = jnp.stack([x, y], axis=-1).reshape(H * W, 2)     # channel0 = x, 1 = y
    return jnp.tile(g, (N, 1))                            # (N*H*W, 2)


def _avg_pool2(x):
    B, H, W = x.shape
    return x.reshape(B, H // 2, 2, W // 2, 2).mean(
        axis=(2, 4), dtype=jnp.float32).astype(x.dtype)


def _bilinear_sample(img, xs, ys):
    # img: (B, H, W) bf16; xs, ys: (B, P).  align_corners=True, zero padding.
    B, H, W = img.shape
    x0 = jnp.floor(xs)
    y0 = jnp.floor(ys)
    x1 = x0 + 1.0
    y1 = y0 + 1.0
    wx1 = xs - x0
    wy1 = ys - y0
    wx0 = 1.0 - wx1
    wy0 = 1.0 - wy1
    flat = img.reshape(B, H * W)

    def gather(xi, yi):
        valid = (xi >= 0) & (xi <= W - 1) & (yi >= 0) & (yi <= H - 1)
        xc = jnp.clip(xi, 0, W - 1).astype(jnp.int32)
        yc = jnp.clip(yi, 0, H - 1).astype(jnp.int32)
        vals = jnp.take_along_axis(flat, yc * W + xc, axis=1).astype(jnp.float32)
        return jnp.where(valid, vals, 0.0)

    return (gather(x0, y0) * wx0 * wy0 + gather(x1, y0) * wx1 * wy0 +
            gather(x0, y1) * wx0 * wy1 + gather(x1, y1) * wx1 * wy1)


def corr_lookup(pyramid, coords_cl, radius):
    # pyramid[l]: (N*HW, Hl, Wl) bf16;  coords_cl: (M, 2) f32 channels-last.
    cx = coords_cl[:, 0]
    cy = coords_cl[:, 1]
    d = jnp.arange(-radius, radius + 1, dtype=jnp.float32)
    oy, ox = jnp.meshgrid(d, d, indexing="ij")
    ox = ox.reshape(-1)
    oy = oy.reshape(-1)
    feats = []
    for lvl, corr_l in enumerate(pyramid):
        scale = 2.0 ** lvl
        xs = cx[:, None] / scale + ox[None, :]
        ys = cy[:, None] / scale + oy[None, :]
        feats.append(_bilinear_sample(corr_l, xs, ys))
    return jnp.concatenate(feats, axis=-1)               # (M, CORR_DIM) f32


# ----------------------------------------------------------------------------
# parameters (deterministic, synthetic stand-ins; pre-fused GRU weights)
# ----------------------------------------------------------------------------
def init_params(key, n_first_channels):
    patch_dim = n_first_channels * 64                    # 8x8 patch, stride 8
    ks = iter(jax.random.split(key, 32))

    def w(shape, scale=None):
        s = (1.0 / (shape[0] ** 0.5)) if scale is None else scale
        return jax.random.normal(next(ks), shape, jnp.float32) * s

    bf = jnp.bfloat16
    # fused gate weight: rows = [net | inp | mf], cols = [z | r | q_x]
    # (net -> q_x block is structurally zero: q's hidden path uses r*net @ wqh)
    w_gate = jnp.concatenate([
        jnp.concatenate([w((HDIM, HDIM)), w((HDIM, HDIM)),
                         jnp.zeros((HDIM, HDIM), jnp.float32)], axis=1),
        jnp.concatenate([w((CDIM, HDIM)), w((CDIM, HDIM)), w((CDIM, HDIM))],
                        axis=1),
        jnp.concatenate([w((MDIM, HDIM)), w((MDIM, HDIM)), w((MDIM, HDIM))],
                        axis=1),
    ], axis=0)
    w_fgate = jnp.concatenate([w((2, HDIM)), w((2, HDIM)), w((2, HDIM))], axis=1)
    params = {
        "w_fnet": w((patch_dim, FDIM)),
        "w_trans": w((FDIM, FDIM)),
        "w_cnet": w((patch_dim, HDIM + CDIM)),
        "w_menc": w((CFP_DIM, MDIM)).astype(bf),          # input is [flow|corr|pad]
        "w_gate": w_gate.astype(bf),                      # (384, 384)
        "w_fgate": w_fgate,                               # (2, 384) f32, VPU path
        "wqh": w((HDIM, HDIM)).astype(bf),
        "wfh": w((HDIM, 2), scale=0.1 / (HDIM ** 0.5)).astype(bf),
    }
    return params


# ----------------------------------------------------------------------------
# forward
# ----------------------------------------------------------------------------
def kpaflow_forward(params, events1, events2, iters=12):
    N, Cin, H, W = events1.shape
    assert H % 8 == 0 and W % 8 == 0
    H8, W8 = H // 8, W // 8
    assert H8 % (1 << (CORR_LEVELS - 1)) == 0 and W8 % (1 << (CORR_LEVELS - 1)) == 0
    HW = H8 * W8
    M = N * HW
    bf16 = jnp.bfloat16

    def patchify(img):
        p = img.reshape(N, Cin, H8, 8, W8, 8)
        p = p.transpose(0, 2, 4, 1, 3, 5)                # N,H8,W8,Cin,8,8
        return p.reshape(M, Cin * 64)

    p1 = patchify(events1)
    p2 = patchify(events2)

    # frame 1: fnet + cnet fused (single read of p1); frame 2: fnet only
    f1_raw, net, inp = encode_frame1(p1, params["w_fnet"], params["w_cnet"], HDIM)
    f2_raw = pallas_matmul(p2, params["w_fnet"], out_dtype=bf16)

    # KPAEnc trans (stand-in), shared projection
    f1 = pallas_matmul(f1_raw, params["w_trans"], out_dtype=bf16)
    f2 = pallas_matmul(f2_raw, params["w_trans"], out_dtype=bf16)

    # all-pairs correlation volume (bf16 writeback) + bf16 pyramid
    D = f1.shape[-1]
    corr0 = all_pairs_corr(f1.reshape(N, HW, D), f2.reshape(N, HW, D))
    lvl = corr0.reshape(N * HW, H8, W8)
    pyramid = [lvl]
    for _ in range(CORR_LEVELS - 1):
        lvl = _avg_pool2(lvl)
        pyramid.append(lvl)

    coords0 = coords_grid_cl(N, H8, W8)                  # (M, 2) channels-last
    pad_cols = CFP_DIM - CORR_DIM - 2

    def body(_, carry):
        coords1, net_state = carry
        flow = coords1 - coords0                         # (M, 2) f32
        corr_feat = corr_lookup(pyramid, coords1, CORR_RADIUS)   # (M, 324) f32
        cfp = jnp.concatenate(
            [flow.astype(bf16), corr_feat.astype(bf16),
             jnp.zeros((M, pad_cols), bf16)], axis=-1)   # (M, 384) bf16
        net_state, coords1 = gru_update(net_state, inp, cfp, coords1, params)
        return coords1, net_state

    coords1, _ = lax.fori_loop(0, iters, body, (coords0, net))
    flow = coords1 - coords0
    # single layout transform at the very end -> (N, 2, H/8, W/8)
    return flow.reshape(N, H8, W8, 2).transpose(0, 3, 1, 2)


# ----------------------------------------------------------------------------
if __name__ == "__main__":
    key = jax.random.PRNGKey(0)
    k_p, k1, k2 = jax.random.split(key, 3)

    N, Cin, H, W = 2, 5, 64, 64          # small, /8-divisible, 4-level pyramid
    params = init_params(k_p, Cin)
    events1 = jax.random.normal(k1, (N, Cin, H, W), jnp.float32)
    events2 = jax.random.normal(k2, (N, Cin, H, W), jnp.float32)

    fwd = jax.jit(functools.partial(kpaflow_forward, iters=12))
    flow = jax.block_until_ready(fwd(params, events1, events2))

    assert flow.shape == (N, 2, H // 8, W // 8)
    assert bool(jnp.all(jnp.isfinite(flow)))
    print("KERNEL_OK")
</pallas_src>

<mosaic_0001>
module attributes {stable_mosaic.version = 11 : i64} {
  func.func private @main(%arg0: i32) attributes {dimension_semantics = [#tpu.dimension_semantics<core_parallel>], iteration_bounds = array<i64: 2>, tpu.core_type = #tpu.core_type<sc_scalar_subcore>, window_params = []} {
    return
  }
}

module attributes {stable_mosaic.version = 11 : i64} {
  func.func private @main(%arg0: i32) attributes {dimension_semantics = [#tpu.dimension_semantics<core_parallel>], iteration_bounds = array<i64: 2>, tpu.core_type = #tpu.core_type<sc_scalar_subcore>, window_params = []} {
    return
  }
}

module attributes {stable_mosaic.version = 11 : i64} {
  func.func @_enc1_kernel(%arg0: i32, %arg1: memref<128x320xbf16, #tpu.memory_space<vmem>>, %arg2: memref<320x512xbf16, #tpu.memory_space<vmem>>, %arg3: memref<128x256xbf16, #tpu.memory_space<vmem>>, %arg4: memref<128x128xf32, #tpu.memory_space<vmem>>, %arg5: memref<128x128xbf16, #tpu.memory_space<vmem>>) attributes {dimension_semantics = [#tpu.dimension_semantics<parallel>], iteration_bounds = array<i64: 1>, scalar_prefetch = 0 : i64, scratch_operands = 0 : i64, tpu.core_type = #tpu.core_type<tc>, window_params = [{transform_indices = @transform_0, window_bounds = array<i64: 128, 320>}, {pipeline_mode = #tpu.pipeline_mode<synchronous>, transform_indices = @transform_1, window_bounds = array<i64: 320, 512>}, {transform_indices = @transform_2, window_bounds = array<i64: 128, 256>}, {transform_indices = @transform_3, window_bounds = array<i64: 128, 128>}, {transform_indices = @transform_4, window_bounds = array<i64: 128, 128>}]} {
    %c0 = arith.constant 0 : index
    %c0_0 = arith.constant 0 : index
    %0 = vector.load %arg1[%c0, %c0_0] : memref<128x320xbf16, #tpu.memory_space<vmem>>, vector<128x320xbf16>
    %c0_1 = arith.constant 0 : index
    %c0_2 = arith.constant 0 : index
    %1 = vector.load %arg2[%c0_1, %c0_2] : memref<320x512xbf16, #tpu.memory_space<vmem>>, vector<320x512xbf16>
    %cst = arith.constant dense<0.000000e+00> : vector<128x512xf32>
    %2 = tpu.matmul %0, %1, %cst {dimension_numbers = #tpu.dot_dimension_numbers<[1], [0], [0], [1], [0, 0, 1, 1], [], []>} : vector<128x320xbf16>, vector<320x512xbf16>, vector<128x512xf32> -> vector<128x512xf32>
    %3 = vector.extract_strided_slice %2 {offsets = [0, 0], sizes = [128, 256], strides = [1, 1]} : vector<128x512xf32> to vector<128x256xf32>
    %4 = arith.truncf %3 : vector<128x256xf32> to vector<128x256xbf16>
    %c0_3 = arith.constant 0 : index
    %c0_4 = arith.constant 0 : index
    %5 = vector.load %arg3[%c0_3, %c0_4] : memref<128x256xbf16, #tpu.memory_space<vmem>>, vector<128x256xbf16>
    tpu.vector_store %arg3[%c0_3, %c0_4], %4 {strides = array<i32>} : memref<128x256xbf16, #tpu.memory_space<vmem>>, vector<128x256xbf16>,
    %6 = vector.extract_strided_slice %2 {offsets = [0, 256], sizes = [128, 128], strides = [1, 1]} : vector<128x512xf32> to vector<128x128xf32>
    %7 = math.tanh %6 : vector<128x128xf32>
    %c0_5 = arith.constant 0 : index
    %c0_6 = arith.constant 0 : index
    %8 = vector.load %arg4[%c0_5, %c0_6] : memref<128x128xf32, #tpu.memory_space<vmem>>, vector<128x128xf32>
    tpu.vector_store %arg4[%c0_5, %c0_6], %7 {strides = array<i32>} : memref<128x128xf32, #tpu.memory_space<vmem>>, vector<128x128xf32>,
    %9 = vector.extract_strided_slice %2 {offsets = [0, 384], sizes = [128, 128], strides = [1, 1]} : vector<128x512xf32> to vector<128x128xf32>
    %cst_7 = arith.constant 0.000000e+00 : f32
    %10 = vector.broadcast %cst_7 : f32 to vector<128x128xf32>
    %11 = arith.maximumf %9, %10 : vector<128x128xf32>
    %12 = arith.truncf %11 : vector<128x128xf32> to vector<128x128xbf16>
    %c0_8 = arith.constant 0 : index
    %c0_9 = arith.constant 0 : index
    %13 = vector.load %arg5[%c0_8, %c0_9] : memref<128x128xbf16, #tpu.memory_space<vmem>>, vector<128x128xbf16>
    tpu.vector_store %arg5[%c0_8, %c0_9], %12 {strides = array<i32>} : memref<128x128xbf16, #tpu.memory_space<vmem>>, vector<128x128xbf16>,
    return
  }
  func.func @transform_0(%arg0: i32) -> (i32, i32) {
    %c0_i32 = arith.constant 0 : i32
    %c0_i32_0 = arith.constant 0 : i32
    return %arg0, %c0_i32 : i32, i32
  }
  func.func @transform_1(%arg0: i32) -> (i32, i32) {
    %c0_i32 = arith.constant 0 : i32
    %c0_i32_0 = arith.constant 0 : i32
    %c0_i32_1 = arith.constant 0 : i32
    return %c0_i32, %c0_i32_0 : i32, i32
  }
  func.func @transform_2(%arg0: i32) -> (i32, i32) {
    %c0_i32 = arith.constant 0 : i32
    %c0_i32_0 = arith.constant 0 : i32
    return %arg0, %c0_i32 : i32, i32
  }
  func.func @transform_3(%arg0: i32) -> (i32, i32) {
    %c0_i32 = arith.constant 0 : i32
    %c0_i32_0 = arith.constant 0 : i32
    return %arg0, %c0_i32 : i32, i32
  }
  func.func @transform_4(%arg0: i32) -> (i32, i32) {
    %c0_i32 = arith.constant 0 : i32
    %c0_i32_0 = arith.constant 0 : i32
    return %arg0, %c0_i32 : i32, i32
  }
}

module attributes {stable_mosaic.version = 11 : i64} {
  func.func @_mm_single_kernel(%arg0: i32, %arg1: i32, %arg2: memref<128x256xbf16, #tpu.memory_space<vmem>>, %arg3: memref<256x256xbf16, #tpu.memory_space<vmem>>, %arg4: memref<128x256xbf16, #tpu.memory_space<vmem>>) attributes {dimension_semantics = [#tpu.dimension_semantics<parallel>, #tpu.dimension_semantics<parallel>], iteration_bounds = array<i64: 1, 1>, scalar_prefetch = 0 : i64, scratch_operands = 0 : i64, tpu.core_type = #tpu.core_type<tc>, window_params = [{transform_indices = @transform_0, window_bounds = array<i64: 128, 256>}, {transform_indices = @transform_1, window_bounds = array<i64: 256, 256>}, {transform_indices = @transform_2, window_bounds = array<i64: 128, 256>}]} {
    %c0 = arith.constant 0 : index
    %c0_0 = arith.constant 0 : index
    %0 = vector.load %arg2[%c0, %c0_0] : memref<128x256xbf16, #tpu.memory_space<vmem>>, vector<128x256xbf16>
    %c0_1 = arith.constant 0 : index
    %c0_2 = arith.constant 0 : index
    %1 = vector.load %arg3[%c0_1, %c0_2] : memref<256x256xbf16, #tpu.memory_space<vmem>>, vector<256x256xbf16>
    %cst = arith.constant dense<0.000000e+00> : vector<128x256xf32>
    %2 = tpu.matmul %0, %1, %cst {dimension_numbers = #tpu.dot_dimension_numbers<[1], [0], [0], [1], [0, 0, 1, 1], [], []>} : vector<128x256xbf16>, vector<256x256xbf16>, vector<128x256xf32> -> vector<128x256xf32>
    %3 = arith.truncf %2 : vector<128x256xf32> to vector<128x256xbf16>
    %c0_3 = arith.constant 0 : index
    %c0_4 = arith.constant 0 : index
    %4 = vector.load %arg4[%c0_3, %c0_4] : memref<128x256xbf16, #tpu.memory_space<vmem>>, vector<128x256xbf16>
    tpu.vector_store %arg4[%c0_3, %c0_4], %3 {strides = array<i32>} : memref<128x256xbf16, #tpu.memory_space<vmem>>, vector<128x256xbf16>,
    return
  }
  func.func @transform_0(%arg0: i32, %arg1: i32) -> (i32, i32) {
    %c0_i32 = arith.constant 0 : i32
    %c0_i32_0 = arith.constant 0 : i32
    return %arg0, %c0_i32 : i32, i32
  }
  func.func @transform_1(%arg0: i32, %arg1: i32) -> (i32, i32) {
    %c0_i32 = arith.constant 0 : i32
    %c0_i32_0 = arith.constant 0 : i32
    return %c0_i32, %arg1 : i32, i32
  }
  func.func @transform_2(%arg0: i32, %arg1: i32) -> (i32, i32) {
    %c0_i32 = arith.constant 0 : i32
    return %arg0, %arg1 : i32, i32
  }
}

module attributes {stable_mosaic.version = 11 : i64} {
  func.func @_mm_single_kernel(%arg0: i32, %arg1: i32, %arg2: memref<128x320xbf16, #tpu.memory_space<vmem>>, %arg3: memref<320x256xbf16, #tpu.memory_space<vmem>>, %arg4: memref<128x256xbf16, #tpu.memory_space<vmem>>) attributes {dimension_semantics = [#tpu.dimension_semantics<parallel>, #tpu.dimension_semantics<parallel>], iteration_bounds = array<i64: 1, 1>, scalar_prefetch = 0 : i64, scratch_operands = 0 : i64, tpu.core_type = #tpu.core_type<tc>, window_params = [{transform_indices = @transform_0, window_bounds = array<i64: 128, 320>}, {transform_indices = @transform_1, window_bounds = array<i64: 320, 256>}, {transform_indices = @transform_2, window_bounds = array<i64: 128, 256>}]} {
    %c0 = arith.constant 0 : index
    %c0_0 = arith.constant 0 : index
    %0 = vector.load %arg2[%c0, %c0_0] : memref<128x320xbf16, #tpu.memory_space<vmem>>, vector<128x320xbf16>
    %c0_1 = arith.constant 0 : index
    %c0_2 = arith.constant 0 : index
    %1 = vector.load %arg3[%c0_1, %c0_2] : memref<320x256xbf16, #tpu.memory_space<vmem>>, vector<320x256xbf16>
    %cst = arith.constant dense<0.000000e+00> : vector<128x256xf32>
    %2 = tpu.matmul %0, %1, %cst {dimension_numbers = #tpu.dot_dimension_numbers<[1], [0], [0], [1], [0, 0, 1, 1], [], []>} : vector<128x320xbf16>, vector<320x256xbf16>, vector<128x256xf32> -> vector<128x256xf32>
    %3 = arith.truncf %2 : vector<128x256xf32> to vector<128x256xbf16>
    %c0_3 = arith.constant 0 : index
    %c0_4 = arith.constant 0 : index
    %4 = vector.load %arg4[%c0_3, %c0_4] : memref<128x256xbf16, #tpu.memory_space<vmem>>, vector<128x256xbf16>
    tpu.vector_store %arg4[%c0_3, %c0_4], %3 {strides = array<i32>} : memref<128x256xbf16, #tpu.memory_space<vmem>>, vector<128x256xbf16>,
    return
  }
  func.func @transform_0(%arg0: i32, %arg1: i32) -> (i32, i32) {
    %c0_i32 = arith.constant 0 : i32
    %c0_i32_0 = arith.constant 0 : i32
    return %arg0, %c0_i32 : i32, i32
  }
  func.func @transform_1(%arg0: i32, %arg1: i32) -> (i32, i32) {
    %c0_i32 = arith.constant 0 : i32
    %c0_i32_0 = arith.constant 0 : i32
    return %c0_i32, %arg1 : i32, i32
  }
  func.func @transform_2(%arg0: i32, %arg1: i32) -> (i32, i32) {
    %c0_i32 = arith.constant 0 : i32
    return %arg0, %arg1 : i32, i32
  }
}

module attributes {stable_mosaic.version = 11 : i64} {
  func.func @_corr_kernel(%arg0: i32, %arg1: i32, %arg2: i32, %arg3: memref<1x64x256xbf16, #tpu.memory_space<vmem>>, %arg4: memref<1x64x256xbf16, #tpu.memory_space<vmem>>, %arg5: memref<1x64x64xbf16, #tpu.memory_space<vmem>>) attributes {dimension_semantics = [#tpu.dimension_semantics<parallel>, #tpu.dimension_semantics<parallel>, #tpu.dimension_semantics<parallel>], iteration_bounds = array<i64: 2, 1, 1>, scalar_prefetch = 0 : i64, scratch_operands = 0 : i64, tpu.core_type = #tpu.core_type<tc>, window_params = [{transform_indices = @transform_0, window_bounds = array<i64: 1, 64, 256>}, {transform_indices = @transform_1, window_bounds = array<i64: 1, 64, 256>}, {transform_indices = @transform_2, window_bounds = array<i64: 1, 64, 64>}]} {
    %c0 = arith.constant 0 : index
    %c0_0 = arith.constant 0 : index
    %c0_1 = arith.constant 0 : index
    %0 = vector.load %arg3[%c0, %c0_0, %c0_1] : memref<1x64x256xbf16, #tpu.memory_space<vmem>>, vector<1x64x256xbf16>
    %1 = vector.shape_cast %0 : vector<1x64x256xbf16> to vector<64x256xbf16>
    %c0_2 = arith.constant 0 : index
    %c0_3 = arith.constant 0 : index
    %c0_4 = arith.constant 0 : index
    %2 = vector.load %arg4[%c0_2, %c0_3, %c0_4] : memref<1x64x256xbf16, #tpu.memory_space<vmem>>, vector<1x64x256xbf16>
    %3 = vector.shape_cast %2 : vector<1x64x256xbf16> to vector<64x256xbf16>
    %cst = arith.constant dense<0.000000e+00> : vector<64x64xf32>
    %4 = tpu.matmul %1, %3, %cst {dimension_numbers = #tpu.dot_dimension_numbers<[1], [1], [0], [0], [0, 0, 1, 0], [], []>} : vector<64x256xbf16>, vector<64x256xbf16>, vector<64x64xf32> -> vector<64x64xf32>
    %cst_5 = arith.constant 6.250000e-02 : f32
    %5 = vector.broadcast %cst_5 : f32 to vector<64x64xf32>
    %6 = arith.mulf %4, %5 : vector<64x64xf32>
    %7 = arith.truncf %6 : vector<64x64xf32> to vector<64x64xbf16>
    %c0_6 = arith.constant 0 : index
    %c0_7 = arith.constant 0 : index
    %c0_8 = arith.constant 0 : index
    %8 = vector.load %arg5[%c0_6, %c0_7, %c0_8] : memref<1x64x64xbf16, #tpu.memory_space<vmem>>, vector<1x64x64xbf16>
    %9 = vector.shape_cast %8 : vector<1x64x64xbf16> to vector<64x64xbf16>
    %10 = vector.shape_cast %7 : vector<64x64xbf16> to vector<1x64x64xbf16>
    tpu.vector_store %arg5[%c0_6, %c0_7, %c0_8], %10 {strides = array<i32>} : memref<1x64x64xbf16, #tpu.memory_space<vmem>>, vector<1x64x64xbf16>,
    return
  }
  func.func @transform_0(%arg0: i32, %arg1: i32, %arg2: i32) -> (i32, i32, i32) {
    %c0_i32 = arith.constant 0 : i32
    %c0_i32_0 = arith.constant 0 : i32
    return %arg0, %arg1, %c0_i32 : i32, i32, i32
  }
  func.func @transform_1(%arg0: i32, %arg1: i32, %arg2: i32) -> (i32, i32, i32) {
    %c0_i32 = arith.constant 0 : i32
    %c0_i32_0 = arith.constant 0 : i32
    return %arg0, %arg2, %c0_i32 : i32, i32, i32
  }
  func.func @transform_2(%arg0: i32, %arg1: i32, %arg2: i32) -> (i32, i32, i32) {
    %c0_i32 = arith.constant 0 : i32
    return %arg0, %arg1, %arg2 : i32, i32, i32
  }
}

module attributes {stable_mosaic.version = 11 : i64} {
  func.func @_update_kernel(%arg0: i32, %arg1: memref<128x128xf32, #tpu.memory_space<vmem>>, %arg2: memref<128x128xbf16, #tpu.memory_space<vmem>>, %arg3: memref<128x384xbf16, #tpu.memory_space<vmem>>, %arg4: memref<128x2xf32, #tpu.memory_space<vmem>>, %arg5: memref<384x128xbf16, #tpu.memory_space<vmem>>, %arg6: memref<384x384xbf16, #tpu.memory_space<vmem>>, %arg7: memref<2x384xf32, #tpu.memory_space<vmem>>, %arg8: memref<128x128xbf16, #tpu.memory_space<vmem>>, %arg9: memref<128x2xbf16, #tpu.memory_space<vmem>>, %arg10: memref<128x128xf32, #tpu.memory_space<vmem>>, %arg11: memref<128x2xf32, #tpu.memory_space<vmem>>) attributes {dimension_semantics = [#tpu.dimension_semantics<parallel>], iteration_bounds = array<i64: 1>, scalar_prefetch = 0 : i64, scratch_operands = 0 : i64, tpu.core_type = #tpu.core_type<tc>, window_params = [{transform_indices = @transform_0, window_bounds = array<i64: 128, 128>}, {transform_indices = @transform_1, window_bounds = array<i64: 128, 128>}, {transform_indices = @transform_2, window_bounds = array<i64: 128, 384>}, {transform_indices = @transform_3, window_bounds = array<i64: 128, 2>}, {pipeline_mode = #tpu.pipeline_mode<synchronous>, transform_indices = @transform_4, window_bounds = array<i64: 384, 128>}, {pipeline_mode = #tpu.pipeline_mode<synchronous>, transform_indices = @transform_5, window_bounds = array<i64: 384, 384>}, {pipeline_mode = #tpu.pipeline_mode<synchronous>, transform_indices = @transform_6, window_bounds = array<i64: 2, 384>}, {pipeline_mode = #tpu.pipeline_mode<synchronous>, transform_indices = @transform_7, window_bounds = array<i64: 128, 128>}, {pipeline_mode = #tpu.pipeline_mode<synchronous>, transform_indices = @transform_8, window_bounds = array<i64: 128, 2>}, {transform_indices = @transform_9, window_bounds = array<i64: 128, 128>}, {transform_indices = @transform_10, window_bounds = array<i64: 128, 2>}]} {
    %c0 = arith.constant 0 : index
    %c0_0 = arith.constant 0 : index
    %0 = vector.load %arg1[%c0, %c0_0] : memref<128x128xf32, #tpu.memory_space<vmem>>, vector<128x128xf32>
    %c0_1 = arith.constant 0 : index
    %c0_2 = arith.constant 0 : index
    %1 = vector.load %arg2[%c0_1, %c0_2] : memref<128x128xbf16, #tpu.memory_space<vmem>>, vector<128x128xbf16>
    %c0_3 = arith.constant 0 : index
    %c0_4 = arith.constant 0 : index
    %2 = vector.load %arg3[%c0_3, %c0_4] : memref<128x384xbf16, #tpu.memory_space<vmem>>, vector<128x384xbf16>
    %3 = vector.extract_strided_slice %2 {offsets = [0, 0], sizes = [128, 2], strides = [1, 1]} : vector<128x384xbf16> to vector<128x2xbf16>
    %4 = arith.extf %3 : vector<128x2xbf16> to vector<128x2xf32>
    %c0_5 = arith.constant 0 : index
    %c0_6 = arith.constant 0 : index
    %5 = vector.load %arg5[%c0_5, %c0_6] : memref<384x128xbf16, #tpu.memory_space<vmem>>, vector<384x128xbf16>
    %cst = arith.constant dense<0.000000e+00> : vector<128x128xf32>
    %6 = tpu.matmul %2, %5, %cst {dimension_numbers = #tpu.dot_dimension_numbers<[1], [0], [0], [1], [0, 0, 1, 1], [], []>} : vector<128x384xbf16>, vector<384x128xbf16>, vector<128x128xf32> -> vector<128x128xf32>
    %cst_7 = arith.constant 0.000000e+00 : f32
    %7 = vector.broadcast %cst_7 : f32 to vector<128x128xf32>
    %8 = arith.maximumf %6, %7 : vector<128x128xf32>
    %9 = arith.truncf %0 : vector<128x128xf32> to vector<128x128xbf16>
    %10 = arith.truncf %8 : vector<128x128xf32> to vector<128x128xbf16>
    %11 = tpu.concatenate %9, %1, %10 in 1 : vector<128x128xbf16>, vector<128x128xbf16>, vector<128x128xbf16> -> vector<128x384xbf16>
    %c0_8 = arith.constant 0 : index
    %c0_9 = arith.constant 0 : index
    %12 = vector.load %arg6[%c0_8, %c0_9] : memref<384x384xbf16, #tpu.memory_space<vmem>>, vector<384x384xbf16>
    %cst_10 = arith.constant dense<0.000000e+00> : vector<128x384xf32>
    %13 = tpu.matmul %11, %12, %cst_10 {dimension_numbers = #tpu.dot_dimension_numbers<[1], [0], [0], [1], [0, 0, 1, 1], [], []>} : vector<128x384xbf16>, vector<384x384xbf16>, vector<128x384xf32> -> vector<128x384xf32>
    %c0_11 = arith.constant 0 : index
    %c0_12 = arith.constant 0 : index
    %14 = vector.load %arg7[%c0_11, %c0_12] : memref<2x384xf32, #tpu.memory_space<vmem>>, vector<2x384xf32>
    %15 = vector.extract_strided_slice %4 {offsets = [0, 0], sizes = [128, 1], strides = [1, 1]} : vector<128x2xf32> to vector<128x1xf32>
    %16 = vector.extract_strided_slice %14 {offsets = [0, 0], sizes = [1, 384], strides = [1, 1]} : vector<2x384xf32> to vector<1x384xf32>
    %17 = vector.broadcast %15 : vector<128x1xf32> to vector<128x384xf32>
    %18 = vector.broadcast %16 : vector<1x384xf32> to vector<128x384xf32>
    %19 = arith.mulf %17, %18 : vector<128x384xf32>
    %20 = arith.addf %13, %19 : vector<128x384xf32>
    %21 = vector.extract_strided_slice %4 {offsets = [0, 1], sizes = [128, 1], strides = [1, 1]} : vector<128x2xf32> to vector<128x1xf32>
    %22 = vector.extract_strided_slice %14 {offsets = [1, 0], sizes = [1, 384], strides = [1, 1]} : vector<2x384xf32> to vector<1x384xf32>
    %23 = vector.broadcast %21 : vector<128x1xf32> to vector<128x384xf32>
    %24 = vector.broadcast %22 : vector<1x384xf32> to vector<128x384xf32>
    %25 = arith.mulf %23, %24 : vector<128x384xf32>
    %26 = arith.addf %20, %25 : vector<128x384xf32>
    %27 = vector.extract_strided_slice %26 {offsets = [0, 0], sizes = [128, 128], strides = [1, 1]} : vector<128x384xf32> to vector<128x128xf32>
    %28 = arith.negf %27 : vector<128x128xf32>
    %29 = math.exp %28 : vector<128x128xf32>
    %cst_13 = arith.constant 1.000000e+00 : f32
    %30 = vector.broadcast %cst_13 : f32 to vector<128x128xf32>
    %31 = arith.addf %30, %29 : vector<128x128xf32>
    %32 = arith.divf %30, %31 : vector<128x128xf32>
    %33 = vector.extract_strided_slice %26 {offsets = [0, 128], sizes = [128, 128], strides = [1, 1]} : vector<128x384xf32> to vector<128x128xf32>
    %34 = arith.negf %33 : vector<128x128xf32>
    %35 = math.exp %34 : vector<128x128xf32>
    %cst_14 = arith.constant 1.000000e+00 : f32
    %36 = vector.broadcast %cst_14 : f32 to vector<128x128xf32>
    %37 = arith.addf %36, %35 : vector<128x128xf32>
    %38 = arith.divf %36, %37 : vector<128x128xf32>
    %39 = arith.mulf %38, %0 : vector<128x128xf32>
    %40 = arith.truncf %39 : vector<128x128xf32> to vector<128x128xbf16>
    %c0_15 = arith.constant 0 : index
    %c0_16 = arith.constant 0 : index
    %41 = vector.load %arg8[%c0_15, %c0_16] : memref<128x128xbf16, #tpu.memory_space<vmem>>, vector<128x128xbf16>
    %cst_17 = arith.constant dense<0.000000e+00> : vector<128x128xf32>
    %42 = tpu.matmul %40, %41, %cst_17 {dimension_numbers = #tpu.dot_dimension_numbers<[1], [0], [0], [1], [0, 0, 1, 1], [], []>} : vector<128x128xbf16>, vector<128x128xbf16>, vector<128x128xf32> -> vector<128x128xf32>
    %43 = vector.extract_strided_slice %26 {offsets = [0, 256], sizes = [128, 128], strides = [1, 1]} : vector<128x384xf32> to vector<128x128xf32>
    %44 = arith.addf %42, %43 : vector<128x128xf32>
    %45 = math.tanh %44 : vector<128x128xf32>
    %cst_18 = arith.constant 1.000000e+00 : f32
    %46 = vector.broadcast %cst_18 : f32 to vector<128x128xf32>
    %47 = arith.subf %46, %32 : vector<128x128xf32>
    %48 = arith.mulf %47, %0 : vector<128x128xf32>
    %49 = arith.mulf %32, %45 : vector<128x128xf32>
    %50 = arith.addf %48, %49 : vector<128x128xf32>
    %c0_19 = arith.constant 0 : index
    %c0_20 = arith.constant 0 : index
    %51 = vector.load %arg10[%c0_19, %c0_20] : memref<128x128xf32, #tpu.memory_space<vmem>>, vector<128x128xf32>
    tpu.vector_store %arg10[%c0_19, %c0_20], %50 {strides = array<i32>} : memref<128x128xf32, #tpu.memory_space<vmem>>, vector<128x128xf32>,
    %52 = arith.truncf %50 : vector<128x128xf32> to vector<128x128xbf16>
    %c0_21 = arith.constant 0 : index
    %c0_22 = arith.constant 0 : index
    %53 = vector.load %arg9[%c0_21, %c0_22] : memref<128x2xbf16, #tpu.memory_space<vmem>>, vector<128x2xbf16>
    %cst_23 = arith.constant dense<0.000000e+00> : vector<128x2xf32>
    %54 = tpu.matmul %52, %53, %cst_23 {dimension_numbers = #tpu.dot_dimension_numbers<[1], [0], [0], [1], [0, 0, 1, 1], [], []>} : vector<128x128xbf16>, vector<128x2xbf16>, vector<128x2xf32> -> vector<128x2xf32>
    %c0_24 = arith.constant 0 : index
    %c0_25 = arith.constant 0 : index
    %55 = vector.load %arg4[%c0_24, %c0_25] : memref<128x2xf32, #tpu.memory_space<vmem>>, vector<128x2xf32>
    %56 = arith.addf %55, %54 : vector<128x2xf32>
    %c0_26 = arith.constant 0 : index
    %c0_27 = arith.constant 0 : index
    %57 = vector.load %arg11[%c0_26, %c0_27] : memref<128x2xf32, #tpu.memory_space<vmem>>, vector<128x2xf32>
    tpu.vector_store %arg11[%c0_26, %c0_27], %56 {strides = array<i32>} : memref<128x2xf32, #tpu.memory_space<vmem>>, vector<128x2xf32>,
    return
  }
  func.func @transform_0(%arg0: i32) -> (i32, i32) {
    %c0_i32 = arith.constant 0 : i32
    %c0_i32_0 = arith.constant 0 : i32
    return %arg0, %c0_i32 : i32, i32
  }
  func.func @transform_1(%arg0: i32) -> (i32, i32) {
    %c0_i32 = arith.constant 0 : i32
    %c0_i32_0 = arith.constant 0 : i32
    return %arg0, %c0_i32 : i32, i32
  }
  func.func @transform_2(%arg0: i32) -> (i32, i32) {
    %c0_i32 = arith.constant 0 : i32
    %c0_i32_0 = arith.constant 0 : i32
    return %arg0, %c0_i32 : i32, i32
  }
  func.func @transform_3(%arg0: i32) -> (i32, i32) {
    %c0_i32 = arith.constant 0 : i32
    %c0_i32_0 = arith.constant 0 : i32
    return %arg0, %c0_i32 : i32, i32
  }
  func.func @transform_4(%arg0: i32) -> (i32, i32) {
    %c0_i32 = arith.constant 0 : i32
    %c0_i32_0 = arith.constant 0 : i32
    %c0_i32_1 = arith.constant 0 : i32
    return %c0_i32, %c0_i32_0 : i32, i32
  }
  func.func @transform_5(%arg0: i32) -> (i32, i32) {
    %c0_i32 = arith.constant 0 : i32
    %c0_i32_0 = arith.constant 0 : i32
    %c0_i32_1 = arith.constant 0 : i32
    return %c0_i32, %c0_i32_0 : i32, i32
  }
  func.func @transform_6(%arg0: i32) -> (i32, i32) {
    %c0_i32 = arith.constant 0 : i32
    %c0_i32_0 = arith.constant 0 : i32
    %c0_i32_1 = arith.constant 0 : i32
    return %c0_i32, %c0_i32_0 : i32, i32
  }
  func.func @transform_7(%arg0: i32) -> (i32, i32) {
    %c0_i32 = arith.constant 0 : i32
    %c0_i32_0 = arith.constant 0 : i32
    %c0_i32_1 = arith.constant 0 : i32
    return %c0_i32, %c0_i32_0 : i32, i32
  }
  func.func @transform_8(%arg0: i32) -> (i32, i32) {
    %c0_i32 = arith.constant 0 : i32
    %c0_i32_0 = arith.constant 0 : i32
    %c0_i32_1 = arith.constant 0 : i32
    return %c0_i32, %c0_i32_0 : i32, i32
  }
  func.func @transform_9(%arg0: i32) -> (i32, i32) {
    %c0_i32 = arith.constant 0 : i32
    %c0_i32_0 = arith.constant 0 : i32
    return %arg0, %c0_i32 : i32, i32
  }
  func.func @transform_10(%arg0: i32) -> (i32, i32) {
    %c0_i32 = arith.constant 0 : i32
    %c0_i32_0 = arith.constant 0 : i32
    return %arg0, %c0_i32 : i32, i32
  }
}

</mosaic_0001>

<bundles_post_ra>
// kernel: kpaflow_forward.5
= control target key start
LH: loop header
LB: loop body
LE: loop exit
PB: predicated region body
PF: predicated region fallthrough
CT: control target
= control target key end

     0   :  { %10 = vsyncpa [#allocation3], 0  ;;  %s2368_s0 = inlined_call_operand.vmem [shape: bf16[128,320], index: 0, kind: input, shape index: {}]   ;;  %s2369_s1 = inlined_call_operand.vmem [shape: bf16[320,512], index: 1, kind: input, shape index: {}]   ;;  %s2370_s2 = inlined_call_operand.vmem [shape: bf16[128,256], index: 2, kind: output, shape index: {0}]   ;;  %s2371_s3 = inlined_call_operand.hbm [shape: f32[128,128], index: 3, kind: output, shape index: {1}]   ;;  %s2372_s4 = inlined_call_operand.hbm [shape: bf16[128,128], index: 4, kind: output, shape index: {2}]  }
   0x1   :  { %v1704_v0 = vld [vmem:[%s2369_s1 + $0x4] ss:$16 sps:$4 sm:$0xff]   ;;  %v1706_v1 = vld [vmem:[%s2369_s1 + $0xc] ss:$16 sps:$4 sm:$0xff]   ;;  %v1708_v2 = vld [vmem:[%s2369_s1] ss:$16 sps:$4 sm:$0xff]  }
   0x2   :  { %674 = vmatprep.subr.bf16.mxu0 %v1704_v0  ;;  %v1709_v3 = vld [vmem:[%s2369_s1 + $0x8] ss:$16 sps:$4 sm:$0xff]   ;;  %900 = vmatprep.subr.bf16.mxu1 %v1706_v1  ;;  %v1710_v4 = vld [vmem:[%s2369_s1 + $0x24] ss:$16 sps:$4 sm:$0xff]   ;;  %v1712_v5 = vld [vmem:[%s2369_s1 + $0x2c] ss:$16 sps:$4 sm:$0xff]  }
   0x3   :  { %675 = vmatpush1.bf16.msra.mxu0 %v1708_v2  ;;  %901 = vmatpush1.bf16.msra.mxu1 %v1709_v3  ;;  %v1714_v6 = vld [vmem:[%s2369_s1 + $0x20] ss:$16 sps:$4 sm:$0xff]   ;;  %v1715_v7 = vld [vmem:[%s2369_s1 + $0x28] ss:$16 sps:$4 sm:$0xff]   ;;  %v1716_v8 = vld [vmem:[%s2369_s1 + $0x44] ss:$16 sps:$4 sm:$0xff]  }
   0x4   :  { %676 = vmatprep.subr.bf16.mxu0 %v1710_v4  ;;  %902 = vmatprep.subr.bf16.mxu1 %v1712_v5  ;;  %v1718_v9 = vld [vmem:[%s2369_s1 + $0x4c] ss:$16 sps:$4 sm:$0xff]   ;;  %v1720_v10 = vld [vmem:[%s2369_s1 + $0x40] ss:$16 sps:$4 sm:$0xff]   ;;  %v1721_v11 = vld [vmem:[%s2369_s1 + $0x48] ss:$16 sps:$4 sm:$0xff]  }
   0x5   :  { %v1722_v12 = vld [vmem:[%s2369_s1 + $0x64] ss:$16 sps:$4 sm:$0xff]   ;;  %v1724_v13 = vld [vmem:[%s2369_s1 + $0x6c] ss:$16 sps:$4 sm:$0xff]   ;;  %v1726_v14 = vld [vmem:[%s2369_s1 + $0x60] ss:$16 sps:$4 sm:$0xff]  }
   0x6   :  { %v1727_v15 = vld [vmem:[%s2369_s1 + $0x68] ss:$16 sps:$4 sm:$0xff]   ;;  %v1728_v16 = vld [vmem:[%s2369_s1 + $0x84] ss:$16 sps:$4 sm:$0xff]   ;;  %v1730_v17 = vld [vmem:[%s2369_s1 + $0x8c] ss:$16 sps:$4 sm:$0xff]  }
   0x7   :  { %677 = vmatpush1.bf16.msra.mxu0 %v1714_v6  ;;  %903 = vmatpush1.bf16.msra.mxu1 %v1715_v7  ;;  %v1732_v18 = vld [vmem:[%s2369_s1 + $0x80] ss:$16 sps:$4 sm:$0xff]   ;;  %v1733_v19 = vld [vmem:[%s2369_s1 + $0x88] ss:$16 sps:$4 sm:$0xff]   ;;  %v1734_v20 = vld [vmem:[%s2369_s1 + $0xa4] ss:$16 sps:$4 sm:$0xff]  }
   0x8   :  { %678 = vmatprep.subr.bf16.mxu0 %v1716_v8  ;;  %904 = vmatprep.subr.bf16.mxu1 %v1718_v9  ;;  %v1736_v21 = vld [vmem:[%s2369_s1 + $0xac] ss:$16 sps:$4 sm:$0xff]   ;;  %v1738_v22 = vld [vmem:[%s2369_s1 + $0xa0] ss:$16 sps:$4 sm:$0xff]   ;;  %v1739_v23 = vld [vmem:[%s2369_s1 + $0xa8] ss:$16 sps:$4 sm:$0xff]  }
   0x9   :  { %v1740_v24 = vld [vmem:[%s2369_s1 + $0xc4] ss:$16 sps:$4 sm:$0xff]   ;;  %v1742_v25 = vld [vmem:[%s2369_s1 + $0xcc] ss:$16 sps:$4 sm:$0xff]   ;;  %v1744_v26 = vld [vmem:[%s2369_s1 + $0xc0] ss:$16 sps:$4 sm:$0xff]  }
   0xa   :  { %v1745_v27 = vld [vmem:[%s2369_s1 + $0xc8] ss:$16 sps:$4 sm:$0xff]   ;;  %v1746_v28 = vld [vmem:[%s2369_s1 + $0xe4] ss:$16 sps:$4 sm:$0xff]   ;;  %v1748_v29 = vld [vmem:[%s2369_s1 + $0xec] ss:$16 sps:$4 sm:$0xff]  }
   0xb   :  { %679 = vmatpush1.bf16.msra.mxu0 %v1720_v10  ;;  %905 = vmatpush1.bf16.msra.mxu1 %v1721_v11  ;;  %v1750_v30 = vld [vmem:[%s2369_s1 + $0xe0] ss:$16 sps:$4 sm:$0xff]   ;;  %v1751_v31 = vld [vmem:[%s2369_s1 + $0xe8] ss:$16 sps:$4 sm:$0xff]   ;;  %v1752_v32 = vld [vmem:[%s2369_s1 + $0x104] ss:$16 sps:$4 sm:$0xff]  }
   0xc   :  { %680 = vmatprep.subr.bf16.mxu0 %v1722_v12  ;;  %906 = vmatprep.subr.bf16.mxu1 %v1724_v13  ;;  %v1754_v33 = vld [vmem:[%s2369_s1 + $0x10c] ss:$16 sps:$4 sm:$0xff]   ;;  %v1756_v34 = vld [vmem:[%s2369_s1 + $0x100] ss:$16 sps:$4 sm:$0xff]   ;;  %v1757_v35 = vld [vmem:[%s2369_s1 + $0x108] ss:$16 sps:$4 sm:$0xff]  }
   0xd   :  { %v1758_v36 = vld [vmem:[%s2369_s1 + $0x124] ss:$16 sps:$4 sm:$0xff]   ;;  %v1760_v37 = vld [vmem:[%s2369_s1 + $0x12c] ss:$16 sps:$4 sm:$0xff]   ;;  %v1762_v38 = vld [vmem:[%s2369_s1 + $0x120] ss:$16 sps:$4 sm:$0xff]  }
   0xe   :  { %v1763_v39 = vld [vmem:[%s2369_s1 + $0x128] ss:$16 sps:$4 sm:$0xff]   ;;  %v1764_v40 = vld [vmem:[%s2369_s1 + $0x144] ss:$16 sps:$4 sm:$0xff]   ;;  %v1766_v41 = vld [vmem:[%s2369_s1 + $0x14c] ss:$16 sps:$4 sm:$0xff]  }
   0xf   :  { %681 = vmatpush1.bf16.msra.mxu0 %v1726_v14  ;;  %907 = vmatpush1.bf16.msra.mxu1 %v1727_v15  ;;  %v1768_v42 = vld [vmem:[%s2369_s1 + $0x140] ss:$16 sps:$4 sm:$0xff]   ;;  %v1769_v43 = vld [vmem:[%s2369_s1 + $0x148] ss:$16 sps:$4 sm:$0xff]   ;;  %v1770_v44 = vld [vmem:[%s2369_s1 + $0x164] ss:$16 sps:$4 sm:$0xff]  }
  0x10   :  { %682 = vmatprep.subr.bf16.mxu0 %v1728_v16  ;;  %908 = vmatprep.subr.bf16.mxu1 %v1730_v17  ;;  %v1772_v45 = vld [vmem:[%s2369_s1 + $0x16c] ss:$16 sps:$4 sm:$0xff]   ;;  %v1774_v46 = vld [vmem:[%s2369_s1 + $0x160] ss:$16 sps:$4 sm:$0xff]   ;;  %v1775_v47 = vld [vmem:[%s2369_s1 + $0x168] ss:$16 sps:$4 sm:$0xff]  }
  0x11   :  { %v1802_v48 = vld [vmem:[%s2368_s0 + $0x4] ss:$12 sps:$4 sm:$0xff]   ;;  %v1778_v50 = vld [vmem:[%s2369_s1 + $0x18c] ss:$16 sps:$4 sm:$0xff]   ;;  %v1781_v52 = vld [vmem:[%s2369_s1 + $0x188] ss:$16 sps:$4 sm:$0xff]  }
  0x12   :  { %v1776_v49 = vld [vmem:[%s2369_s1 + $0x184] ss:$16 sps:$4 sm:$0xff]   ;;  %706 = vmatprep.mubr.bf16.mxu0 %v1802_v48  ;;  %932 = vmatprep.mubr.bf16.mxu1 %v1802_v48  ;;  %v1780_v51 = vld [vmem:[%s2369_s1 + $0x180] ss:$16 sps:$4 sm:$0xff]   ;;  %v1784_v54 = vld [vmem:[%s2369_s1 + $0x1ac] ss:$16 sps:$4 sm:$0xff]  }
  0x13   :  { %683 = vmatpush1.bf16.msra.mxu0 %v1732_v18  ;;  %909 = vmatpush1.bf16.msra.mxu1 %v1733_v19  ;;  %v1782_v53 = vld [vmem:[%s2369_s1 + $0x1a4] ss:$16 sps:$4 sm:$0xff]   ;;  %v1786_v55 = vld [vmem:[%s2369_s1 + $0x1a0] ss:$16 sps:$4 sm:$0xff]   ;;  %v1787_v56 = vld [vmem:[%s2369_s1 + $0x1a8] ss:$16 sps:$4 sm:$0xff]  }
  0x14   :  { %684 = vmatprep.subr.bf16.mxu0 %v1734_v20  ;;  %910 = vmatprep.subr.bf16.mxu1 %v1736_v21  ;;  %v1788_v57 = vld [vmem:[%s2369_s1 + $0x1c4] ss:$16 sps:$4 sm:$0xff]   ;;  %v1790_v58 = vld [vmem:[%s2369_s1 + $0x1cc] ss:$16 sps:$4 sm:$0xff]   ;;  %v1792_v59 = vld [vmem:[%s2369_s1 + $0x1c0] ss:$16 sps:$4 sm:$0xff]  }
  0x15   :  { %v1793_v60 = vld [vmem:[%s2369_s1 + $0x1c8] ss:$16 sps:$4 sm:$0xff]   ;;  %v1794_v61 = vld [vmem:[%s2369_s1 + $0x1e4] ss:$16 sps:$4 sm:$0xff]   ;;  %v1796_v62 = vld [vmem:[%s2369_s1 + $0x1ec] ss:$16 sps:$4 sm:$0xff]  }
  0x16   :  { %v1798_v63 = vld [vmem:[%s2369_s1 + $0x1e0] ss:$16 sps:$4 sm:$0xff]   ;;  %v1799_v0 = vld [vmem:[%s2369_s1 + $0x1e8] ss:$16 sps:$4 sm:$0xff]   ;;  %v1805_v1 = vld [vmem:[%s2369_s1 + $0x20c] ss:$16 sps:$4 sm:$0xff]  }
  0x17   :  { %685 = vmatpush1.bf16.msra.mxu0 %v1738_v22  ;;  %911 = vmatpush1.bf16.msra.mxu1 %v1739_v23  ;;  %v1811_v2 = vld [vmem:[%s2369_s1 + $0x204] ss:$16 sps:$4 sm:$0xff]   ;;  %v1800_v3 = vld [vmem:[%s2368_s0] ss:$12 sps:$4 sm:$0xff]   ;;  %v1803_v4 = vld [vmem:[%s2369_s1 + $0x208] ss:$16 sps:$4 sm:$0xff]  }
  0x18   :  { %686 = vmatprep.subr.bf16.mxu0 %v1740_v24  ;;  %912 = vmatprep.subr.bf16.mxu1 %v1742_v25  ;;  %v1806_v5 = vld [vmem:[%s2368_s0 + $0x1c] ss:$12 sps:$4 sm:$0xff]   ;;  %v1809_v6 = vld [vmem:[%s2369_s1 + $0x200] ss:$16 sps:$4 sm:$0xff]   ;;  %v1823_v8 = vld [vmem:[%s2369_s1 + $0x224] ss:$16 sps:$4 sm:$0xff]  }
  0x19   :  { %v1817_v7 = vld [vmem:[%s2369_s1 + $0x22c] ss:$16 sps:$4 sm:$0xff]   ;;  %v1815_v9 = vld [vmem:[%s2369_s1 + $0x228] ss:$16 sps:$4 sm:$0xff]   ;;  %v1821_v10 = vld [vmem:[%s2369_s1 + $0x220] ss:$16 sps:$4 sm:$0xff]  }
  0x1a   :  { %v1829_v11 = vld [vmem:[%s2369_s1 + $0x24c] ss:$16 sps:$4 sm:$0xff]   ;;  %v1835_v12 = vld [vmem:[%s2369_s1 + $0x244] ss:$16 sps:$4 sm:$0xff]  }
  0x1b   :  { %687 = vmatpush1.bf16.msra.mxu0 %v1744_v26  ;;  %913 = vmatpush1.bf16.msra.mxu1 %v1745_v27  ;;  %v1808_v13 = vld [vmem:[%s2368_s0 + $0x18] ss:$12 sps:$4 sm:$0xff]   ;;  %v1812_v14 = vld [vmem:[%s2368_s0 + $0x34] ss:$12 sps:$4 sm:$0xff]  }
  0x1c   :  { %688 = vmatprep.subr.bf16.mxu0 %v1746_v28  ;;  %914 = vmatprep.subr.bf16.mxu1 %v1748_v29 }
  0x1f   :  { %689 = vmatpush1.bf16.msra.mxu0 %v1750_v30  ;;  %915 = vmatpush1.bf16.msra.mxu1 %v1751_v31 }
  0x20   :  { %690 = vmatprep.subr.bf16.mxu0 %v1752_v32  ;;  %916 = vmatprep.subr.bf16.mxu1 %v1754_v33 }
  0x23   :  { %691 = vmatpush1.bf16.msra.mxu0 %v1756_v34  ;;  %917 = vmatpush1.bf16.msra.mxu1 %v1757_v35 }
  0x24   :  { %692 = vmatprep.subr.bf16.mxu0 %v1758_v36  ;;  %918 = vmatprep.subr.bf16.mxu1 %v1760_v37 }
  0x27   :  { %693 = vmatpush1.bf16.msra.mxu0 %v1762_v38  ;;  %919 = vmatpush1.bf16.msra.mxu1 %v1763_v39 }
  0x28   :  { %694 = vmatprep.subr.bf16.mxu0 %v1764_v40  ;;  %920 = vmatprep.subr.bf16.mxu1 %v1766_v41 }
  0x2b   :  { %695 = vmatpush1.bf16.msra.mxu0 %v1768_v42  ;;  %921 = vmatpush1.bf16.msra.mxu1 %v1769_v43 }
  0x2c   :  { %696 = vmatprep.subr.bf16.mxu0 %v1770_v44  ;;  %922 = vmatprep.subr.bf16.mxu1 %v1772_v45 }
  0x2f   :  { %697 = vmatpush1.bf16.msra.mxu0 %v1774_v46  ;;  %923 = vmatpush1.bf16.msra.mxu1 %v1775_v47 }
  0x30   :  { %698 = vmatprep.subr.bf16.mxu0 %v1776_v49  ;;  %924 = vmatprep.subr.bf16.mxu1 %v1778_v50 }
  0x33   :  { %699 = vmatpush1.bf16.msra.mxu0 %v1780_v51  ;;  %925 = vmatpush1.bf16.msra.mxu1 %v1781_v52 }
  0x34   :  { %700 = vmatprep.subr.bf16.mxu0 %v1782_v53  ;;  %926 = vmatprep.subr.bf16.mxu1 %v1784_v54 }
  0x37   :  { %701 = vmatpush1.bf16.msra.mxu0 %v1786_v55  ;;  %927 = vmatpush1.bf16.msra.mxu1 %v1787_v56 }
  0x38   :  { %702 = vmatprep.subr.bf16.mxu0 %v1788_v57  ;;  %928 = vmatprep.subr.bf16.mxu1 %v1790_v58 }
  0x3b   :  { %703 = vmatpush1.bf16.msra.mxu0 %v1792_v59  ;;  %929 = vmatpush1.bf16.msra.mxu1 %v1793_v60 }
  0x3c   :  { %704 = vmatprep.subr.bf16.mxu0 %v1794_v61  ;;  %930 = vmatprep.subr.bf16.mxu1 %v1796_v62 }
  0x3f   :  { %705 = vmatpush1.bf16.msra.mxu0 %v1798_v63  ;;  %931 = vmatpush1.bf16.msra.mxu1 %v1799_v0 }
  0x40   :  { %1013 = vmatprep.subr.bf16.mxu1 %v1805_v1  ;;  %787 = vmatprep.subr.bf16.mxu0 %v1811_v2 }
  0x42   :  { %707 = vmatmul.mubr.bf16.vlgmr.msra.gmra.mrb[0].mxu0 %v1800_v3  ;;  %933 = vmatmul.mubr.bf16.vlgmr.msra.gmra.mrb[0].mxu1 %v1800_v3 }
  0x43   :  { %1014 = vmatpush1.bf16.msra.mxu1 %v1803_v4  ;;  %716 = vmatprep.mubr.bf16.mxu0 %v1806_v5 }
  0x44   :  { %942 = vmatprep.mubr.bf16.mxu1 %v1806_v5  ;;  %788 = vmatpush1.bf16.msra.mxu0 %v1809_v6 }
  0x45   :  { %1015 = vmatprep.subr.bf16.mxu1 %v1817_v7  ;;  %789 = vmatprep.subr.bf16.mxu0 %v1823_v8 }
  0x47   :  { %1016 = vmatpush1.bf16.msra.mxu1 %v1815_v9 }
  0x48   :  { %11 = vsyncpa [#allocation5], 0  ;;  %790 = vmatpush1.bf16.msra.mxu0 %v1821_v10  ;;  %v1827_v15 = vld [vmem:[%s2369_s1 + $0x248] ss:$16 sps:$4 sm:$0xff]   ;;  %1017 = vmatprep.subr.bf16.mxu1 %v1829_v11  ;;  %v1833_v16 = vld [vmem:[%s2369_s1 + $0x240] ss:$16 sps:$4 sm:$0xff]  }
  0x49   :  { %791 = vmatprep.subr.bf16.mxu0 %v1835_v12  ;;  %v1841_v17 = vld [vmem:[%s2369_s1 + $0x26c] ss:$16 sps:$4 sm:$0xff]   ;;  %v1847_v18 = vld [vmem:[%s2369_s1 + $0x264] ss:$16 sps:$4 sm:$0xff]   ;;  %v1839_v19 = vld [vmem:[%s2369_s1 + $0x268] ss:$16 sps:$4 sm:$0xff]  }
  0x4a   :  { %717 = vmatmul.mubr.bf16.gmra.mrb[4].mxu0 %v1808_v13  ;;  %943 = vmatmul.mubr.bf16.gmra.mrb[4].mxu1 %v1808_v13  ;;  %v1845_v20 = vld [vmem:[%s2369_s1 + $0x260] ss:$16 sps:$4 sm:$0xff]   ;;  %v1818_v22 = vld [vmem:[%s2368_s0 + $0x4c] ss:$12 sps:$4 sm:$0xff]   ;;  %v1820_v23 = vld [vmem:[%s2368_s0 + $0x48] ss:$12 sps:$4 sm:$0xff]  }
  0x4b   :  { %726 = vmatprep.mubr.bf16.mxu0 %v1812_v14  ;;  %952 = vmatprep.mubr.bf16.mxu1 %v1812_v14  ;;  %v1814_v21 = vld [vmem:[%s2368_s0 + $0x30] ss:$12 sps:$4 sm:$0xff]   ;;  %v1826_v25 = vld [vmem:[%s2368_s0 + $0x60] ss:$12 sps:$4 sm:$0xff]   ;;  %v1832_v27 = vld [vmem:[%s2368_s0 + $0x78] ss:$12 sps:$4 sm:$0xff]  }
  0x4c   :  { %1018 = vmatpush1.bf16.msra.mxu1 %v1827_v15  ;;  %792 = vmatpush1.bf16.msra.mxu0 %v1833_v16  ;;  %v1824_v24 = vld [vmem:[%s2368_s0 + $0x64] ss:$12 sps:$4 sm:$0xff]   ;;  %v1830_v26 = vld [vmem:[%s2368_s0 + $0x7c] ss:$12 sps:$4 sm:$0xff]   ;;  %v1836_v28 = vld [vmem:[%s2368_s0 + $0x94] ss:$12 sps:$4 sm:$0xff]  }
  0x4d   :  { %1019 = vmatprep.subr.bf16.mxu1 %v1841_v17  ;;  %793 = vmatprep.subr.bf16.mxu0 %v1847_v18  ;;  %v1838_v29 = vld [vmem:[%s2368_s0 + $0x90] ss:$12 sps:$4 sm:$0xff]   ;;  %v1842_v30 = vld [vmem:[%s2368_s0 + $0xac] ss:$12 sps:$4 sm:$0xff]   ;;  %v1844_v31 = vld [vmem:[%s2368_s0 + $0xa8] ss:$12 sps:$4 sm:$0xff]  }
  0x4e   :  { %v1936_v32 = vmov 0   ;;  %v1848_v33 = vld [vmem:[%s2368_s0 + $0x8] ss:$12 sps:$4 sm:$0xff]   ;;  %vm649_vm0 = vcmask 523264   ;;  %v1849_v34 = vld [vmem:[%s2368_s0 + $0x20] ss:$12 sps:$4 sm:$0xff]  }
  0x4f   :  { %v1850_v35 = vld [vmem:[%s2368_s0 + $0x38] ss:$12 sps:$4 sm:$0xff]   ;;  %v1851_v36 = vld [vmem:[%s2368_s0 + $0x50] ss:$12 sps:$4 sm:$0xff]   ;;  %v1852_v37 = vld [vmem:[%s2368_s0 + $0x68] ss:$12 sps:$4 sm:$0xff]  }
  0x50   :  { %1020 = vmatpush1.bf16.msra.mxu1 %v1839_v19  ;;  %794 = vmatpush1.bf16.msra.mxu0 %v1845_v20  ;;  %v1853_v38 = vld [vmem:[%s2368_s0 + $0x80] ss:$12 sps:$4 sm:$0xff]   ;;  %v1854_v39 = vld [vmem:[%s2368_s0 + $0x98] ss:$12 sps:$4 sm:$0xff]   ;;  %v1855_v40 = vld [vmem:[%s2368_s0 + $0xb0] ss:$12 sps:$4 sm:$0xff]  }
  0x51   :  { %s1937_s13 = smov [#allocation4]   ;;  %s1938_s18 = smov [#allocation2]  }
  0x52   :  { %727 = vmatmul.mubr.bf16.gmra.mrb[8].mxu0 %v1814_v21  ;;  %953 = vmatmul.mubr.bf16.gmra.mrb[8].mxu1 %v1814_v21  ;;  %s1385_s14 = sshll.u32 %s1937_s13, 4  ;;  %s1373_s19 = sshll.u32 %s1938_s18, 4  ;;  %s1386_s14 = int_to_ptr.vmem [resolvable:$true] %s1385_s14  ;;  %s1374_s19 = int_to_ptr.vmem [resolvable:$true] %s1373_s19 }
  0x53   :  { %736 = vmatprep.mubr.bf16.mxu0 %v1818_v22  ;;  %962 = vmatprep.mubr.bf16.mxu1 %v1818_v22  ;;  %s1888_s20 = scalar_lea.vmem %s1386_s14, 1024  ;;  %p1893_p1 = scmp.lt.s32.totalorder %s1386_s14, %s1386_s14 }
  0x54   :  { %p1889_p0 = scmp.ne.s32.totalorder %s1386_s14, %s1888_s20  ;;  %p1894_p2 = scmp.lt.s32.totalorder %s1888_s20, %s1888_s20 }
  0x56   :  { %p1895_p3 = por %p1894_p2, %p1893_p1 }
  0x58   :  { %p1896_p4 = pnand %p1895_p3, %p1889_p0 }
  0x5a   :  { %737 = vmatmul.mubr.bf16.gmra.mrb[12].mxu0 %v1820_v23  ;;  %963 = vmatmul.mubr.bf16.gmra.mrb[12].mxu1 %v1820_v23 }
  0x5b   :  { %746 = vmatprep.mubr.bf16.mxu0 %v1824_v24  ;;  %972 = vmatprep.mubr.bf16.mxu1 %v1824_v24 }
  0x62   :  { %747 = vmatmul.mubr.bf16.gmra.mrb[16].mxu0 %v1826_v25  ;;  %973 = vmatmul.mubr.bf16.gmra.mrb[16].mxu1 %v1826_v25 }
  0x63   :  { %756 = vmatprep.mubr.bf16.mxu0 %v1830_v26  ;;  %982 = vmatprep.mubr.bf16.mxu1 %v1830_v26 }
  0x6a   :  { %757 = vmatmul.mubr.bf16.gmra.mrb[20].mxu0 %v1832_v27  ;;  %983 = vmatmul.mubr.bf16.gmra.mrb[20].mxu1 %v1832_v27 }
  0x6b   :  { %766 = vmatprep.mubr.bf16.mxu0 %v1836_v28  ;;  %992 = vmatprep.mubr.bf16.mxu1 %v1836_v28 }
  0x72   :  { %767 = vmatmul.mubr.bf16.gmra.mrb[24].mxu0 %v1838_v29  ;;  %993 = vmatmul.mubr.bf16.gmra.mrb[24].mxu1 %v1838_v29 }
  0x73   :  { %776 = vmatprep.mubr.bf16.mxu0 %v1842_v30  ;;  %1002 = vmatprep.mubr.bf16.mxu1 %v1842_v30 }
  0x7a   :  { %777 = vmatmul.mubr.bf16.gmra.mrb[28].mxu0 %v1844_v31  ;;  %1003 = vmatmul.mubr.bf16.gmra.mrb[28].mxu1 %v1844_v31 }
  0x7b   :  { %819 = vmatprep.mubr.bf16.mxu0 %v1936_v32  ;;  %1045 = vmatprep.mubr.bf16.mxu1 %v1936_v32 }
  0x82   :  { %1506 = vmatmul.mubr.msk.bf16.vlgmr.msra.gmra.mrb[0].mxu0 %vm649_vm0, %v1848_v33  ;;  %1514 = vmatmul.mubr.msk.bf16.vlgmr.msra.gmra.mrb[0].mxu1 %vm649_vm0, %v1848_v33 }
  0x83   :  { %829 = vmatprep.mubr.bf16.mxu0 %v1936_v32  ;;  %1055 = vmatprep.mubr.bf16.mxu1 %v1936_v32 }
  0x8a   :  { %1507 = vmatmul.mubr.msk.bf16.gmra.mrb[4].mxu0 %vm649_vm0, %v1849_v34  ;;  %1515 = vmatmul.mubr.msk.bf16.gmra.mrb[4].mxu1 %vm649_vm0, %v1849_v34 }
  0x8b   :  { %839 = vmatprep.mubr.bf16.mxu0 %v1936_v32  ;;  %1065 = vmatprep.mubr.bf16.mxu1 %v1936_v32 }
  0x92   :  { %1508 = vmatmul.mubr.msk.bf16.gmra.mrb[8].mxu0 %vm649_vm0, %v1850_v35  ;;  %1516 = vmatmul.mubr.msk.bf16.gmra.mrb[8].mxu1 %vm649_vm0, %v1850_v35 }
  0x93   :  { %849 = vmatprep.mubr.bf16.mxu0 %v1936_v32  ;;  %1075 = vmatprep.mubr.bf16.mxu1 %v1936_v32 }
  0x9a   :  { %1509 = vmatmul.mubr.msk.bf16.gmra.mrb[12].mxu0 %vm649_vm0, %v1851_v36  ;;  %1517 = vmatmul.mubr.msk.bf16.gmra.mrb[12].mxu1 %vm649_vm0, %v1851_v36 }
  0x9b   :  { %859 = vmatprep.mubr.bf16.mxu0 %v1936_v32  ;;  %1085 = vmatprep.mubr.bf16.mxu1 %v1936_v32 }
  0xa2   :  { %1510 = vmatmul.mubr.msk.bf16.gmra.mrb[16].mxu0 %vm649_vm0, %v1852_v37  ;;  %1518 = vmatmul.mubr.msk.bf16.gmra.mrb[16].mxu1 %vm649_vm0, %v1852_v37 }
  0xa3   :  { %869 = vmatprep.mubr.bf16.mxu0 %v1936_v32  ;;  %1095 = vmatprep.mubr.bf16.mxu1 %v1936_v32 }
  0xaa   :  { %1511 = vmatmul.mubr.msk.bf16.gmra.mrb[20].mxu0 %vm649_vm0, %v1853_v38  ;;  %1519 = vmatmul.mubr.msk.bf16.gmra.mrb[20].mxu1 %vm649_vm0, %v1853_v38 }
  0xab   :  { %879 = vmatprep.mubr.bf16.mxu0 %v1936_v32  ;;  %1105 = vmatprep.mubr.bf16.mxu1 %v1936_v32 }
  0xb2   :  { %1512 = vmatmul.mubr.msk.bf16.gmra.mrb[24].mxu0 %vm649_vm0, %v1854_v39  ;;  %1520 = vmatmul.mubr.msk.bf16.gmra.mrb[24].mxu1 %vm649_vm0, %v1854_v39 }
  0xb3   :  { %889 = vmatprep.mubr.bf16.mxu0 %v1936_v32  ;;  %1115 = vmatprep.mubr.bf16.mxu1 %v1936_v32 }
  0xba   :  { %1513 = vmatmul.mubr.msk.bf16.gmra.mrb[28].mxu0 %vm649_vm0, %v1855_v40  ;;  %1521 = vmatmul.mubr.msk.bf16.gmra.mrb[28].mxu1 %vm649_vm0, %v1855_v40 }
 0x155   :  { %v821_v41 = vpop.f32.mrb[0].mxu0  ;;  %v1047_v42 = vpop.f32.mrb[0].mxu1 }
 0x156   :  { %1856 = vtanh.f32 %v1047_v42  ;;  %v823_v43 = vpop.f32.mrb[1].mxu0  ;;  %v1049_v44 = vpop.f32.mrb[1].mxu1 }
 0x157   :  { %v1554_v45 = vpack.c.bf16 %v823_v43, %v821_v41  ;;  %v825_v46 = vpop.f32.mrb[2].mxu0  ;;  %v1051_v47 = vpop.f32.mrb[2].mxu1  ;;  %v1270_v50 = vmax.f32 %v1049_v44, 0.0 }
 0x158   :  { %1858 = vtanh.f32 %v1051_v47  ;;  %v827_v48 = vpop.f32.mrb[3].mxu0  ;;  %v1053_v49 = vpop.f32.mrb[3].mxu1 }
 0x159   :  { %1222 = vst [vmem:[%s2370_s2] sm:$0xff] %v1554_v45  ;;  %v1555_v51 = vpack.c.bf16 %v827_v48, %v825_v46  ;;  %v1271_v52 = vmax.f32 %v1053_v49, 0.0 }
 0x15b   :  { %1223 = vst [vmem:[%s2370_s2 + $0x8] sm:$0xff] %v1555_v51  ;;  %v1589_v53 = vpack.c.bf16 %v1271_v52, %v1270_v50 }
 0x15d   :  { %1590 = vst [vmem:[#allocation4] sm:$0xff] %v1589_v53   ;;  %v831_v54 = vpop.f32.mrb[4].mxu0  ;;  %v1057_v55 = vpop.f32.mrb[4].mxu1 }
 0x15e   :  { %1860 = vtanh.f32 %v1057_v55  ;;  %v833_v56 = vpop.f32.mrb[5].mxu0  ;;  %v1059_v57 = vpop.f32.mrb[5].mxu1 }
 0x15f   :  { %v1556_v58 = vpack.c.bf16 %v833_v56, %v831_v54  ;;  %v835_v59 = vpop.f32.mrb[6].mxu0  ;;  %v1061_v60 = vpop.f32.mrb[6].mxu1  ;;  %v1272_v0 = vmax.f32 %v1059_v57, 0.0 }
 0x160   :  { %v1857_v61 = vpop.eup %1856  ;;  %1862 = vtanh.f32 %v1061_v60  ;;  %v837_v62 = vpop.f32.mrb[7].mxu0 }
 0x161   :  { %v1063_v63 = vpop.f32.mrb[7].mxu1  ;;  %1254 = vst [vmem:[#allocation2] sm:$0xff] %v1857_v61  ;;  %1224 = vst [vmem:[%s2370_s2 + $0x10] sm:$0xff] %v1556_v58  ;;  %v1557_v1 = vpack.c.bf16 %v837_v62, %v835_v59 }
 0x162   :  { %v1273_v2 = vmax.f32 %v1063_v63, 0.0  ;;  %v1859_v3 = vpop.eup %1858 }
 0x163   :  { %1255 = vst [vmem:[#allocation2 + $0x8] sm:$0xff] %v1859_v3  ;;  %1225 = vst [vmem:[%s2370_s2 + $0x18] sm:$0xff] %v1557_v1 }
 0x164   :  { %v1594_v4 = vpack.c.bf16 %v1273_v2, %v1272_v0 }
 0x165   :  { %v841_v5 = vpop.f32.mrb[8].mxu0  ;;  %v1067_v6 = vpop.f32.mrb[8].mxu1 }
 0x166   :  { %1626 = vst [vmem:[#allocation4 + $0x8] sm:$0xff] %v1594_v4   ;;  %1864 = vtanh.f32 %v1067_v6  ;;  %v843_v7 = vpop.f32.mrb[9].mxu0  ;;  %v1069_v8 = vpop.f32.mrb[9].mxu1 }
 0x167   :  { %v1558_v9 = vpack.c.bf16 %v843_v7, %v841_v5  ;;  %v845_v10 = vpop.f32.mrb[10].mxu0  ;;  %v1071_v11 = vpop.f32.mrb[10].mxu1  ;;  %v1274_v15 = vmax.f32 %v1069_v8, 0.0 }
 0x168   :  { %v1861_v12 = vpop.eup %1860  ;;  %1866 = vtanh.f32 %v1071_v11  ;;  %v847_v13 = vpop.f32.mrb[11].mxu0 }
 0x169   :  { %v1073_v14 = vpop.f32.mrb[11].mxu1  ;;  %1256 = vst [vmem:[#allocation2 + $0x10] sm:$0xff] %v1861_v12  ;;  %1226 = vst [vmem:[%s2370_s2 + $0x20] sm:$0xff] %v1558_v9  ;;  %v1559_v16 = vpack.c.bf16 %v847_v13, %v845_v10 }
 0x16a   :  { %v1275_v17 = vmax.f32 %v1073_v14, 0.0  ;;  %v1863_v18 = vpop.eup %1862 }
 0x16b   :  { %1257 = vst [vmem:[#allocation2 + $0x18] sm:$0xff] %v1863_v18  ;;  %1227 = vst [vmem:[%s2370_s2 + $0x28] sm:$0xff] %v1559_v16 }
 0x16c   :  { %v1599_v19 = vpack.c.bf16 %v1275_v17, %v1274_v15 }
 0x16d   :  { %v851_v20 = vpop.f32.mrb[12].mxu0  ;;  %v1077_v21 = vpop.f32.mrb[12].mxu1 }
 0x16e   :  { %1627 = vst [vmem:[#allocation4 + $0x10] sm:$0xff] %v1599_v19   ;;  %1868 = vtanh.f32 %v1077_v21  ;;  %v853_v22 = vpop.f32.mrb[13].mxu0  ;;  %v1079_v23 = vpop.f32.mrb[13].mxu1 }
 0x16f   :  { %v1560_v24 = vpack.c.bf16 %v853_v22, %v851_v20  ;;  %v855_v25 = vpop.f32.mrb[14].mxu0  ;;  %v1081_v26 = vpop.f32.mrb[14].mxu1  ;;  %v1276_v30 = vmax.f32 %v1079_v23, 0.0 }
 0x170   :  { %v1865_v27 = vpop.eup %1864  ;;  %1870 = vtanh.f32 %v1081_v26  ;;  %v857_v28 = vpop.f32.mrb[15].mxu0 }
 0x171   :  { %v1083_v29 = vpop.f32.mrb[15].mxu1  ;;  %1258 = vst [vmem:[#allocation2 + $0x20] sm:$0xff] %v1865_v27  ;;  %1228 = vst [vmem:[%s2370_s2 + $0x30] sm:$0xff] %v1560_v24  ;;  %v1561_v31 = vpack.c.bf16 %v857_v28, %v855_v25 }
 0x172   :  { %v1277_v32 = vmax.f32 %v1083_v29, 0.0  ;;  %v1867_v33 = vpop.eup %1866 }
 0x173   :  { %1259 = vst [vmem:[#allocation2 + $0x28] sm:$0xff] %v1867_v33  ;;  %1229 = vst [vmem:[%s2370_s2 + $0x38] sm:$0xff] %v1561_v31 }
 0x174   :  { %v1604_v34 = vpack.c.bf16 %v1277_v32, %v1276_v30 }
 0x175   :  { %v861_v35 = vpop.f32.mrb[16].mxu0  ;;  %v1087_v36 = vpop.f32.mrb[16].mxu1 }
 0x176   :  { %1628 = vst [vmem:[#allocation4 + $0x18] sm:$0xff] %v1604_v34   ;;  %1872 = vtanh.f32 %v1087_v36  ;;  %v863_v37 = vpop.f32.mrb[17].mxu0  ;;  %v1089_v38 = vpop.f32.mrb[17].mxu1 }
 0x177   :  { %v1562_v39 = vpack.c.bf16 %v863_v37, %v861_v35  ;;  %v865_v40 = vpop.f32.mrb[18].mxu0  ;;  %v1091_v41 = vpop.f32.mrb[18].mxu1  ;;  %v1278_v45 = vmax.f32 %v1089_v38, 0.0 }
 0x178   :  { %v1869_v42 = vpop.eup %1868  ;;  %1874 = vtanh.f32 %v1091_v41  ;;  %v867_v43 = vpop.f32.mrb[19].mxu0 }
 0x179   :  { %v1093_v44 = vpop.f32.mrb[19].mxu1  ;;  %1260 = vst [vmem:[#allocation2 + $0x30] sm:$0xff] %v1869_v42  ;;  %1230 = vst [vmem:[%s2370_s2 + $0x40] sm:$0xff] %v1562_v39  ;;  %v1563_v46 = vpack.c.bf16 %v867_v43, %v865_v40 }
 0x17a   :  { %v1279_v47 = vmax.f32 %v1093_v44, 0.0  ;;  %v1871_v48 = vpop.eup %1870 }
 0x17b   :  { %1261 = vst [vmem:[#allocation2 + $0x38] sm:$0xff] %v1871_v48  ;;  %1231 = vst [vmem:[%s2370_s2 + $0x48] sm:$0xff] %v1563_v46 }
 0x17c   :  { %v1609_v49 = vpack.c.bf16 %v1279_v47, %v1278_v45 }
 0x17d   :  { %v871_v50 = vpop.f32.mrb[20].mxu0  ;;  %v1097_v51 = vpop.f32.mrb[20].mxu1 }
 0x17e   :  { %1629 = vst [vmem:[#allocation4 + $0x20] sm:$0xff] %v1609_v49   ;;  %1876 = vtanh.f32 %v1097_v51  ;;  %v873_v52 = vpop.f32.mrb[21].mxu0  ;;  %v1099_v53 = vpop.f32.mrb[21].mxu1 }
 0x17f   :  { %v1564_v54 = vpack.c.bf16 %v873_v52, %v871_v50  ;;  %v875_v55 = vpop.f32.mrb[22].mxu0  ;;  %v1101_v56 = vpop.f32.mrb[22].mxu1  ;;  %v1280_v60 = vmax.f32 %v1099_v53, 0.0 }
 0x180   :  { %v1873_v57 = vpop.eup %1872  ;;  %1878 = vtanh.f32 %v1101_v56  ;;  %v877_v58 = vpop.f32.mrb[23].mxu0 }
 0x181   :  { %v1103_v59 = vpop.f32.mrb[23].mxu1  ;;  %1262 = vst [vmem:[#allocation2 + $0x40] sm:$0xff] %v1873_v57  ;;  %1232 = vst [vmem:[%s2370_s2 + $0x50] sm:$0xff] %v1564_v54  ;;  %v1565_v61 = vpack.c.bf16 %v877_v58, %v875_v55 }
 0x182   :  { %v1281_v62 = vmax.f32 %v1103_v59, 0.0  ;;  %v1875_v63 = vpop.eup %1874 }
 0x183   :  { %1263 = vst [vmem:[#allocation2 + $0x48] sm:$0xff] %v1875_v63  ;;  %1233 = vst [vmem:[%s2370_s2 + $0x58] sm:$0xff] %v1565_v61 }
 0x184   :  { %v1614_v0 = vpack.c.bf16 %v1281_v62, %v1280_v60 }
 0x185   :  { %v881_v1 = vpop.f32.mrb[24].mxu0  ;;  %v1107_v2 = vpop.f32.mrb[24].mxu1 }
 0x186   :  { %1630 = vst [vmem:[#allocation4 + $0x28] sm:$0xff] %v1614_v0   ;;  %1880 = vtanh.f32 %v1107_v2  ;;  %v883_v3 = vpop.f32.mrb[25].mxu0  ;;  %v1109_v4 = vpop.f32.mrb[25].mxu1 }
 0x187   :  { %v1566_v5 = vpack.c.bf16 %v883_v3, %v881_v1  ;;  %v885_v6 = vpop.f32.mrb[26].mxu0  ;;  %v1111_v7 = vpop.f32.mrb[26].mxu1  ;;  %v1282_v11 = vmax.f32 %v1109_v4, 0.0 }
 0x188   :  { %v1877_v8 = vpop.eup %1876  ;;  %1882 = vtanh.f32 %v1111_v7  ;;  %v887_v9 = vpop.f32.mrb[27].mxu0 }
 0x189   :  { %v1113_v10 = vpop.f32.mrb[27].mxu1  ;;  %1264 = vst [vmem:[#allocation2 + $0x50] sm:$0xff] %v1877_v8  ;;  %1234 = vst [vmem:[%s2370_s2 + $0x60] sm:$0xff] %v1566_v5  ;;  %v1567_v12 = vpack.c.bf16 %v887_v9, %v885_v6 }
 0x18a   :  { %v1283_v13 = vmax.f32 %v1113_v10, 0.0  ;;  %v1879_v14 = vpop.eup %1878 }
 0x18b   :  { %1265 = vst [vmem:[#allocation2 + $0x58] sm:$0xff] %v1879_v14  ;;  %1235 = vst [vmem:[%s2370_s2 + $0x68] sm:$0xff] %v1567_v12 }
 0x18c   :  { %v1619_v15 = vpack.c.bf16 %v1283_v13, %v1282_v11 }
 0x18d   :  { %v891_v16 = vpop.f32.mrb[28].mxu0  ;;  %v1117_v17 = vpop.f32.mrb[28].mxu1 }
 0x18e   :  { %1631 = vst [vmem:[#allocation4 + $0x30] sm:$0xff] %v1619_v15   ;;  %1884 = vtanh.f32 %v1117_v17  ;;  %v893_v18 = vpop.f32.mrb[29].mxu0  ;;  %v1119_v19 = vpop.f32.mrb[29].mxu1 }
 0x18f   :  { %v1568_v20 = vpack.c.bf16 %v893_v18, %v891_v16  ;;  %v895_v21 = vpop.f32.mrb[30].mxu0  ;;  %v1121_v22 = vpop.f32.mrb[30].mxu1  ;;  %v1284_v26 = vmax.f32 %v1119_v19, 0.0 }
 0x190   :  { %v1881_v23 = vpop.eup %1880  ;;  %1886 = vtanh.f32 %v1121_v22  ;;  %v897_v24 = vpop.f32.mrb[31].mxu0 }
 0x191   :  { %v1123_v25 = vpop.f32.mrb[31].mxu1  ;;  %1266 = vst [vmem:[#allocation2 + $0x60] sm:$0xff] %v1881_v23  ;;  %1236 = vst [vmem:[%s2370_s2 + $0x70] sm:$0xff] %v1568_v20  ;;  %v1569_v27 = vpack.c.bf16 %v897_v24, %v895_v21 }
 0x192   :  { %v1285_v28 = vmax.f32 %v1123_v25, 0.0  ;;  %v1883_v29 = vpop.eup %1882 }
 0x193   :  { %1267 = vst [vmem:[#allocation2 + $0x68] sm:$0xff] %v1883_v29  ;;  %1237 = vst [vmem:[%s2370_s2 + $0x78] sm:$0xff] %v1569_v27 }
 0x194   :  { %v1624_v30 = vpack.c.bf16 %v1285_v28, %v1284_v26 }
 0x196   :  { %1632 = vst [vmem:[#allocation4 + $0x38] sm:$0xff] %v1624_v30  }
 0x197   :  { %1899 = shalt.err (!%p1896_p4)
}
 0x198   :  { %s1900_s23 = scalar_lea.hbm %s2372_s4, 1024 }
 0x199   :  { %p1901_p5 = scmp.ne.s32.totalorder %s2372_s4, %s1900_s23  ;;  %p1904_p6 = scmp.lt.u32.totalorder %s1900_s23, %s2372_s4 }
 0x19b   :  { %p1906_p7 = pnand %p1904_p6, %p1901_p5 }
 0x19d   :  { %1909 = shalt.err (!%p1906_p7)
}
 0x19e   :  { %s1939_s27 = smov 64   ;;  %s1940_s28 = smov 4   ;;  %v1885_v31 = vpop.eup %1884 }
 0x19f   :  { %1391 = dma.vmem_to_hbm [thread:$0]  %s1386_s14, 1024, %s2372_s4, [#allocation5], %s1939_s27, %s1939_s27, %s1940_s28   ;;  %1268 = vst [vmem:[#allocation2 + $0x70] sm:$0xff] %v1885_v31  ;;  %v1887_v32 = vpop.eup %1886 }
 0x1a0   :  { %1269 = vst [vmem:[#allocation2 + $0x78] sm:$0xff] %v1887_v32  ;;  %s1910_s5 = scalar_lea.vmem %s1374_s19, 2048  ;;  %p1915_p9 = scmp.lt.s32.totalorder %s1374_s19, %s1374_s19 }
 0x1a1   :  { %p1911_p8 = scmp.ne.s32.totalorder %s1374_s19, %s1910_s5  ;;  %p1916_p10 = scmp.lt.s32.totalorder %s1910_s5, %s1910_s5 }
 0x1a3   :  { %p1917_p11 = por %p1916_p10, %p1915_p9 }
 0x1a5   :  { %p1918_p12 = pnand %p1917_p11, %p1911_p8 }
 0x1a7   :  { %1921 = shalt.err (!%p1918_p12)
}
 0x1a8   :  { %s1922_s8 = scalar_lea.hbm %s2371_s3, 2048 }
 0x1a9   :  { %p1923_p13 = scmp.ne.s32.totalorder %s2371_s3, %s1922_s8  ;;  %p1926_p0 = scmp.lt.u32.totalorder %s1922_s8, %s2371_s3 }
 0x1ab   :  { %p1928_p1 = pnand %p1926_p0, %p1923_p13 }
 0x1ad   :  { %1931 = shalt.err (!%p1928_p1)
}
 0x1ae   :  { %s1941_s11 = smov 128   ;;  %s1942_s12 = smov 8  }
 0x1af   :  { %1379 = dma.vmem_to_hbm [thread:$0]  %s1374_s19, 2048, %s2371_s3, [#allocation3], %s1941_s11, %s1941_s11, %s1942_s12  }
 0x1b0   :  { %1932 = dma.done.wait [#allocation3], 2048  }
 0x1b1   :  { %1933 = vsyncadd [#allocation3], 4294965248 }
 0x1b2   :  { %1934 = dma.done.wait [#allocation5], 1024  }
 0x1b3   :  { %1935 = vsyncadd [#allocation5], 4294966272 }
 0x1b4   :  { %1400 = vsyncpa [#allocation3], 1 }
 0x1b5   :  { %1401 = vsyncpa [#allocation5], 1 }

// kernel: kpaflow_forward.7
= control target key start
LH: loop header
LB: loop body
LE: loop exit
PB: predicated region body
PF: predicated region fallthrough
CT: control target
= control target key end

     0   :  { %s919_s1 = inlined_call_operand.vmem [shape: bf16[256,256], index: 1, kind: input, shape index: {}]   ;;  %s920_s0 = inlined_call_operand.vmem [shape: bf16[128,256], index: 0, kind: input, shape index: {}]   ;;  %s921_s2 = inlined_call_operand.vmem [shape: bf16[128,256], index: 2, kind: output, shape index: {}]  }
   0x1   :  { %v640_v0 = vld [vmem:[%s919_s1 + $0x4] ss:$8 sps:$4 sm:$0xff]   ;;  %v642_v1 = vld [vmem:[%s919_s1] ss:$8 sps:$4 sm:$0xff]   ;;  %v643_v2 = vld [vmem:[%s919_s1 + $0x14] ss:$8 sps:$4 sm:$0xff]  }
   0x2   :  { %299 = vmatprep.subr.bf16.mxu0 %v640_v0  ;;  %608 = vmatprep.subr.bf16.mxu1 %v640_v0  ;;  %v645_v3 = vld [vmem:[%s919_s1 + $0x10] ss:$8 sps:$4 sm:$0xff]   ;;  %v646_v4 = vld [vmem:[%s919_s1 + $0x24] ss:$8 sps:$4 sm:$0xff]   ;;  %v648_v5 = vld [vmem:[%s919_s1 + $0x20] ss:$8 sps:$4 sm:$0xff]  }
   0x3   :  { %300 = vmatpush1.bf16.msra.mxu0 %v642_v1  ;;  %624 = vmatpush1.bf16.msra.mxu1 %v642_v1  ;;  %v649_v6 = vld [vmem:[%s919_s1 + $0x34] ss:$8 sps:$4 sm:$0xff]   ;;  %v651_v7 = vld [vmem:[%s919_s1 + $0x30] ss:$8 sps:$4 sm:$0xff]   ;;  %v652_v8 = vld [vmem:[%s919_s1 + $0x44] ss:$8 sps:$4 sm:$0xff]  }
   0x4   :  { %301 = vmatprep.subr.bf16.mxu0 %v643_v2  ;;  %609 = vmatprep.subr.bf16.mxu1 %v643_v2  ;;  %v654_v9 = vld [vmem:[%s919_s1 + $0x40] ss:$8 sps:$4 sm:$0xff]   ;;  %v655_v10 = vld [vmem:[%s919_s1 + $0x54] ss:$8 sps:$4 sm:$0xff]   ;;  %v657_v11 = vld [vmem:[%s919_s1 + $0x50] ss:$8 sps:$4 sm:$0xff]  }
   0x5   :  { %v658_v12 = vld [vmem:[%s919_s1 + $0x64] ss:$8 sps:$4 sm:$0xff]   ;;  %v660_v14 = vld [vmem:[%s919_s1 + $0x60] ss:$8 sps:$4 sm:$0xff]   ;;  %v661_v16 = vld [vmem:[%s919_s1 + $0x74] ss:$8 sps:$4 sm:$0xff]  }
   0x6   :  { %v690_v13 = vld [vmem:[%s920_s0 + $0x4] ss:$8 sps:$4 sm:$0xff]   ;;  %v663_v17 = vld [vmem:[%s919_s1 + $0x70] ss:$8 sps:$4 sm:$0xff]   ;;  %v666_v19 = vld [vmem:[%s919_s1 + $0x80] ss:$8 sps:$4 sm:$0xff]  }
   0x7   :  { %302 = vmatpush1.bf16.msra.mxu0 %v645_v3  ;;  %625 = vmatpush1.bf16.msra.mxu1 %v645_v3  ;;  %v693_v15 = vld [vmem:[%s920_s0 + $0x44] ss:$8 sps:$4 sm:$0xff]   ;;  %v667_v20 = vld [vmem:[%s919_s1 + $0x94] ss:$8 sps:$4 sm:$0xff]   ;;  %v669_v21 = vld [vmem:[%s919_s1 + $0x90] ss:$8 sps:$4 sm:$0xff]  }
   0x8   :  { %303 = vmatprep.subr.bf16.mxu0 %v646_v4  ;;  %610 = vmatprep.subr.bf16.mxu1 %v646_v4  ;;  %v664_v18 = vld [vmem:[%s919_s1 + $0x84] ss:$8 sps:$4 sm:$0xff]   ;;  %v672_v23 = vld [vmem:[%s919_s1 + $0xa0] ss:$8 sps:$4 sm:$0xff]   ;;  %v673_v24 = vld [vmem:[%s919_s1 + $0xb4] ss:$8 sps:$4 sm:$0xff]  }
   0x9   :  { %331 = vmatprep.mubr.bf16.mxu0 %v690_v13  ;;  %371 = vmatprep.mubr.bf16.mxu1 %v693_v15  ;;  %v670_v22 = vld [vmem:[%s919_s1 + $0xa4] ss:$8 sps:$4 sm:$0xff]   ;;  %v675_v25 = vld [vmem:[%s919_s1 + $0xb0] ss:$8 sps:$4 sm:$0xff]   ;;  %v678_v27 = vld [vmem:[%s919_s1 + $0xc0] ss:$8 sps:$4 sm:$0xff]  }
   0xa   :  { %v676_v26 = vld [vmem:[%s919_s1 + $0xc4] ss:$8 sps:$4 sm:$0xff]   ;;  %v679_v28 = vld [vmem:[%s919_s1 + $0xd4] ss:$8 sps:$4 sm:$0xff]   ;;  %v681_v29 = vld [vmem:[%s919_s1 + $0xd0] ss:$8 sps:$4 sm:$0xff]  }
   0xb   :  { %304 = vmatpush1.bf16.msra.mxu0 %v648_v5  ;;  %626 = vmatpush1.bf16.msra.mxu1 %v648_v5  ;;  %v682_v30 = vld [vmem:[%s919_s1 + $0xe4] ss:$8 sps:$4 sm:$0xff]   ;;  %v684_v31 = vld [vmem:[%s919_s1 + $0xe0] ss:$8 sps:$4 sm:$0xff]   ;;  %v685_v32 = vld [vmem:[%s919_s1 + $0xf4] ss:$8 sps:$4 sm:$0xff]  }
   0xc   :  { %305 = vmatprep.subr.bf16.mxu0 %v649_v6  ;;  %611 = vmatprep.subr.bf16.mxu1 %v649_v6  ;;  %v687_v33 = vld [vmem:[%s919_s1 + $0xf0] ss:$8 sps:$4 sm:$0xff]   ;;  %v688_v34 = vld [vmem:[%s920_s0] ss:$8 sps:$4 sm:$0xff]   ;;  %v694_v36 = vld [vmem:[%s920_s0 + $0x14] ss:$8 sps:$4 sm:$0xff]  }
   0xd   :  { %v691_v35 = vld [vmem:[%s920_s0 + $0x40] ss:$8 sps:$4 sm:$0xff]   ;;  %v696_v37 = vld [vmem:[%s920_s0 + $0x54] ss:$8 sps:$4 sm:$0xff]   ;;  %v698_v38 = vld [vmem:[%s920_s0 + $0x10] ss:$8 sps:$4 sm:$0xff]  }
   0xe   :  { %v699_v39 = vld [vmem:[%s920_s0 + $0x50] ss:$8 sps:$4 sm:$0xff]   ;;  %v700_v40 = vld [vmem:[%s920_s0 + $0x24] ss:$8 sps:$4 sm:$0xff]   ;;  %v704_v42 = vld [vmem:[%s920_s0 + $0x20] ss:$8 sps:$4 sm:$0xff]  }
   0xf   :  { %306 = vmatpush1.bf16.msra.mxu0 %v651_v7  ;;  %627 = vmatpush1.bf16.msra.mxu1 %v651_v7  ;;  %v702_v41 = vld [vmem:[%s920_s0 + $0x64] ss:$8 sps:$4 sm:$0xff]   ;;  %v705_v43 = vld [vmem:[%s920_s0 + $0x60] ss:$8 sps:$4 sm:$0xff]   ;;  %v706_v44 = vld [vmem:[%s920_s0 + $0x34] ss:$8 sps:$4 sm:$0xff]  }
  0x10   :  { %307 = vmatprep.subr.bf16.mxu0 %v652_v8  ;;  %612 = vmatprep.subr.bf16.mxu1 %v652_v8  ;;  %v708_v45 = vld [vmem:[%s920_s0 + $0x74] ss:$8 sps:$4 sm:$0xff]   ;;  %v710_v46 = vld [vmem:[%s920_s0 + $0x30] ss:$8 sps:$4 sm:$0xff]  }
  0x11   :  { %v711_v47 = vld [vmem:[%s920_s0 + $0x70] ss:$8 sps:$4 sm:$0xff]  }
  0x13   :  { %308 = vmatpush1.bf16.msra.mxu0 %v654_v9  ;;  %628 = vmatpush1.bf16.msra.mxu1 %v654_v9 }
  0x14   :  { %309 = vmatprep.subr.bf16.mxu0 %v655_v10  ;;  %613 = vmatprep.subr.bf16.mxu1 %v655_v10 }
  0x17   :  { %310 = vmatpush1.bf16.msra.mxu0 %v657_v11  ;;  %629 = vmatpush1.bf16.msra.mxu1 %v657_v11 }
  0x18   :  { %311 = vmatprep.subr.bf16.mxu0 %v658_v12  ;;  %614 = vmatprep.subr.bf16.mxu1 %v658_v12 }
  0x1b   :  { %312 = vmatpush1.bf16.msra.mxu0 %v660_v14  ;;  %630 = vmatpush1.bf16.msra.mxu1 %v660_v14 }
  0x1c   :  { %313 = vmatprep.subr.bf16.mxu0 %v661_v16  ;;  %615 = vmatprep.subr.bf16.mxu1 %v661_v16 }
  0x1f   :  { %314 = vmatpush1.bf16.msra.mxu0 %v663_v17  ;;  %631 = vmatpush1.bf16.msra.mxu1 %v663_v17 }
  0x20   :  { %315 = vmatprep.subr.bf16.mxu0 %v664_v18  ;;  %616 = vmatprep.subr.bf16.mxu1 %v664_v18 }
  0x23   :  { %316 = vmatpush1.bf16.msra.mxu0 %v666_v19  ;;  %632 = vmatpush1.bf16.msra.mxu1 %v666_v19 }
  0x24   :  { %317 = vmatprep.subr.bf16.mxu0 %v667_v20  ;;  %617 = vmatprep.subr.bf16.mxu1 %v667_v20 }
  0x27   :  { %318 = vmatpush1.bf16.msra.mxu0 %v669_v21  ;;  %633 = vmatpush1.bf16.msra.mxu1 %v669_v21 }
  0x28   :  { %319 = vmatprep.subr.bf16.mxu0 %v670_v22  ;;  %618 = vmatprep.subr.bf16.mxu1 %v670_v22 }
  0x2b   :  { %320 = vmatpush1.bf16.msra.mxu0 %v672_v23  ;;  %634 = vmatpush1.bf16.msra.mxu1 %v672_v23 }
  0x2c   :  { %321 = vmatprep.subr.bf16.mxu0 %v673_v24  ;;  %619 = vmatprep.subr.bf16.mxu1 %v673_v24 }
  0x2f   :  { %322 = vmatpush1.bf16.msra.mxu0 %v675_v25  ;;  %635 = vmatpush1.bf16.msra.mxu1 %v675_v25 }
  0x30   :  { %323 = vmatprep.subr.bf16.mxu0 %v676_v26  ;;  %620 = vmatprep.subr.bf16.mxu1 %v676_v26 }
  0x33   :  { %324 = vmatpush1.bf16.msra.mxu0 %v678_v27  ;;  %636 = vmatpush1.bf16.msra.mxu1 %v678_v27 }
  0x34   :  { %325 = vmatprep.subr.bf16.mxu0 %v679_v28  ;;  %621 = vmatprep.subr.bf16.mxu1 %v679_v28 }
  0x37   :  { %326 = vmatpush1.bf16.msra.mxu0 %v681_v29  ;;  %637 = vmatpush1.bf16.msra.mxu1 %v681_v29 }
  0x38   :  { %327 = vmatprep.subr.bf16.mxu0 %v682_v30  ;;  %622 = vmatprep.subr.bf16.mxu1 %v682_v30 }
  0x3b   :  { %328 = vmatpush1.bf16.msra.mxu0 %v684_v31  ;;  %638 = vmatpush1.bf16.msra.mxu1 %v684_v31 }
  0x3c   :  { %329 = vmatprep.subr.bf16.mxu0 %v685_v32  ;;  %623 = vmatprep.subr.bf16.mxu1 %v685_v32 }
  0x3f   :  { %330 = vmatpush1.bf16.msra.mxu0 %v687_v33  ;;  %639 = vmatpush1.bf16.msra.mxu1 %v687_v33 }
  0x42   :  { %332 = vmatmul.mubr.bf16.vlgmr.msra.gmra.mrb[0].mxu0 %v688_v34  ;;  %372 = vmatmul.mubr.bf16.vlgmr.msra.gmra.mrb[0].mxu1 %v691_v35 }
  0x43   :  { %341 = vmatprep.mubr.bf16.mxu0 %v694_v36  ;;  %381 = vmatprep.mubr.bf16.mxu1 %v696_v37 }
  0x4a   :  { %342 = vmatmul.mubr.bf16.gmra.mrb[4].mxu0 %v698_v38  ;;  %382 = vmatmul.mubr.bf16.gmra.mrb[4].mxu1 %v699_v39 }
  0x4b   :  { %351 = vmatprep.mubr.bf16.mxu0 %v700_v40  ;;  %391 = vmatprep.mubr.bf16.mxu1 %v702_v41 }
  0x52   :  { %352 = vmatmul.mubr.bf16.gmra.mrb[8].mxu0 %v704_v42  ;;  %392 = vmatmul.mubr.bf16.gmra.mrb[8].mxu1 %v705_v43 }
  0x53   :  { %361 = vmatprep.mubr.bf16.mxu0 %v706_v44  ;;  %401 = vmatprep.mubr.bf16.mxu1 %v708_v45 }
  0x5a   :  { %362 = vmatmul.mubr.bf16.gmra.mrb[12].mxu0 %v710_v46  ;;  %402 = vmatmul.mubr.bf16.gmra.mrb[12].mxu1 %v711_v47 }
 0x115   :  { %v333_v48 = vpop.f32.mrb[0].mxu0  ;;  %v373_v49 = vpop.f32.mrb[0].mxu1 }
 0x116   :  { %v335_v50 = vpop.f32.mrb[1].mxu0  ;;  %v375_v51 = vpop.f32.mrb[1].mxu1 }
 0x117   :  { %v592_v52 = vpack.c.bf16 %v335_v50, %v333_v48  ;;  %v600_v53 = vpack.c.bf16 %v375_v51, %v373_v49  ;;  %v337_v54 = vpop.f32.mrb[2].mxu0  ;;  %v377_v55 = vpop.f32.mrb[2].mxu1 }
 0x118   :  { %v339_v56 = vpop.f32.mrb[3].mxu0  ;;  %v379_v57 = vpop.f32.mrb[3].mxu1 }
 0x119   :  { %508 = vst [vmem:[%s921_s2] sm:$0xff] %v592_v52  ;;  %516 = vst [vmem:[%s921_s2 + $0x40] sm:$0xff] %v600_v53  ;;  %v593_v58 = vpack.c.bf16 %v339_v56, %v337_v54  ;;  %v601_v59 = vpack.c.bf16 %v379_v57, %v377_v55 }
 0x11b   :  { %509 = vst [vmem:[%s921_s2 + $0x8] sm:$0xff] %v593_v58  ;;  %517 = vst [vmem:[%s921_s2 + $0x48] sm:$0xff] %v601_v59 }
 0x11d   :  { %v343_v60 = vpop.f32.mrb[4].mxu0  ;;  %v383_v61 = vpop.f32.mrb[4].mxu1 }
 0x11e   :  { %v345_v62 = vpop.f32.mrb[5].mxu0  ;;  %v385_v63 = vpop.f32.mrb[5].mxu1 }
 0x11f   :  { %v594_v0 = vpack.c.bf16 %v345_v62, %v343_v60  ;;  %v602_v1 = vpack.c.bf16 %v385_v63, %v383_v61  ;;  %v347_v2 = vpop.f32.mrb[6].mxu0  ;;  %v387_v3 = vpop.f32.mrb[6].mxu1 }
 0x120   :  { %v349_v4 = vpop.f32.mrb[7].mxu0  ;;  %v389_v5 = vpop.f32.mrb[7].mxu1 }
 0x121   :  { %510 = vst [vmem:[%s921_s2 + $0x10] sm:$0xff] %v594_v0  ;;  %518 = vst [vmem:[%s921_s2 + $0x50] sm:$0xff] %v602_v1  ;;  %v595_v6 = vpack.c.bf16 %v349_v4, %v347_v2  ;;  %v603_v7 = vpack.c.bf16 %v389_v5, %v387_v3 }
 0x123   :  { %511 = vst [vmem:[%s921_s2 + $0x18] sm:$0xff] %v595_v6  ;;  %519 = vst [vmem:[%s921_s2 + $0x58] sm:$0xff] %v603_v7 }
 0x125   :  { %v353_v8 = vpop.f32.mrb[8].mxu0  ;;  %v393_v9 = vpop.f32.mrb[8].mxu1 }
 0x126   :  { %v355_v10 = vpop.f32.mrb[9].mxu0  ;;  %v395_v11 = vpop.f32.mrb[9].mxu1 }
 0x127   :  { %v596_v12 = vpack.c.bf16 %v355_v10, %v353_v8  ;;  %v604_v13 = vpack.c.bf16 %v395_v11, %v393_v9  ;;  %v357_v14 = vpop.f32.mrb[10].mxu0  ;;  %v397_v15 = vpop.f32.mrb[10].mxu1 }
 0x128   :  { %v359_v16 = vpop.f32.mrb[11].mxu0  ;;  %v399_v17 = vpop.f32.mrb[11].mxu1 }
 0x129   :  { %512 = vst [vmem:[%s921_s2 + $0x20] sm:$0xff] %v596_v12  ;;  %520 = vst [vmem:[%s921_s2 + $0x60] sm:$0xff] %v604_v13  ;;  %v597_v18 = vpack.c.bf16 %v359_v16, %v357_v14  ;;  %v605_v19 = vpack.c.bf16 %v399_v17, %v397_v15 }
 0x12b   :  { %513 = vst [vmem:[%s921_s2 + $0x28] sm:$0xff] %v597_v18  ;;  %521 = vst [vmem:[%s921_s2 + $0x68] sm:$0xff] %v605_v19 }
 0x12d   :  { %v363_v20 = vpop.f32.mrb[12].mxu0  ;;  %v403_v21 = vpop.f32.mrb[12].mxu1 }
 0x12e   :  { %v365_v22 = vpop.f32.mrb[13].mxu0  ;;  %v405_v23 = vpop.f32.mrb[13].mxu1 }
 0x12f   :  { %v598_v24 = vpack.c.bf16 %v365_v22, %v363_v20  ;;  %v606_v25 = vpack.c.bf16 %v405_v23, %v403_v21  ;;  %v367_v26 = vpop.f32.mrb[14].mxu0  ;;  %v407_v27 = vpop.f32.mrb[14].mxu1 }
 0x130   :  { %v369_v28 = vpop.f32.mrb[15].mxu0  ;;  %v409_v29 = vpop.f32.mrb[15].mxu1 }
 0x131   :  { %514 = vst [vmem:[%s921_s2 + $0x30] sm:$0xff] %v598_v24  ;;  %522 = vst [vmem:[%s921_s2 + $0x70] sm:$0xff] %v606_v25  ;;  %v599_v30 = vpack.c.bf16 %v369_v28, %v367_v26  ;;  %v607_v31 = vpack.c.bf16 %v409_v29, %v407_v27 }
 0x133   :  { %515 = vst [vmem:[%s921_s2 + $0x38] sm:$0xff] %v599_v30  ;;  %523 = vst [vmem:[%s921_s2 + $0x78] sm:$0xff] %v607_v31 }

// kernel: kpaflow_forward.6
= control target key start
LH: loop header
LB: loop body
LE: loop exit
PB: predicated region body
PF: predicated region fallthrough
CT: control target
= control target key end

     0   :  { %v1000_v1 = vmov 0   ;;  %vm404_vm0 = vcmask 523264   ;;  %s1281_s1 = inlined_call_operand.vmem [shape: bf16[320,256], index: 1, kind: input, shape index: {}]   ;;  %s1282_s0 = inlined_call_operand.vmem [shape: bf16[128,320], index: 0, kind: input, shape index: {}]   ;;  %s1283_s2 = inlined_call_operand.vmem [shape: bf16[128,256], index: 2, kind: output, shape index: {}]  }
   0x1   :  { %v908_v0 = vld [vmem:[%s1281_s1 + $0x4] ss:$8 sps:$4 sm:$0xff]   ;;  %574 = vmatprep.mubr.bf16.mxu0 %v1000_v1  ;;  %v910_v2 = vld [vmem:[%s1281_s1] ss:$8 sps:$4 sm:$0xff]   ;;  %v911_v3 = vld [vmem:[%s1281_s1 + $0x14] ss:$8 sps:$4 sm:$0xff]  }
   0x2   :  { %429 = vmatprep.subr.bf16.mxu1 %v908_v0  ;;  %v913_v4 = vld [vmem:[%s1281_s1 + $0x10] ss:$8 sps:$4 sm:$0xff]   ;;  %v914_v5 = vld [vmem:[%s1281_s1 + $0x24] ss:$8 sps:$4 sm:$0xff]   ;;  %v916_v6 = vld [vmem:[%s1281_s1 + $0x20] ss:$8 sps:$4 sm:$0xff]  }
   0x3   :  { %430 = vmatpush1.bf16.msra.mxu1 %v910_v2  ;;  %v917_v7 = vld [vmem:[%s1281_s1 + $0x34] ss:$8 sps:$4 sm:$0xff]   ;;  %v919_v8 = vld [vmem:[%s1281_s1 + $0x30] ss:$8 sps:$4 sm:$0xff]   ;;  %v920_v9 = vld [vmem:[%s1281_s1 + $0x44] ss:$8 sps:$4 sm:$0xff]  }
   0x4   :  { %431 = vmatprep.subr.bf16.mxu1 %v911_v3  ;;  %v922_v10 = vld [vmem:[%s1281_s1 + $0x40] ss:$8 sps:$4 sm:$0xff]   ;;  %v923_v11 = vld [vmem:[%s1281_s1 + $0x54] ss:$8 sps:$4 sm:$0xff]   ;;  %v944_v12 = vld [vmem:[%s1281_s1 + $0x104] ss:$8 sps:$4 sm:$0xff]  }
   0x5   :  { %v946_v13 = vld [vmem:[%s1281_s1 + $0x100] ss:$8 sps:$4 sm:$0xff]   ;;  %v925_v14 = vld [vmem:[%s1281_s1 + $0x50] ss:$8 sps:$4 sm:$0xff]   ;;  %542 = vmatprep.subr.bf16.mxu0 %v944_v12  ;;  %v950_v15 = vld [vmem:[%s1281_s1 + $0x114] ss:$8 sps:$4 sm:$0xff]  }
   0x6   :  { %543 = vmatpush1.bf16.msra.mxu0 %v946_v13  ;;  %v952_v16 = vld [vmem:[%s1281_s1 + $0x110] ss:$8 sps:$4 sm:$0xff]   ;;  %v926_v17 = vld [vmem:[%s1281_s1 + $0x64] ss:$8 sps:$4 sm:$0xff]   ;;  %v928_v18 = vld [vmem:[%s1281_s1 + $0x60] ss:$8 sps:$4 sm:$0xff]  }
   0x7   :  { %432 = vmatpush1.bf16.msra.mxu1 %v913_v4  ;;  %544 = vmatprep.subr.bf16.mxu0 %v950_v15  ;;  %v956_v19 = vld [vmem:[%s1281_s1 + $0x124] ss:$8 sps:$4 sm:$0xff]   ;;  %v929_v20 = vld [vmem:[%s1281_s1 + $0x74] ss:$8 sps:$4 sm:$0xff]   ;;  %v958_v21 = vld [vmem:[%s1281_s1 + $0x120] ss:$8 sps:$4 sm:$0xff]  }
   0x8   :  { %433 = vmatprep.subr.bf16.mxu1 %v914_v5  ;;  %v962_v22 = vld [vmem:[%s1281_s1 + $0x134] ss:$8 sps:$4 sm:$0xff]   ;;  %v931_v23 = vld [vmem:[%s1281_s1 + $0x70] ss:$8 sps:$4 sm:$0xff]   ;;  %v932_v25 = vld [vmem:[%s1281_s1 + $0x84] ss:$8 sps:$4 sm:$0xff]  }
   0x9   :  { %v964_v24 = vld [vmem:[%s1281_s1 + $0x130] ss:$8 sps:$4 sm:$0xff]   ;;  %v968_v27 = vld [vmem:[%s1282_s0 + $0x8] ss:$12 sps:$4 sm:$0xff]   ;;  %v938_v31 = vld [vmem:[%s1281_s1 + $0xa4] ss:$8 sps:$4 sm:$0xff]  }
   0xa   :  { %545 = vmatpush1.bf16.msra.mxu0 %v952_v16  ;;  %v971_v26 = vld [vmem:[%s1282_s0 + $0x4] ss:$12 sps:$4 sm:$0xff]   ;;  %v934_v28 = vld [vmem:[%s1281_s1 + $0x80] ss:$8 sps:$4 sm:$0xff]   ;;  %v935_v29 = vld [vmem:[%s1281_s1 + $0x94] ss:$8 sps:$4 sm:$0xff]  }
   0xb   :  { %434 = vmatpush1.bf16.msra.mxu1 %v916_v6  ;;  %546 = vmatprep.subr.bf16.mxu0 %v956_v19  ;;  %v937_v30 = vld [vmem:[%s1281_s1 + $0x90] ss:$8 sps:$4 sm:$0xff]   ;;  %v972_v32 = vld [vmem:[%s1282_s0 + $0x20] ss:$12 sps:$4 sm:$0xff]   ;;  %v941_v34 = vld [vmem:[%s1281_s1 + $0xb4] ss:$8 sps:$4 sm:$0xff]  }
   0xc   :  { %435 = vmatprep.subr.bf16.mxu1 %v917_v7  ;;  %461 = vmatprep.mubr.bf16.mxu1 %v971_v26  ;;  %v940_v33 = vld [vmem:[%s1281_s1 + $0xa0] ss:$8 sps:$4 sm:$0xff]   ;;  %v943_v35 = vld [vmem:[%s1281_s1 + $0xb0] ss:$8 sps:$4 sm:$0xff]   ;;  %v947_v36 = vld [vmem:[%s1281_s1 + $0xc4] ss:$8 sps:$4 sm:$0xff]  }
   0xd   :  { %v976_v37 = vld [vmem:[%s1282_s0 + $0x38] ss:$12 sps:$4 sm:$0xff]   ;;  %v949_v38 = vld [vmem:[%s1281_s1 + $0xc0] ss:$8 sps:$4 sm:$0xff]   ;;  %v953_v39 = vld [vmem:[%s1281_s1 + $0xd4] ss:$8 sps:$4 sm:$0xff]  }
   0xe   :  { %547 = vmatpush1.bf16.msra.mxu0 %v958_v21  ;;  %v955_v40 = vld [vmem:[%s1281_s1 + $0xd0] ss:$8 sps:$4 sm:$0xff]   ;;  %v959_v41 = vld [vmem:[%s1281_s1 + $0xe4] ss:$8 sps:$4 sm:$0xff]   ;;  %v961_v43 = vld [vmem:[%s1281_s1 + $0xe0] ss:$8 sps:$4 sm:$0xff]  }
   0xf   :  { %436 = vmatpush1.bf16.msra.mxu1 %v919_v8  ;;  %548 = vmatprep.subr.bf16.mxu0 %v962_v22  ;;  %v980_v42 = vld [vmem:[%s1282_s0 + $0x50] ss:$12 sps:$4 sm:$0xff]   ;;  %v969_v46 = vld [vmem:[%s1282_s0] ss:$12 sps:$4 sm:$0xff]   ;;  %v984_v47 = vld [vmem:[%s1282_s0 + $0x68] ss:$12 sps:$4 sm:$0xff]  }
  0x10   :  { %437 = vmatprep.subr.bf16.mxu1 %v920_v9  ;;  %v965_v44 = vld [vmem:[%s1281_s1 + $0xf4] ss:$8 sps:$4 sm:$0xff]   ;;  %v967_v45 = vld [vmem:[%s1281_s1 + $0xf0] ss:$8 sps:$4 sm:$0xff]   ;;  %v988_v50 = vld [vmem:[%s1282_s0 + $0x80] ss:$12 sps:$4 sm:$0xff]  }
  0x11   :  { %v973_v48 = vld [vmem:[%s1282_s0 + $0x1c] ss:$12 sps:$4 sm:$0xff]   ;;  %v975_v49 = vld [vmem:[%s1282_s0 + $0x18] ss:$12 sps:$4 sm:$0xff]   ;;  %v977_v51 = vld [vmem:[%s1282_s0 + $0x34] ss:$12 sps:$4 sm:$0xff]  }
  0x12   :  { %549 = vmatpush1.bf16.msra.mxu0 %v964_v24  ;;  %v979_v52 = vld [vmem:[%s1282_s0 + $0x30] ss:$12 sps:$4 sm:$0xff]   ;;  %v992_v53 = vld [vmem:[%s1282_s0 + $0x98] ss:$12 sps:$4 sm:$0xff]   ;;  %v983_v55 = vld [vmem:[%s1282_s0 + $0x48] ss:$12 sps:$4 sm:$0xff]  }
  0x13   :  { %438 = vmatpush1.bf16.msra.mxu1 %v922_v10  ;;  %v981_v54 = vld [vmem:[%s1282_s0 + $0x4c] ss:$12 sps:$4 sm:$0xff]   ;;  %v996_v56 = vld [vmem:[%s1282_s0 + $0xb0] ss:$12 sps:$4 sm:$0xff]   ;;  %v993_v61 = vld [vmem:[%s1282_s0 + $0x94] ss:$12 sps:$4 sm:$0xff]  }
  0x14   :  { %439 = vmatprep.subr.bf16.mxu1 %v923_v11  ;;  %v985_v57 = vld [vmem:[%s1282_s0 + $0x64] ss:$12 sps:$4 sm:$0xff]   ;;  %v987_v58 = vld [vmem:[%s1282_s0 + $0x60] ss:$12 sps:$4 sm:$0xff]   ;;  %v989_v59 = vld [vmem:[%s1282_s0 + $0x7c] ss:$12 sps:$4 sm:$0xff]  }
  0x15   :  { %835 = vmatmul.mubr.msk.bf16.vlgmr.msra.gmra.mrb[0].mxu0 %vm404_vm0, %v968_v27  ;;  %v991_v60 = vld [vmem:[%s1282_s0 + $0x78] ss:$12 sps:$4 sm:$0xff]   ;;  %v995_v62 = vld [vmem:[%s1282_s0 + $0x90] ss:$12 sps:$4 sm:$0xff]   ;;  %v999_v0 = vld [vmem:[%s1282_s0 + $0xa8] ss:$12 sps:$4 sm:$0xff]  }
  0x16   :  { %584 = vmatprep.mubr.bf16.mxu0 %v1000_v1  ;;  %v997_v63 = vld [vmem:[%s1282_s0 + $0xac] ss:$12 sps:$4 sm:$0xff]  }
  0x17   :  { %440 = vmatpush1.bf16.msra.mxu1 %v925_v14 }
  0x18   :  { %441 = vmatprep.subr.bf16.mxu1 %v926_v17 }
  0x1b   :  { %442 = vmatpush1.bf16.msra.mxu1 %v928_v18 }
  0x1c   :  { %443 = vmatprep.subr.bf16.mxu1 %v929_v20 }
  0x1d   :  { %836 = vmatmul.mubr.msk.bf16.gmra.mrb[4].mxu0 %vm404_vm0, %v972_v32 }
  0x1e   :  { %594 = vmatprep.mubr.bf16.mxu0 %v1000_v1 }
  0x1f   :  { %444 = vmatpush1.bf16.msra.mxu1 %v931_v23 }
  0x20   :  { %445 = vmatprep.subr.bf16.mxu1 %v932_v25 }
  0x23   :  { %446 = vmatpush1.bf16.msra.mxu1 %v934_v28 }
  0x24   :  { %447 = vmatprep.subr.bf16.mxu1 %v935_v29 }
  0x25   :  { %837 = vmatmul.mubr.msk.bf16.gmra.mrb[8].mxu0 %vm404_vm0, %v976_v37 }
  0x26   :  { %604 = vmatprep.mubr.bf16.mxu0 %v1000_v1 }
  0x27   :  { %448 = vmatpush1.bf16.msra.mxu1 %v937_v30 }
  0x28   :  { %449 = vmatprep.subr.bf16.mxu1 %v938_v31 }
  0x2b   :  { %450 = vmatpush1.bf16.msra.mxu1 %v940_v33 }
  0x2c   :  { %451 = vmatprep.subr.bf16.mxu1 %v941_v34 }
  0x2d   :  { %838 = vmatmul.mubr.msk.bf16.gmra.mrb[12].mxu0 %vm404_vm0, %v980_v42 }
  0x2e   :  { %614 = vmatprep.mubr.bf16.mxu0 %v1000_v1 }
  0x2f   :  { %452 = vmatpush1.bf16.msra.mxu1 %v943_v35 }
  0x30   :  { %453 = vmatprep.subr.bf16.mxu1 %v947_v36 }
  0x33   :  { %454 = vmatpush1.bf16.msra.mxu1 %v949_v38 }
  0x34   :  { %455 = vmatprep.subr.bf16.mxu1 %v953_v39 }
  0x35   :  { %839 = vmatmul.mubr.msk.bf16.gmra.mrb[16].mxu0 %vm404_vm0, %v984_v47 }
  0x36   :  { %624 = vmatprep.mubr.bf16.mxu0 %v1000_v1 }
  0x37   :  { %456 = vmatpush1.bf16.msra.mxu1 %v955_v40 }
  0x38   :  { %457 = vmatprep.subr.bf16.mxu1 %v959_v41 }
  0x3b   :  { %458 = vmatpush1.bf16.msra.mxu1 %v961_v43 }
  0x3c   :  { %459 = vmatprep.subr.bf16.mxu1 %v965_v44 }
  0x3d   :  { %840 = vmatmul.mubr.msk.bf16.gmra.mrb[20].mxu0 %vm404_vm0, %v988_v50 }
  0x3e   :  { %634 = vmatprep.mubr.bf16.mxu0 %v1000_v1 }
  0x3f   :  { %460 = vmatpush1.bf16.msra.mxu1 %v967_v45 }
  0x42   :  { %462 = vmatmul.mubr.bf16.vlgmr.msra.gmra.mrb[0].mxu1 %v969_v46 }
  0x43   :  { %471 = vmatprep.mubr.bf16.mxu1 %v973_v48 }
  0x45   :  { %841 = vmatmul.mubr.msk.bf16.gmra.mrb[24].mxu0 %vm404_vm0, %v992_v53 }
  0x46   :  { %644 = vmatprep.mubr.bf16.mxu0 %v1000_v1 }
  0x4a   :  { %472 = vmatmul.mubr.bf16.gmra.mrb[4].mxu1 %v975_v49 }
  0x4b   :  { %481 = vmatprep.mubr.bf16.mxu1 %v977_v51 }
  0x4d   :  { %842 = vmatmul.mubr.msk.bf16.gmra.mrb[28].mxu0 %vm404_vm0, %v996_v56 }
  0x52   :  { %482 = vmatmul.mubr.bf16.gmra.mrb[8].mxu1 %v979_v52 }
  0x53   :  { %491 = vmatprep.mubr.bf16.mxu1 %v981_v54 }
  0x5a   :  { %492 = vmatmul.mubr.bf16.gmra.mrb[12].mxu1 %v983_v55 }
  0x5b   :  { %501 = vmatprep.mubr.bf16.mxu1 %v985_v57 }
  0x62   :  { %502 = vmatmul.mubr.bf16.gmra.mrb[16].mxu1 %v987_v58 }
  0x63   :  { %511 = vmatprep.mubr.bf16.mxu1 %v989_v59 }
  0x6a   :  { %512 = vmatmul.mubr.bf16.gmra.mrb[20].mxu1 %v991_v60 }
  0x6b   :  { %521 = vmatprep.mubr.bf16.mxu1 %v993_v61 }
  0x72   :  { %522 = vmatmul.mubr.bf16.gmra.mrb[24].mxu1 %v995_v62 }
  0x73   :  { %531 = vmatprep.mubr.bf16.mxu1 %v997_v63 }
  0x7a   :  { %532 = vmatmul.mubr.bf16.gmra.mrb[28].mxu1 %v999_v0 }
  0xe8   :  { %v576_v1 = vpop.f32.mrb[0].mxu0 }
  0xe9   :  { %v578_v2 = vpop.f32.mrb[1].mxu0 }
  0xea   :  { %v580_v3 = vpop.f32.mrb[2].mxu0 }
  0xeb   :  { %v582_v4 = vpop.f32.mrb[3].mxu0 }
  0xf0   :  { %v586_v5 = vpop.f32.mrb[4].mxu0 }
  0xf1   :  { %v588_v6 = vpop.f32.mrb[5].mxu0 }
  0xf2   :  { %v590_v7 = vpop.f32.mrb[6].mxu0 }
  0xf3   :  { %v592_v8 = vpop.f32.mrb[7].mxu0 }
  0xf8   :  { %v596_v9 = vpop.f32.mrb[8].mxu0 }
  0xf9   :  { %v598_v10 = vpop.f32.mrb[9].mxu0 }
  0xfa   :  { %v600_v11 = vpop.f32.mrb[10].mxu0 }
  0xfb   :  { %v602_v12 = vpop.f32.mrb[11].mxu0 }
 0x100   :  { %v606_v13 = vpop.f32.mrb[12].mxu0 }
 0x101   :  { %v608_v14 = vpop.f32.mrb[13].mxu0 }
 0x102   :  { %v610_v15 = vpop.f32.mrb[14].mxu0 }
 0x103   :  { %v612_v16 = vpop.f32.mrb[15].mxu0 }
 0x108   :  { %v1224_v18 = vpop.f32.mrb[16].mxu0 }
 0x109   :  { %v1226_v21 = vpop.f32.mrb[17].mxu0 }
 0x10a   :  { %v1228_v24 = vpop.f32.mrb[18].mxu0 }
 0x10b   :  { %v622_v27 = vpop.f32.mrb[19].mxu0 }
 0x110   :  { %v626_v32 = vpop.f32.mrb[20].mxu0 }
 0x111   :  { %v628_v35 = vpop.f32.mrb[21].mxu0 }
 0x112   :  { %v630_v38 = vpop.f32.mrb[22].mxu0 }
 0x113   :  { %v632_v41 = vpop.f32.mrb[23].mxu0 }
 0x115   :  { %v463_v17 = vpop.f32.mrb[0].mxu1 }
 0x116   :  { %v577_v19 = vadd.f32 %v576_v1, %v463_v17  ;;  %v465_v20 = vpop.f32.mrb[1].mxu1 }
 0x117   :  { %v579_v22 = vadd.f32 %v578_v2, %v465_v20  ;;  %v467_v23 = vpop.f32.mrb[2].mxu1 }
 0x118   :  { %v581_v25 = vadd.f32 %v580_v3, %v467_v23  ;;  %v469_v26 = vpop.f32.mrb[3].mxu1  ;;  %v636_v46 = vpop.f32.mrb[24].mxu0 }
 0x119   :  { %v859_v28 = vpack.c.bf16 %v579_v22, %v577_v19  ;;  %v583_v29 = vadd.f32 %v582_v4, %v469_v26  ;;  %v638_v49 = vpop.f32.mrb[25].mxu0 }
 0x11a   :  { %v640_v52 = vpop.f32.mrb[26].mxu0 }
 0x11b   :  { %751 = vst [vmem:[%s1283_s2] sm:$0xff] %v859_v28  ;;  %v860_v30 = vpack.c.bf16 %v583_v29, %v581_v25  ;;  %v642_v55 = vpop.f32.mrb[27].mxu0 }
 0x11d   :  { %752 = vst [vmem:[%s1283_s2 + $0x8] sm:$0xff] %v860_v30  ;;  %v473_v31 = vpop.f32.mrb[4].mxu1 }
 0x11e   :  { %v587_v33 = vadd.f32 %v586_v5, %v473_v31  ;;  %v475_v34 = vpop.f32.mrb[5].mxu1 }
 0x11f   :  { %v589_v36 = vadd.f32 %v588_v6, %v475_v34  ;;  %v477_v37 = vpop.f32.mrb[6].mxu1 }
 0x120   :  { %v591_v39 = vadd.f32 %v590_v7, %v477_v37  ;;  %v479_v40 = vpop.f32.mrb[7].mxu1  ;;  %v646_v60 = vpop.f32.mrb[28].mxu0 }
 0x121   :  { %v861_v42 = vpack.c.bf16 %v589_v36, %v587_v33  ;;  %v593_v43 = vadd.f32 %v592_v8, %v479_v40  ;;  %v648_v63 = vpop.f32.mrb[29].mxu0 }
 0x122   :  { %v650_v2 = vpop.f32.mrb[30].mxu0 }
 0x123   :  { %753 = vst [vmem:[%s1283_s2 + $0x10] sm:$0xff] %v861_v42  ;;  %v862_v44 = vpack.c.bf16 %v593_v43, %v591_v39  ;;  %v652_v5 = vpop.f32.mrb[31].mxu0 }
 0x125   :  { %754 = vst [vmem:[%s1283_s2 + $0x18] sm:$0xff] %v862_v44  ;;  %v483_v45 = vpop.f32.mrb[8].mxu1 }
 0x126   :  { %v597_v47 = vadd.f32 %v596_v9, %v483_v45  ;;  %v485_v48 = vpop.f32.mrb[9].mxu1 }
 0x127   :  { %v599_v50 = vadd.f32 %v598_v10, %v485_v48  ;;  %v487_v51 = vpop.f32.mrb[10].mxu1 }
 0x128   :  { %v601_v53 = vadd.f32 %v600_v11, %v487_v51  ;;  %v489_v54 = vpop.f32.mrb[11].mxu1 }
 0x129   :  { %v863_v56 = vpack.c.bf16 %v599_v50, %v597_v47  ;;  %v603_v57 = vadd.f32 %v602_v12, %v489_v54 }
 0x12b   :  { %755 = vst [vmem:[%s1283_s2 + $0x20] sm:$0xff] %v863_v56  ;;  %v864_v58 = vpack.c.bf16 %v603_v57, %v601_v53 }
 0x12d   :  { %756 = vst [vmem:[%s1283_s2 + $0x28] sm:$0xff] %v864_v58  ;;  %v493_v59 = vpop.f32.mrb[12].mxu1 }
 0x12e   :  { %v607_v61 = vadd.f32 %v606_v13, %v493_v59  ;;  %v495_v62 = vpop.f32.mrb[13].mxu1 }
 0x12f   :  { %v609_v0 = vadd.f32 %v608_v14, %v495_v62  ;;  %v497_v1 = vpop.f32.mrb[14].mxu1 }
 0x130   :  { %v611_v3 = vadd.f32 %v610_v15, %v497_v1  ;;  %v499_v4 = vpop.f32.mrb[15].mxu1 }
 0x131   :  { %v865_v6 = vpack.c.bf16 %v609_v0, %v607_v61  ;;  %v613_v7 = vadd.f32 %v612_v16, %v499_v4 }
 0x133   :  { %757 = vst [vmem:[%s1283_s2 + $0x30] sm:$0xff] %v865_v6  ;;  %v866_v8 = vpack.c.bf16 %v613_v7, %v611_v3 }
 0x135   :  { %758 = vst [vmem:[%s1283_s2 + $0x38] sm:$0xff] %v866_v8  ;;  %v503_v9 = vpop.f32.mrb[16].mxu1 }
 0x136   :  { %v617_v10 = vadd.f32 %v1224_v18, %v503_v9  ;;  %v505_v11 = vpop.f32.mrb[17].mxu1 }
 0x137   :  { %v619_v12 = vadd.f32 %v1226_v21, %v505_v11  ;;  %v507_v13 = vpop.f32.mrb[18].mxu1 }
 0x138   :  { %v621_v14 = vadd.f32 %v1228_v24, %v507_v13  ;;  %v509_v15 = vpop.f32.mrb[19].mxu1 }
 0x139   :  { %v867_v16 = vpack.c.bf16 %v619_v12, %v617_v10  ;;  %v623_v17 = vadd.f32 %v622_v27, %v509_v15 }
 0x13b   :  { %759 = vst [vmem:[%s1283_s2 + $0x40] sm:$0xff] %v867_v16  ;;  %v868_v19 = vpack.c.bf16 %v623_v17, %v621_v14 }
 0x13d   :  { %760 = vst [vmem:[%s1283_s2 + $0x48] sm:$0xff] %v868_v19  ;;  %v513_v20 = vpop.f32.mrb[20].mxu1 }
 0x13e   :  { %v627_v18 = vadd.f32 %v626_v32, %v513_v20  ;;  %v515_v22 = vpop.f32.mrb[21].mxu1 }
 0x13f   :  { %v629_v23 = vadd.f32 %v628_v35, %v515_v22  ;;  %v517_v21 = vpop.f32.mrb[22].mxu1 }
 0x140   :  { %v631_v25 = vadd.f32 %v630_v38, %v517_v21  ;;  %v519_v26 = vpop.f32.mrb[23].mxu1 }
 0x141   :  { %v869_v24 = vpack.c.bf16 %v629_v23, %v627_v18  ;;  %v633_v28 = vadd.f32 %v632_v41, %v519_v26 }
 0x143   :  { %761 = vst [vmem:[%s1283_s2 + $0x50] sm:$0xff] %v869_v24  ;;  %v870_v27 = vpack.c.bf16 %v633_v28, %v631_v25 }
 0x145   :  { %762 = vst [vmem:[%s1283_s2 + $0x58] sm:$0xff] %v870_v27  ;;  %v523_v29 = vpop.f32.mrb[24].mxu1 }
 0x146   :  { %v637_v30 = vadd.f32 %v636_v46, %v523_v29  ;;  %v525_v31 = vpop.f32.mrb[25].mxu1 }
 0x147   :  { %v639_v32 = vadd.f32 %v638_v49, %v525_v31  ;;  %v527_v33 = vpop.f32.mrb[26].mxu1 }
 0x148   :  { %v641_v34 = vadd.f32 %v640_v52, %v527_v33  ;;  %v529_v35 = vpop.f32.mrb[27].mxu1 }
 0x149   :  { %v871_v36 = vpack.c.bf16 %v639_v32, %v637_v30  ;;  %v643_v37 = vadd.f32 %v642_v55, %v529_v35 }
 0x14b   :  { %763 = vst [vmem:[%s1283_s2 + $0x60] sm:$0xff] %v871_v36  ;;  %v872_v38 = vpack.c.bf16 %v643_v37, %v641_v34 }
 0x14d   :  { %764 = vst [vmem:[%s1283_s2 + $0x68] sm:$0xff] %v872_v38  ;;  %v533_v39 = vpop.f32.mrb[28].mxu1 }
 0x14e   :  { %v647_v40 = vadd.f32 %v646_v60, %v533_v39  ;;  %v535_v41 = vpop.f32.mrb[29].mxu1 }
 0x14f   :  { %v649_v42 = vadd.f32 %v648_v63, %v535_v41  ;;  %v537_v43 = vpop.f32.mrb[30].mxu1 }
 0x150   :  { %v651_v44 = vadd.f32 %v650_v2, %v537_v43  ;;  %v539_v45 = vpop.f32.mrb[31].mxu1 }
 0x151   :  { %v873_v46 = vpack.c.bf16 %v649_v42, %v647_v40  ;;  %v653_v47 = vadd.f32 %v652_v5, %v539_v45 }
 0x153   :  { %765 = vst [vmem:[%s1283_s2 + $0x70] sm:$0xff] %v873_v46  ;;  %v874_v48 = vpack.c.bf16 %v653_v47, %v651_v44 }
 0x155   :  { %766 = vst [vmem:[%s1283_s2 + $0x78] sm:$0xff] %v874_v48 }

// kernel: kpaflow_forward.9
= control target key start
LH: loop header
LB: loop body
LE: loop exit
PB: predicated region body
PF: predicated region fallthrough
CT: control target
= control target key end

     0   :  { %s718_s9 = smov 0   ;;  %s720_s10 = smov 0   ;;  %s786_s0 = inlined_call_operand.vmem [shape: bf16[2,64,256], index: 0, kind: input, shape index: {}]   ;;  %s787_s1 = inlined_call_operand.vmem [shape: bf16[2,64,256], index: 1, kind: input, shape index: {}]   ;;  %s788_s2 = inlined_call_operand.vmem [shape: bf16[2,64,64], index: 2, kind: output, shape index: {}]  }
   0x1   :  { %s722_s11 = smov 0  }
   0x2 LB: > { %s31_s12 = sadd.s32 1, %s697_s10  ;;  %p579_p0 = scmp.ge.s32.totalorder %s701_s11, 1  ;;  %s701_s11 = sphi %s722_s11, %s12_s11   ;;  %s697_s10 = sphi %s720_s10, %s790_s10   ;;  %s693_s9 = sphi %s718_s9, %s789_s9  }
   0x3   : > { %p33_p1 = scmp.ge.s32.totalorder %s31_s12, 2  ;;  %p161_p2 = scmp.lt.s32.totalorder %s701_s11, 3 }
   0x5   : > { %s792_s12 = smov (%p33_p1, %s31_s12), 0  ;;  %p162_p3 = pnand %p579_p0, %p161_p2 }
   0x6   : > { %p206_p4 = scmp.lt.s32.totalorder (!%p162_p3), %s693_s9, 1  ;;  %vm442_vm0 = vcmask (!%p162_p3), 519168  }
   0x7   : > { %165 = sbr.rel (%p162_p3) target bundleno = 277 (0x115), region = 28 }
   0xe   : > { %s794_s9 = smov (!%p206_p4, %s693_s9), 1 }
   0xf   : > { %s612_s13 = sshll.u32 %s794_s9, 6  ;;  %s614_s20 = sshll.u32 %s794_s9, 5 }
  0x10   : > { %s225_s16 = scalar_lea.vmem %s787_s1, %s612_s13  ;;  %s745_s19 = scalar_lea.vmem %s786_s0, %s612_s13 }
  0x11   : > { %v655_v0 = vld [vmem:[%s225_s16 + $0x4] ss:$8 sps:$4 sm:$0xff]   ;;  %v657_v1 = vld [vmem:[%s225_s16] ss:$8 sps:$4 sm:$0xff]   ;;  %v658_v2 = vld [vmem:[%s225_s16 + $0x14] ss:$8 sps:$4 sm:$0xff]   ;;  %s759_s23 = scalar_lea.vmem %s788_s2, %s614_s20 }
  0x12   : > { %337 = vmatprep.subr.bf16.mxu0 %v655_v0  ;;  %623 = vmatprep.subr.bf16.mxu1 %v655_v0  ;;  %v669_v3 = vld [vmem:[%s745_s19 + $0x4] ss:$8 sps:$4 sm:$0xff]   ;;  %v660_v4 = vld [vmem:[%s225_s16 + $0x10] ss:$8 sps:$4 sm:$0xff]   ;;  %v663_v7 = vld [vmem:[%s225_s16 + $0x20] ss:$8 sps:$4 sm:$0xff]  }
  0x13   : > { %338 = vmatpush1.bf16.xpose.msra.mxu0 %v657_v1  ;;  %627 = vmatpush1.bf16.xpose.msra.mxu1 %v657_v1  ;;  %v672_v5 = vld [vmem:[%s745_s19 + $0x24] ss:$8 sps:$4 sm:$0xff]   ;;  %v664_v8 = vld [vmem:[%s225_s16 + $0x34] ss:$8 sps:$4 sm:$0xff]   ;;  %v666_v9 = vld [vmem:[%s225_s16 + $0x30] ss:$8 sps:$4 sm:$0xff]  }
  0x14   : > { %339 = vmatprep.subr.bf16.mxu0 %v658_v2  ;;  %624 = vmatprep.subr.bf16.mxu1 %v658_v2  ;;  %v661_v6 = vld [vmem:[%s225_s16 + $0x24] ss:$8 sps:$4 sm:$0xff]   ;;  %v667_v10 = vld [vmem:[%s745_s19] ss:$8 sps:$4 sm:$0xff]   ;;  %v673_v12 = vld [vmem:[%s745_s19 + $0x14] ss:$8 sps:$4 sm:$0xff]  }
  0x15   : > { %369 = vmatprep.mubr.bf16.mxu0 %v669_v3  ;;  %385 = vmatprep.mubr.bf16.mxu1 %v672_v5  ;;  %v670_v11 = vld [vmem:[%s745_s19 + $0x20] ss:$8 sps:$4 sm:$0xff]   ;;  %v675_v13 = vld [vmem:[%s745_s19 + $0x34] ss:$8 sps:$4 sm:$0xff]   ;;  %v677_v14 = vld [vmem:[%s745_s19 + $0x10] ss:$8 sps:$4 sm:$0xff]  }
  0x16   : > { %v678_v15 = vld [vmem:[%s745_s19 + $0x30] ss:$8 sps:$4 sm:$0xff]  }
  0x1b   : > { %340 = vmatpush1.bf16.xpose.msra.mxu0 %v660_v4  ;;  %628 = vmatpush1.bf16.xpose.msra.mxu1 %v660_v4 }
  0x1c   : > { %341 = vmatprep.subr.bf16.mxu0 %v661_v6  ;;  %625 = vmatprep.subr.bf16.mxu1 %v661_v6 }
  0x23   : > { %342 = vmatpush1.bf16.xpose.msra.mxu0 %v663_v7  ;;  %629 = vmatpush1.bf16.xpose.msra.mxu1 %v663_v7 }
  0x24   : > { %343 = vmatprep.subr.bf16.mxu0 %v664_v8  ;;  %626 = vmatprep.subr.bf16.mxu1 %v664_v8 }
  0x2b   : > { %344 = vmatpush1.bf16.xpose.msra.mxu0 %v666_v9  ;;  %630 = vmatpush1.bf16.xpose.msra.mxu1 %v666_v9 }
  0x32   : > { %370 = vmatmul.mubr.bf16.vlgmr.msra.gmra.mrb[0].mxu0 %v667_v10  ;;  %386 = vmatmul.mubr.bf16.vlgmr.msra.gmra.mrb[0].mxu1 %v670_v11 }
  0x33   : > { %377 = vmatprep.mubr.bf16.mxu0 %v673_v12  ;;  %393 = vmatprep.mubr.bf16.mxu1 %v675_v13 }
  0x3a   : > { %378 = vmatmul.mubr.bf16.gmra.mrb[4].mxu0 %v677_v14  ;;  %394 = vmatmul.mubr.bf16.gmra.mrb[4].mxu1 %v678_v15 }
 0x105   : > { %v371_v16 = vpop.f32.mrb[0].mxu0  ;;  %v387_v17 = vpop.f32.mrb[0].mxu1 }
 0x106   : > { %v402_v18 = vmul.f32 0.0625, %v371_v16  ;;  %v406_v19 = vmul.f32 0.0625, %v387_v17  ;;  %v373_v20 = vpop.f32.mrb[1].mxu0  ;;  %v389_v21 = vpop.f32.mrb[1].mxu1 }
 0x107   : > { %v374_v22 = vpop.f32.mrb[2].mxu0  ;;  %v390_v23 = vpop.f32.mrb[2].mxu1 }
 0x108   : > { %v615_v24 = vpack.c.bf16 %v402_v18, %v402_v18  ;;  %v619_v25 = vpack.c.bf16 %v406_v19, %v406_v19  ;;  %v403_v26 = vmul.f32 0.0625, %v374_v22  ;;  %v407_v27 = vmul.f32 0.0625, %v390_v23  ;;  %v376_v28 = vpop.f32.mrb[3].mxu0  ;;  %v392_v29 = vpop.f32.mrb[3].mxu1 }
 0x10a   : > { %443 = vst.msk [vmem:[%s759_s23] sm:$0xf] %vm442_vm0, %v615_v24  ;;  %447 = vst.msk [vmem:[%s759_s23 + $0x10] sm:$0xf] %vm442_vm0, %v619_v25  ;;  %v616_v30 = vpack.c.bf16 %v403_v26, %v403_v26  ;;  %v620_v31 = vpack.c.bf16 %v407_v27, %v407_v27 }
 0x10c   : > { %444 = vst.msk [vmem:[%s759_s23 + $0x4] sm:$0xf] %vm442_vm0, %v616_v30  ;;  %448 = vst.msk [vmem:[%s759_s23 + $0x14] sm:$0xf] %vm442_vm0, %v620_v31 }
 0x10d   : > { %v379_v32 = vpop.f32.mrb[4].mxu0  ;;  %v395_v33 = vpop.f32.mrb[4].mxu1 }
 0x10e   : > { %v404_v34 = vmul.f32 0.0625, %v379_v32  ;;  %v408_v35 = vmul.f32 0.0625, %v395_v33  ;;  %v381_v36 = vpop.f32.mrb[5].mxu0  ;;  %v397_v37 = vpop.f32.mrb[5].mxu1 }
 0x10f   : > { %v382_v38 = vpop.f32.mrb[6].mxu0  ;;  %v398_v39 = vpop.f32.mrb[6].mxu1 }
 0x110   : > { %v617_v40 = vpack.c.bf16 %v404_v34, %v404_v34  ;;  %v621_v41 = vpack.c.bf16 %v408_v35, %v408_v35  ;;  %v405_v42 = vmul.f32 0.0625, %v382_v38  ;;  %v409_v43 = vmul.f32 0.0625, %v398_v39  ;;  %v384_v44 = vpop.f32.mrb[7].mxu0  ;;  %v400_v45 = vpop.f32.mrb[7].mxu1 }
 0x112   : > { %445 = vst.msk [vmem:[%s759_s23 + $0x8] sm:$0xf] %vm442_vm0, %v617_v40  ;;  %449 = vst.msk [vmem:[%s759_s23 + $0x18] sm:$0xf] %vm442_vm0, %v621_v41  ;;  %v618_v46 = vpack.c.bf16 %v405_v42, %v405_v42  ;;  %v622_v47 = vpack.c.bf16 %v409_v43, %v409_v43 }
 0x114   : > { %446 = vst.msk [vmem:[%s759_s23 + $0xc] sm:$0xf] %vm442_vm0, %v618_v46  ;;  %450 = vst.msk [vmem:[%s759_s23 + $0x1c] sm:$0xf] %vm442_vm0, %v622_v47 }
 0x115 PF: > { %s12_s11 = sadd.s32 1, %s701_s11   ;;  %s789_s9 = smov %s697_s10 }
 0x116   : > { %p9_p5 = scmp.ge.s32.totalorder %s12_s11, 4   ;;  %s790_s10 = smov %s792_s12 }
 0x118   :  { %11 = sbr.rel (!%p9_p5) target bundleno = 2 (0x2), region = 61 }

// kernel: sub.35
= control target key start
LH: loop header
LB: loop body
LE: loop exit
PB: predicated region body
PF: predicated region fallthrough
CT: control target
= control target key end

     0   :  { %s364_s0 = inlined_call_operand.vmem [shape: f32[128,2], index: 0, kind: input, shape index: {}]   ;;  %s365_s1 = inlined_call_operand.vmem [shape: f32[128,2], index: 1, kind: input, shape index: {}]   ;;  %s366_s2 = inlined_call_operand.vmem [shape: f32[128,2], index: 2, kind: output, shape index: {}]  }
   0x1   :  { %v3_v0 = vld [vmem:[%s364_s0] sm:$0xff]  ;;  %v160_v2 = vld [vmem:[%s364_s0 + $0x8] sm:$0xff]  ;;  %v163_v5 = vld [vmem:[%s364_s0 + $0x10] sm:$0xff] }
   0x2   :  { %v4_v1 = vld [vmem:[%s365_s1] sm:$0xff]  ;;  %v161_v4 = vld [vmem:[%s365_s1 + $0x8] sm:$0xff]  ;;  %v164_v6 = vld [vmem:[%s365_s1 + $0x10] sm:$0xff] }
   0x3   :  { %v7_v3 = vsub.f32 %v3_v0, %v4_v1  ;;  %v16_v7 = vsub.f32 %v160_v2, %v161_v4  ;;  %v26_v8 = vsub.f32 %v163_v5, %v164_v6  ;;  %v166_v9 = vld [vmem:[%s364_s0 + $0x18] sm:$0xff]  ;;  %v169_v11 = vld [vmem:[%s364_s0 + $0x20] sm:$0xff]  ;;  %v172_v14 = vld [vmem:[%s364_s0 + $0x28] sm:$0xff] }
   0x4   :  { %v167_v10 = vld [vmem:[%s365_s1 + $0x18] sm:$0xff]  ;;  %v170_v13 = vld [vmem:[%s365_s1 + $0x20] sm:$0xff]  ;;  %v173_v15 = vld [vmem:[%s365_s1 + $0x28] sm:$0xff] }
   0x5   :  { %9 = vst [vmem:[%s366_s2] sm:$0xff] %v7_v3  ;;  %v36_v12 = vsub.f32 %v166_v9, %v167_v10  ;;  %162 = vst [vmem:[%s366_s2 + $0x8] sm:$0xff] %v16_v7  ;;  %v46_v16 = vsub.f32 %v169_v11, %v170_v13  ;;  %v56_v17 = vsub.f32 %v172_v14, %v173_v15  ;;  %v175_v18 = vld [vmem:[%s364_s0 + $0x30] sm:$0xff]  ;;  %v178_v20 = vld [vmem:[%s364_s0 + $0x38] sm:$0xff] }
   0x6   :  { %165 = vst [vmem:[%s366_s2 + $0x10] sm:$0xff] %v26_v8  ;;  %v176_v19 = vld [vmem:[%s365_s1 + $0x30] sm:$0xff]  ;;  %v179_v22 = vld [vmem:[%s365_s1 + $0x38] sm:$0xff]  ;;  %v181_v23 = vld [vmem:[%s364_s0 + $0x40] sm:$0xff] }
   0x7   :  { %168 = vst [vmem:[%s366_s2 + $0x18] sm:$0xff] %v36_v12  ;;  %v66_v21 = vsub.f32 %v175_v18, %v176_v19  ;;  %v182_v24 = vld [vmem:[%s365_s1 + $0x40] sm:$0xff]  ;;  %171 = vst [vmem:[%s366_s2 + $0x20] sm:$0xff] %v46_v16  ;;  %v76_v25 = vsub.f32 %v178_v20, %v179_v22  ;;  %v184_v27 = vld [vmem:[%s364_s0 + $0x48] sm:$0xff] }
   0x8   :  { %174 = vst [vmem:[%s366_s2 + $0x28] sm:$0xff] %v56_v17  ;;  %v86_v26 = vsub.f32 %v181_v23, %v182_v24  ;;  %v185_v28 = vld [vmem:[%s365_s1 + $0x48] sm:$0xff]  ;;  %v187_v29 = vld [vmem:[%s364_s0 + $0x50] sm:$0xff]  ;;  %v190_v32 = vld [vmem:[%s364_s0 + $0x58] sm:$0xff] }
   0x9   :  { %177 = vst [vmem:[%s366_s2 + $0x30] sm:$0xff] %v66_v21  ;;  %v96_v30 = vsub.f32 %v184_v27, %v185_v28  ;;  %v188_v31 = vld [vmem:[%s365_s1 + $0x50] sm:$0xff]  ;;  %v191_v33 = vld [vmem:[%s365_s1 + $0x58] sm:$0xff]  ;;  %180 = vst [vmem:[%s366_s2 + $0x38] sm:$0xff] %v76_v25 }
   0xa   :  { %183 = vst [vmem:[%s366_s2 + $0x40] sm:$0xff] %v86_v26  ;;  %v106_v34 = vsub.f32 %v187_v29, %v188_v31  ;;  %v116_v35 = vsub.f32 %v190_v32, %v191_v33  ;;  %v193_v36 = vld [vmem:[%s364_s0 + $0x60] sm:$0xff]  ;;  %v196_v38 = vld [vmem:[%s364_s0 + $0x68] sm:$0xff]  ;;  %v199_v41 = vld [vmem:[%s364_s0 + $0x70] sm:$0xff] }
   0xb   :  { %v194_v37 = vld [vmem:[%s365_s1 + $0x60] sm:$0xff]  ;;  %186 = vst [vmem:[%s366_s2 + $0x48] sm:$0xff] %v96_v30  ;;  %v197_v40 = vld [vmem:[%s365_s1 + $0x68] sm:$0xff]  ;;  %v200_v42 = vld [vmem:[%s365_s1 + $0x70] sm:$0xff] }
   0xc   :  { %v126_v39 = vsub.f32 %v193_v36, %v194_v37  ;;  %189 = vst [vmem:[%s366_s2 + $0x50] sm:$0xff] %v106_v34  ;;  %192 = vst [vmem:[%s366_s2 + $0x58] sm:$0xff] %v116_v35  ;;  %v136_v43 = vsub.f32 %v196_v38, %v197_v40  ;;  %v146_v44 = vsub.f32 %v199_v41, %v200_v42  ;;  %v202_v45 = vld [vmem:[%s364_s0 + $0x78] sm:$0xff] }
   0xd   :  { %v203_v46 = vld [vmem:[%s365_s1 + $0x78] sm:$0xff] }
   0xe   :  { %195 = vst [vmem:[%s366_s2 + $0x60] sm:$0xff] %v126_v39  ;;  %v156_v47 = vsub.f32 %v202_v45, %v203_v46  ;;  %198 = vst [vmem:[%s366_s2 + $0x68] sm:$0xff] %v136_v43 }
   0xf   :  { %201 = vst [vmem:[%s366_s2 + $0x70] sm:$0xff] %v146_v44 }
  0x10   :  { %204 = vst [vmem:[%s366_s2 + $0x78] sm:$0xff] %v156_v47 }

// kernel: closed_call.12
= control target key start
LH: loop header
LB: loop body
LE: loop exit
PB: predicated region body
PF: predicated region fallthrough
CT: control target
= control target key end

     0   :  { %vm2627_vm0 = vcmask 15360   ;;  %s5056_s4 = inlined_call_operand.vmem [shape: bf16[384,128], index: 4, kind: input, shape index: {}]   ;;  %s5057_s2 = inlined_call_operand.vmem [shape: bf16[128,384], index: 2, kind: input, shape index: {}]   ;;  %s5058_s5 = inlined_call_operand.vmem [shape: bf16[384,384], index: 5, kind: input, shape index: {}]   ;;  %s5059_s1 = inlined_call_operand.vmem [shape: bf16[128,128], index: 1, kind: input, shape index: {}]   ;;  %s5060_s0 = inlined_call_operand.vmem [shape: f32[128,128], index: 0, kind: input, shape index: {}, may-alias: {0,9}]   ;;  %s5061_s6 = inlined_call_operand.vmem [shape: f32[2,384], index: 6, kind: input, shape index: {}]   ;;  %s5062_s7 = inlined_call_operand.vmem [shape: bf16[128,128], index: 7, kind: input, shape index: {}]   ;;  %s5063_s8 = inlined_call_operand.vmem [shape: bf16[128,2], index: 8, kind: input, shape index: {}]   ;;  %s5064_s9 = inlined_call_operand.vmem [shape: f32[128,128], index: 9, kind: output, shape index: {0}, may-alias: {0,9}]   ;;  %s5065_s3 = inlined_call_operand.vmem [shape: f32[128,2], index: 3, kind: input, shape index: {}, may-alias: {3,10}]   ;;  %s5066_s10 = inlined_call_operand.vmem [shape: f32[128,2], index: 10, kind: output, shape index: {1}, may-alias: {3,10}]  }
   0x1   :  { %v3353_v0 = vld [vmem:[%s5056_s4 + $0x40] sm:$0xff]   ;;  %v3356_v3 = vld [vmem:[%s5056_s4 + $0x48] sm:$0xff]   ;;  %v3359_v6 = vld [vmem:[%s5056_s4 + $0x50] sm:$0xff]  }
   0x2   :  { %v3354_v1 = vld [vmem:[%s5056_s4 + $0x80] sm:$0xff]   ;;  %2828 = vmatprep.subr.bf16.mxu0 %v3353_v0  ;;  %v3357_v4 = vld [vmem:[%s5056_s4 + $0x88] sm:$0xff]   ;;  %v3360_v7 = vld [vmem:[%s5056_s4 + $0x90] sm:$0xff]  }
   0x3   :  { %v3355_v2 = vld [vmem:[%s5056_s4] sm:$0xff]   ;;  %3020 = vmatprep.subr.bf16.mxu1 %v3354_v1  ;;  %v3358_v5 = vld [vmem:[%s5056_s4 + $0x8] sm:$0xff]   ;;  %v3361_v8 = vld [vmem:[%s5056_s4 + $0x10] sm:$0xff]  }
   0x4   :  { %2829 = vmatpush3.bf16.msra.mxu0 %v3355_v2  ;;  %3021 = vmatpush3.bf16.msra.mxu1 %v3354_v1  ;;  %v3362_v9 = vld [vmem:[%s5056_s4 + $0x58] sm:$0xff]   ;;  %v3365_v12 = vld [vmem:[%s5056_s4 + $0x60] sm:$0xff]   ;;  %v3368_v15 = vld [vmem:[%s5056_s4 + $0x68] sm:$0xff]  }
   0x5   :  { %2830 = vmatprep.subr.bf16.mxu0 %v3356_v3  ;;  %3022 = vmatprep.subr.bf16.mxu1 %v3357_v4  ;;  %v3363_v10 = vld [vmem:[%s5056_s4 + $0x98] sm:$0xff]   ;;  %v3366_v13 = vld [vmem:[%s5056_s4 + $0xa0] sm:$0xff]   ;;  %v3369_v16 = vld [vmem:[%s5056_s4 + $0xa8] sm:$0xff]  }
   0x6   :  { %v3364_v11 = vld [vmem:[%s5056_s4 + $0x18] sm:$0xff]   ;;  %v3367_v14 = vld [vmem:[%s5056_s4 + $0x20] sm:$0xff]   ;;  %v3370_v17 = vld [vmem:[%s5056_s4 + $0x28] sm:$0xff]  }
   0x7   :  { %v3371_v18 = vld [vmem:[%s5056_s4 + $0x70] sm:$0xff]   ;;  %v3374_v21 = vld [vmem:[%s5056_s4 + $0x78] sm:$0xff]   ;;  %v3826_v23 = vld [vmem:[%s5057_s2] sm:$0xff] }
   0x8   :  { %2831 = vmatpush3.bf16.msra.mxu0 %v3358_v5  ;;  %3023 = vmatpush3.bf16.msra.mxu1 %v3357_v4  ;;  %v3372_v19 = vld [vmem:[%s5056_s4 + $0xb0] sm:$0xff]   ;;  %v3375_v22 = vld [vmem:[%s5056_s4 + $0xb8] sm:$0xff]   ;;  %v3849_v29 = vld [vmem:[%s5057_s2 + $0x24] sm:$0xff] }
   0x9   :  { %2832 = vmatprep.subr.bf16.mxu0 %v3359_v6  ;;  %3024 = vmatprep.subr.bf16.mxu1 %v3360_v7  ;;  %v3373_v20 = vld [vmem:[%s5056_s4 + $0x30] sm:$0xff]   ;;  %v3376_v27 = vld [vmem:[%s5056_s4 + $0x38] sm:$0xff]   ;;  %v3380_v31 = vld [vmem:[%s5057_s2 + $0x20] ss:$12 sps:$4 sm:$0xff]  }
   0xa   :  { %v3831_v24 = vld [vmem:[%s5057_s2 + $0xc] sm:$0xff]  ;;  %v3378_v26 = vld [vmem:[%s5057_s2 + $0x8] ss:$12 sps:$4 sm:$0xff]   ;;  %v3844_v28 = vld [vmem:[%s5057_s2 + $0x18] sm:$0xff] }
   0xb   :  { %v2653_v25 = vcombine.high %v3826_v23, %v3831_v24  ;;  %3036 = vmatprep.mubr.bf16.mxu1 %v3378_v26  ;;  %v2652_v30 = vcombine.low %v3826_v23, %v3831_v24  ;;  %v2656_v32 = vcombine.high %v3844_v28, %v3849_v29  ;;  %v3383_v33 = vld [vmem:[%s5057_s2 + $0x38] ss:$12 sps:$4 sm:$0xff]   ;;  %v3864_v34 = vld [vmem:[%s5057_s2 + $0x30] sm:$0xff]  ;;  %v3869_v35 = vld [vmem:[%s5057_s2 + $0x3c] sm:$0xff]  ;;  %v2655_v38 = vcombine.low %v3844_v28, %v3849_v29 }
   0xc   :  { %2833 = vmatpush3.bf16.msra.mxu0 %v3361_v8  ;;  %3025 = vmatpush3.bf16.msra.mxu1 %v3360_v7  ;;  %v3401_v36 = vld [vmem:[%s5058_s5] ss:$12 sps:$4 sm:$0xff]   ;;  %v3403_v37 = vld [vmem:[%s5058_s5 + $0x4] ss:$12 sps:$4 sm:$0xff]   ;;  %v3406_v40 = vld [vmem:[%s5058_s5 + $0x1c] ss:$12 sps:$4 sm:$0xff]   ;;  %v2659_v41 = vcombine.high %v3864_v34, %v3869_v35  ;;  %v2658_v49 = vcombine.low %v3864_v34, %v3869_v35 }
   0xd   :  { %2834 = vmatprep.subr.bf16.mxu0 %v3362_v9  ;;  %3026 = vmatprep.subr.bf16.mxu1 %v3363_v10  ;;  %v3385_v39 = vld [vmem:[%s5057_s2 + $0x50] ss:$12 sps:$4 sm:$0xff]   ;;  %v3389_v42 = vld [vmem:[%s5057_s2 + $0x68] ss:$12 sps:$4 sm:$0xff]   ;;  %v3404_v43 = vld [vmem:[%s5058_s5 + $0x18] ss:$12 sps:$4 sm:$0xff]  }
   0xe   :  { %467 = vmatprep.mubr.bf16.mxu0 %v2653_v25  ;;  %v3409_v44 = vld [vmem:[%s5058_s5 + $0x34] ss:$12 sps:$4 sm:$0xff]   ;;  %v3899_v45 = vld [vmem:[%s5057_s2 + $0x48] sm:$0xff]  ;;  %v3407_v47 = vld [vmem:[%s5058_s5 + $0x30] ss:$12 sps:$4 sm:$0xff]  }
   0xf   :  { %v3904_v46 = vld [vmem:[%s5057_s2 + $0x54] sm:$0xff]  ;;  %v3391_v50 = vld [vmem:[%s5057_s2 + $0x80] ss:$12 sps:$4 sm:$0xff]   ;;  %v3415_v54 = vld [vmem:[%s5058_s5 + $0x64] ss:$12 sps:$4 sm:$0xff]  }
  0x10   :  { %2835 = vmatpush3.bf16.msra.mxu0 %v3364_v11  ;;  %3027 = vmatpush3.bf16.msra.mxu1 %v3363_v10  ;;  %v3412_v48 = vld [vmem:[%s5058_s5 + $0x4c] ss:$12 sps:$4 sm:$0xff]   ;;  %v2662_v51 = vcombine.high %v3899_v45, %v3904_v46  ;;  %v3410_v53 = vld [vmem:[%s5058_s5 + $0x48] ss:$12 sps:$4 sm:$0xff]   ;;  %v3931_v55 = vld [vmem:[%s5057_s2 + $0x60] sm:$0xff]  ;;  %v2661_v62 = vcombine.low %v3899_v45, %v3904_v46 }
  0x11   :  { %2836 = vmatprep.subr.bf16.mxu0 %v3365_v12  ;;  %3028 = vmatprep.subr.bf16.mxu1 %v3366_v13  ;;  %v3395_v52 = vld [vmem:[%s5057_s2 + $0x98] ss:$12 sps:$4 sm:$0xff]   ;;  %v3936_v56 = vld [vmem:[%s5057_s2 + $0x6c] sm:$0xff]  ;;  %v3434_v58 = vld [vmem:[%s5058_s5 + $0xc8] ss:$12 sps:$4 sm:$0xff]  }
  0x12   :  { %v3413_v57 = vld [vmem:[%s5058_s5 + $0x60] ss:$12 sps:$4 sm:$0xff]   ;;  %v3397_v59 = vld [vmem:[%s5057_s2 + $0xb0] ss:$12 sps:$4 sm:$0xff]   ;;  %v3435_v60 = vld [vmem:[%s5058_s5 + $0x8] ss:$12 sps:$4 sm:$0xff]   ;;  %v2665_v0 = vcombine.high %v3931_v55, %v3936_v56  ;;  %v2664_v11 = vcombine.low %v3931_v55, %v3936_v56 }
  0x13   :  { %v3418_v61 = vld [vmem:[%s5058_s5 + $0x7c] ss:$12 sps:$4 sm:$0xff]   ;;  %v3416_v63 = vld [vmem:[%s5058_s5 + $0x78] ss:$12 sps:$4 sm:$0xff]   ;;  %v3439_v1 = vld [vmem:[%s5058_s5 + $0xe0] ss:$12 sps:$4 sm:$0xff]  }
  0x14   :  { %2837 = vmatpush3.bf16.msra.mxu0 %v3367_v14  ;;  %3029 = vmatpush3.bf16.msra.mxu1 %v3366_v13  ;;  %v3440_v2 = vld [vmem:[%s5058_s5 + $0x20] ss:$12 sps:$4 sm:$0xff]   ;;  %v3972_v4 = vld [vmem:[%s5057_s2 + $0x78] sm:$0xff]  ;;  %v3977_v5 = vld [vmem:[%s5057_s2 + $0x84] sm:$0xff] }
  0x15   :  { %2838 = vmatprep.subr.bf16.mxu0 %v3368_v15  ;;  %3030 = vmatprep.subr.bf16.mxu1 %v3369_v16  ;;  %v3421_v3 = vld [vmem:[%s5058_s5 + $0x94] ss:$12 sps:$4 sm:$0xff]   ;;  %v3444_v6 = vld [vmem:[%s5058_s5 + $0xf8] ss:$12 sps:$4 sm:$0xff]   ;;  %v3419_v8 = vld [vmem:[%s5058_s5 + $0x90] ss:$12 sps:$4 sm:$0xff]   ;;  %v2668_v13 = vcombine.high %v3972_v4, %v3977_v5  ;;  %v2667_v25 = vcombine.low %v3972_v4, %v3977_v5 }
  0x16   :  { %v3445_v7 = vld [vmem:[%s5058_s5 + $0x38] ss:$12 sps:$4 sm:$0xff]   ;;  %v3449_v10 = vld [vmem:[%s5058_s5 + $0x110] ss:$12 sps:$4 sm:$0xff]   ;;  %v3422_v12 = vld [vmem:[%s5058_s5 + $0xa8] ss:$12 sps:$4 sm:$0xff]  }
  0x17   :  { %v3424_v9 = vld [vmem:[%s5058_s5 + $0xac] ss:$12 sps:$4 sm:$0xff]   ;;  %v3450_v14 = vld [vmem:[%s5058_s5 + $0x50] ss:$12 sps:$4 sm:$0xff]  }
  0x18   :  { %2839 = vmatpush3.bf16.msra.mxu0 %v3370_v17  ;;  %3031 = vmatpush3.bf16.msra.mxu1 %v3369_v16  ;;  %v3427_v15 = vld [vmem:[%s5058_s5 + $0xc4] ss:$12 sps:$4 sm:$0xff]   ;;  %v3454_v16 = vld [vmem:[%s5058_s5 + $0x128] ss:$12 sps:$4 sm:$0xff]  }
  0x19   :  { %2840 = vmatprep.subr.bf16.mxu0 %v3371_v18  ;;  %3032 = vmatprep.subr.bf16.mxu1 %v3372_v19  ;;  %v4013_v17 = vld [vmem:[%s5057_s2 + $0x90] sm:$0xff]  ;;  %v4018_v18 = vld [vmem:[%s5057_s2 + $0x9c] sm:$0xff]  ;;  %v3428_v26 = vld [vmem:[%s5058_s5 + $0xd8] ss:$12 sps:$4 sm:$0xff]  }
  0x1c   :  { %2841 = vmatpush3.bf16.msra.mxu0 %v3373_v20  ;;  %3033 = vmatpush3.bf16.msra.mxu1 %v3372_v19  ;;  %v3425_v19 = vld [vmem:[%s5058_s5 + $0xc0] ss:$12 sps:$4 sm:$0xff]   ;;  %v3455_v20 = vld [vmem:[%s5058_s5 + $0x68] ss:$12 sps:$4 sm:$0xff]  }
  0x1d   :  { %2842 = vmatprep.subr.bf16.mxu0 %v3374_v21  ;;  %3034 = vmatprep.subr.bf16.mxu1 %v3375_v22  ;;  %v3459_v21 = vld [vmem:[%s5058_s5 + $0x140] ss:$12 sps:$4 sm:$0xff]  }
  0x20   :  { %2843 = vmatpush3.bf16.msra.mxu0 %v3376_v27  ;;  %3035 = vmatpush3.bf16.msra.mxu1 %v3375_v22  ;;  %v3430_v22 = vld [vmem:[%s5058_s5 + $0xdc] ss:$12 sps:$4 sm:$0xff]   ;;  %v2671_v27 = vcombine.high %v4013_v17, %v4018_v18 }
  0x21   :  { %1346 = vmatprep.subr.bf16.mxu0 %v3403_v37  ;;  %2908 = vmatprep.subr.bf16.mxu1 %v3434_v58  ;;  %v4059_v37 = vld [vmem:[%s5057_s2 + $0xb4] sm:$0xff] }
  0x22   :  { %v3446_v58 = vld [vmem:[%s5058_s5 + $0x138] ss:$12 sps:$4 sm:$0xff]  }
  0x23   :  { %468 = vmatmul.mubr.bf16.vlgmr.msra.gmra.mrb[0].mxu0 %v2652_v30  ;;  %3037 = vmatmul.mubr.bf16.vlgmr.msra.gmra.mrb[0].mxu1 %v3380_v31  ;;  %v3460_v30 = vld [vmem:[%s5058_s5 + $0x80] ss:$12 sps:$4 sm:$0xff]  }
  0x24   :  { %475 = vmatprep.mubr.bf16.mxu0 %v2656_v32  ;;  %3040 = vmatprep.mubr.bf16.mxu1 %v3383_v33  ;;  %v3461_v31 = vld [vmem:[%s5059_s1] sm:$0xff]  }
  0x25   :  { %1347 = vmatpush1.bf16.msra.mxu0 %v3401_v36  ;;  %2909 = vmatpush3.bf16.msra.mxu1 %v3435_v60  ;;  %v3465_v32 = vld [vmem:[%s5058_s5 + $0x158] ss:$12 sps:$4 sm:$0xff]   ;;  %v3433_v33 = vld [vmem:[%s5058_s5 + $0xf4] ss:$12 sps:$4 sm:$0xff]   ;;  %v4054_v36 = vld [vmem:[%s5057_s2 + $0xa8] sm:$0xff] }
  0x26   :  { %1348 = vmatprep.subr.bf16.mxu0 %v3406_v40  ;;  %2910 = vmatprep.subr.bf16.mxu1 %v3439_v1  ;;  %v3467_v40 = vld [vmem:[%s5058_s5 + $0x170] ss:$12 sps:$4 sm:$0xff]  }
  0x27   :  { %v37_v60 = vld [vmem:[%s5060_s0 + $0x10] sm:$0xff] }
  0x29   :  { %1349 = vmatpush1.bf16.msra.mxu0 %v3404_v43  ;;  %2911 = vmatpush3.bf16.msra.mxu1 %v3440_v2  ;;  %v2674_v43 = vcombine.high %v4054_v36, %v4059_v37  ;;  %v3489_v2 = vld [vmem:[%s5058_s5 + $0x188] ss:$12 sps:$4 sm:$0xff]  }
  0x2a   :  { %1350 = vmatprep.subr.bf16.mxu0 %v3409_v44  ;;  %2912 = vmatprep.subr.bf16.mxu1 %v3444_v6  ;;  %v3436_v44 = vld [vmem:[%s5058_s5 + $0x108] ss:$12 sps:$4 sm:$0xff]  }
  0x2b   :  { %476 = vmatmul.mubr.bf16.gmra.mrb[4].mxu0 %v2655_v38  ;;  %3041 = vmatmul.mubr.bf16.gmra.mrb[4].mxu1 %v3385_v39  ;;  %v3431_v38 = vld [vmem:[%s5058_s5 + $0xf0] ss:$12 sps:$4 sm:$0xff]   ;;  %v3466_v39 = vld [vmem:[%s5058_s5 + $0x98] ss:$12 sps:$4 sm:$0xff]   ;;  %v3456_v6 = vld [vmem:[%s5058_s5 + $0x168] ss:$12 sps:$4 sm:$0xff]  }
  0x2c   :  { %483 = vmatprep.mubr.bf16.mxu0 %v2659_v41  ;;  %3044 = vmatprep.mubr.bf16.mxu1 %v3389_v42  ;;  %v3438_v41 = vld [vmem:[%s5058_s5 + $0x10c] ss:$12 sps:$4 sm:$0xff]   ;;  %v2670_v42 = vcombine.low %v4013_v17, %v4018_v18 }
  0x2d   :  { %1351 = vmatpush1.bf16.msra.mxu0 %v3407_v47  ;;  %2913 = vmatpush3.bf16.msra.mxu1 %v3445_v7  ;;  %v3468_v47 = vld [vmem:[%s5058_s5 + $0xb0] ss:$12 sps:$4 sm:$0xff]  }
  0x2e   :  { %1352 = vmatprep.subr.bf16.mxu0 %v3412_v48  ;;  %2914 = vmatprep.subr.bf16.mxu1 %v3449_v10  ;;  %v3443_v48 = vld [vmem:[%s5058_s5 + $0x124] ss:$12 sps:$4 sm:$0xff]  }
  0x2f   :  { %v3464_v7 = vld [vmem:[%s5058_s5 + $0x184] ss:$12 sps:$4 sm:$0xff]  }
  0x30   :  { %v3495_v10 = vld [vmem:[%s5058_s5 + $0x1b8] ss:$12 sps:$4 sm:$0xff]  }
  0x31   :  { %1353 = vmatpush1.bf16.msra.mxu0 %v3410_v53  ;;  %2915 = vmatpush3.bf16.msra.mxu1 %v3450_v14  ;;  %v3448_v53 = vld [vmem:[%s5058_s5 + $0x13c] ss:$12 sps:$4 sm:$0xff]  }
  0x32   :  { %1354 = vmatprep.subr.bf16.mxu0 %v3415_v54  ;;  %2916 = vmatprep.subr.bf16.mxu1 %v3454_v16  ;;  %v3469_v54 = vld [vmem:[%s5059_s1 + $0x8] sm:$0xff]   ;;  %v3476_v16 = vld [vmem:[%s5058_s5 + $0x1b4] ss:$12 sps:$4 sm:$0xff]  }
  0x33   :  { %484 = vmatmul.mubr.bf16.gmra.mrb[8].mxu0 %v2658_v49  ;;  %3045 = vmatmul.mubr.bf16.gmra.mrb[8].mxu1 %v3391_v50  ;;  %v35_v49 = vld [vmem:[%s5060_s0] sm:$0xff]  ;;  %v36_v50 = vld [vmem:[%s5060_s0 + $0x8] sm:$0xff] }
  0x34   :  { %491 = vmatprep.mubr.bf16.mxu0 %v2662_v51  ;;  %3048 = vmatprep.mubr.bf16.mxu1 %v3395_v52  ;;  %v3441_v51 = vld [vmem:[%s5058_s5 + $0x120] ss:$12 sps:$4 sm:$0xff]   ;;  %v645_v52 = vpack.c.bf16 %v36_v50, %v35_v49 }
  0x35   :  { %1355 = vmatpush1.bf16.msra.mxu0 %v3413_v57  ;;  %2917 = vmatpush3.bf16.msra.mxu1 %v3455_v20  ;;  %v2673_v57 = vcombine.low %v4054_v36, %v4059_v37  ;;  %v42_v20 = vld [vmem:[%s5060_s0 + $0x38] sm:$0xff]  ;;  %v3502_v49 = vld [vmem:[%s5058_s5 + $0x200] ss:$12 sps:$4 sm:$0xff]  }
  0x36   :  { %1356 = vmatprep.subr.bf16.mxu0 %v3418_v61  ;;  %2918 = vmatprep.subr.bf16.mxu1 %v3459_v21  ;;  %v38_v61 = vld [vmem:[%s5060_s0 + $0x18] sm:$0xff] }
  0x37   :  { %v646_v1 = vpack.c.bf16 %v38_v61, %v37_v60  ;;  %v3474_v21 = vld [vmem:[%s5058_s5 + $0x1b0] ss:$12 sps:$4 sm:$0xff]   ;;  %v3697_v60 = vmov 0  }
  0x38   :  { %3262 = vset.pattern.permute.xlu0 %v3697_v60  ;;  %v3504_v61 = vld [vmem:[%s5058_s5 + $0x230] ss:$12 sps:$4 sm:$0xff]  }
  0x39   :  { %1357 = vmatpush1.bf16.msra.mxu0 %v3416_v63  ;;  %2919 = vmatpush3.bf16.msra.mxu1 %v3460_v30  ;;  %v3458_v63 = vld [vmem:[%s5058_s5 + $0x16c] ss:$12 sps:$4 sm:$0xff]   ;;  %v3484_v30 = vld [vmem:[%s5058_s5 + $0x1e4] ss:$12 sps:$4 sm:$0xff]  }
  0x3a   :  { %1358 = vmatprep.subr.bf16.mxu0 %v3421_v3  ;;  %2920 = vmatprep.subr.bf16.mxu1 %v3465_v32  ;;  %v3490_v3 = vld [vmem:[%s5058_s5 + $0x1a0] ss:$12 sps:$4 sm:$0xff]  }
  0x3b   :  { %492 = vmatmul.mubr.bf16.gmra.mrb[12].mxu0 %v2661_v62  ;;  %3049 = vmatmul.mubr.bf16.gmra.mrb[12].mxu1 %v3397_v59  ;;  %v3453_v59 = vld [vmem:[%s5058_s5 + $0x154] ss:$12 sps:$4 sm:$0xff]   ;;  %v3451_v62 = vld [vmem:[%s5058_s5 + $0x150] ss:$12 sps:$4 sm:$0xff]   ;;  %v44_v32 = vld [vmem:[%s5060_s0 + $0x48] sm:$0xff] }
  0x3c   :  { %499 = vmatprep.mubr.bf16.mxu0 %v2665_v0  ;;  %1604 = vmatprep.mubr.bf16.mxu1 %v3461_v31  ;;  %v3473_v0 = vld [vmem:[%s5059_s1 + $0x10] sm:$0xff]  }
  0x3d   :  { %1359 = vmatpush1.bf16.msra.mxu0 %v3419_v8  ;;  %2921 = vmatpush3.bf16.msra.mxu1 %v3466_v39  ;;  %v39_v8 = vld [vmem:[%s5060_s0 + $0x20] sm:$0xff] }
  0x3e   :  { %1360 = vmatprep.subr.bf16.mxu0 %v3424_v9  ;;  %2922 = vmatprep.subr.bf16.mxu1 %v3467_v40  ;;  %v40_v9 = vld [vmem:[%s5060_s0 + $0x28] sm:$0xff] }
  0x3f   :  { %v647_v14 = vpack.c.bf16 %v40_v9, %v39_v8  ;;  %v3485_v40 = vld [vmem:[%s5059_s1 + $0x28] sm:$0xff]   ;;  %v3698_v8 = vmov 1   ;;  %v102_v9 = vunpack.c.l.bf16 %v3849_v29  ;;  %v109_v29 = vunpack.c.l.bf16 %v3972_v4 }
  0x40   :  { %3273 = vset.pattern.permute.xlu1 %v3698_v8 }
  0x41   :  { %1361 = vmatpush1.bf16.msra.mxu0 %v3422_v12  ;;  %2923 = vmatpush3.bf16.msra.mxu1 %v3468_v47  ;;  %v3472_v12 = vld [vmem:[%s5058_s5 + $0x19c] ss:$12 sps:$4 sm:$0xff]  }
  0x42   :  { %1362 = vmatprep.subr.bf16.mxu0 %v3427_v15  ;;  %3052 = vmatprep.subr.bf16.mxu1 %v3489_v2  ;;  %v3470_v15 = vld [vmem:[%s5058_s5 + $0x198] ss:$12 sps:$4 sm:$0xff]  }
  0x43   :  { %500 = vmatmul.mubr.bf16.gmra.mrb[16].mxu0 %v2664_v11  ;;  %v3462_v11 = vld [vmem:[%s5058_s5 + $0x180] ss:$12 sps:$4 sm:$0xff]   ;;  %v46_v47 = vld [vmem:[%s5060_s0 + $0x58] sm:$0xff] }
  0x44   :  { %507 = vmatprep.mubr.bf16.mxu0 %v2668_v13  ;;  %1605 = vmatmul.mubr.bf16.vlgmr.msra.gmra.mrb[16].mxu1 %v645_v52  ;;  %v3477_v13 = vld [vmem:[%s5059_s1 + $0x18] sm:$0xff]  }
  0x45   :  { %1363 = vmatpush1.bf16.msra.mxu0 %v3425_v19  ;;  %1612 = vmatprep.mubr.bf16.mxu1 %v3469_v54  ;;  %v41_v19 = vld [vmem:[%s5060_s0 + $0x30] sm:$0xff] }
  0x46   :  { %1364 = vmatprep.subr.bf16.mxu0 %v3430_v22  ;;  %3053 = vmatpush3.bf16.msra.mxu1 %v3489_v2  ;;  %v648_v22 = vpack.c.bf16 %v42_v20, %v41_v19 }
  0x47   :  { %3054 = vmatprep.subr.bf16.mxu1 %v3490_v3 }
  0x49   :  { %1365 = vmatpush1.bf16.msra.mxu0 %v3428_v26  ;;  %v3481_v26 = vld [vmem:[%s5059_s1 + $0x20] sm:$0xff]  }
  0x4a   :  { %1366 = vmatprep.subr.bf16.mxu0 %v3433_v33  ;;  %3055 = vmatpush3.bf16.msra.mxu1 %v3490_v3  ;;  %v3496_v33 = vld [vmem:[%s5058_s5 + $0x1d0] ss:$12 sps:$4 sm:$0xff]   ;;  %v99_v3 = vunpack.c.l.bf16 %v3826_v23  ;;  %v106_v23 = vunpack.c.l.bf16 %v3904_v46  ;;  %v111_v46 = vunpack.c.l.bf16 %v4013_v17 }
  0x4b   :  { %508 = vmatmul.mubr.bf16.gmra.mrb[20].mxu0 %v2667_v25  ;;  %3056 = vmatprep.subr.bf16.mxu1 %v3495_v10  ;;  %v3480_v25 = vld [vmem:[%s5058_s5 + $0x1cc] ss:$12 sps:$4 sm:$0xff]  }
  0x4c   :  { %515 = vmatprep.mubr.bf16.mxu0 %v2671_v27  ;;  %1613 = vmatmul.mubr.bf16.gmra.mrb[20].mxu1 %v646_v1  ;;  %v3478_v27 = vld [vmem:[%s5058_s5 + $0x1c8] ss:$12 sps:$4 sm:$0xff]  }
  0x4d   :  { %1367 = vmatpush1.bf16.msra.mxu0 %v3431_v38  ;;  %1620 = vmatprep.mubr.bf16.mxu1 %v3473_v0  ;;  %v3482_v38 = vld [vmem:[%s5058_s5 + $0x1e0] ss:$12 sps:$4 sm:$0xff]  }
  0x4e   :  { %1368 = vmatprep.subr.bf16.mxu0 %v3438_v41  ;;  %3057 = vmatpush3.bf16.msra.mxu1 %v3495_v10  ;;  %v3488_v41 = vld [vmem:[%s5058_s5 + $0x1fc] ss:$12 sps:$4 sm:$0xff]  }
  0x4f   :  { %3058 = vmatprep.subr.bf16.mxu1 %v3496_v33 }
  0x51   :  { %1369 = vmatpush1.bf16.msra.mxu0 %v3436_v44  ;;  %v45_v44 = vld [vmem:[%s5060_s0 + $0x50] sm:$0xff] }
  0x52   :  { %1370 = vmatprep.subr.bf16.mxu0 %v3443_v48  ;;  %v3494_v48 = vld [vmem:[%s5058_s5 + $0x214] ss:$12 sps:$4 sm:$0xff]   ;;  %3059 = vmatpush3.bf16.msra.mxu1 %v3496_v33  ;;  %v650_v50 = vpack.c.bf16 %v46_v47, %v45_v44 }
  0x53   :  { %516 = vmatmul.mubr.bf16.gmra.mrb[24].mxu0 %v2670_v42  ;;  %v3501_v42 = vld [vmem:[%s5058_s5 + $0x1e8] ss:$12 sps:$4 sm:$0xff]  }
  0x54   :  { %523 = vmatprep.mubr.bf16.mxu0 %v2674_v43  ;;  %1621 = vmatmul.mubr.bf16.gmra.mrb[24].mxu1 %v647_v14  ;;  %v3486_v43 = vld [vmem:[%s5058_s5 + $0x1f8] ss:$12 sps:$4 sm:$0xff]  }
  0x55   :  { %1371 = vmatpush1.bf16.msra.mxu0 %v3441_v51  ;;  %1628 = vmatprep.mubr.bf16.mxu1 %v3477_v13  ;;  %v3492_v51 = vld [vmem:[%s5058_s5 + $0x210] ss:$12 sps:$4 sm:$0xff]  }
  0x56   :  { %1372 = vmatprep.subr.bf16.mxu0 %v3448_v53  ;;  %3060 = vmatprep.subr.bf16.mxu1 %v3501_v42  ;;  %v3500_v53 = vld [vmem:[%s5058_s5 + $0x22c] ss:$12 sps:$4 sm:$0xff]  }
  0x57   :  { %3061 = vmatpush3.bf16.msra.mxu1 %v3501_v42 }
  0x58   :  { %3062 = vmatprep.subr.bf16.mxu1 %v3502_v49 }
  0x59   :  { %1373 = vmatpush1.bf16.msra.mxu0 %v3446_v58  ;;  %v47_v58 = vld [vmem:[%s5060_s0 + $0x60] sm:$0xff] }
  0x5a   :  { %1374 = vmatprep.subr.bf16.mxu0 %v3453_v59  ;;  %v48_v59 = vld [vmem:[%s5060_s0 + $0x68] sm:$0xff] }
  0x5b   :  { %524 = vmatmul.mubr.bf16.gmra.mrb[28].mxu0 %v2673_v57  ;;  %v3498_v57 = vld [vmem:[%s5058_s5 + $0x228] ss:$12 sps:$4 sm:$0xff]   ;;  %3063 = vmatpush3.bf16.msra.mxu1 %v3502_v49 }
  0x5c   :  { %1378 = vmatprep.mubr.bf16.mxu0 %v3461_v31  ;;  %1629 = vmatmul.mubr.bf16.gmra.mrb[28].mxu1 %v648_v22  ;;  %v43_v31 = vld [vmem:[%s5060_s0 + $0x40] sm:$0xff] }
  0x5d   :  { %1375 = vmatpush1.bf16.msra.mxu0 %v3451_v62  ;;  %1636 = vmatprep.mubr.bf16.mxu1 %v3481_v26  ;;  %v649_v39 = vpack.c.bf16 %v44_v32, %v43_v31  ;;  %v651_v62 = vpack.c.bf16 %v48_v59, %v47_v58 }
  0x5e   :  { %1376 = vmatprep.subr.bf16.mxu0 %v3458_v63  ;;  %v3497_v63 = vld [vmem:[%s5059_s1 + $0x38] sm:$0xff]  }
  0x61   :  { %1377 = vmatpush1.bf16.msra.mxu0 %v3456_v6  ;;  %v100_v6 = vunpack.c.l.bf16 %v3831_v24 }
  0x62   :  { %1459 = vmatprep.subr.bf16.mxu0 %v3464_v7  ;;  %v101_v7 = vunpack.c.l.bf16 %v3844_v28 }
  0x63   :  { %v3263_v10 = vpack.i.bf16 %v100_v6, %v99_v3 }
  0x64   :  { %1379 = vmatmul.mubr.bf16.vlgmr.msra.gmra.mrb[32].mxu0 %v645_v52  ;;  %1637 = vmatmul.mubr.bf16.gmra.mrb[32].mxu1 %v649_v39  ;;  %v3491_v52 = vld [vmem:[%s5059_s1 + $0x30] sm:$0xff]  }
  0x65   :  { %1460 = vmatpush1.bf16.msra.mxu0 %v3462_v11  ;;  %1388 = vmatprep.mubr.bf16.mxu0 %v3469_v54  ;;  %v3503_v54 = vld [vmem:[%s5058_s5 + $0x218] ss:$12 sps:$4 sm:$0xff]   ;;  %v3268_v11 = vpack.i.bf16 %v102_v9, %v101_v7 }
  0x66   :  { %1461 = vmatprep.subr.bf16.mxu0 %v3472_v12  ;;  %1644 = vmatprep.mubr.bf16.mxu1 %v3485_v40  ;;  %v103_v12 = vunpack.c.l.bf16 %v3864_v34  ;;  %v107_v34 = vunpack.c.l.bf16 %v3931_v55  ;;  %v113_v55 = vunpack.c.l.bf16 %v4054_v36 }
  0x67   :  { %3064 = vmatprep.subr.bf16.mxu1 %v3503_v54  ;;  %3264 = vperm.xlu0 %3262, %v3263_v10  }
  0x68   :  { %3065 = vmatpush3.bf16.msra.mxu1 %v3503_v54  ;;  %3275 = vperm.xlu1 %3273, %v3263_v10  }
  0x69   :  { %1462 = vmatpush1.bf16.msra.mxu0 %v3470_v15  ;;  %3066 = vmatprep.subr.bf16.mxu1 %v3504_v61  ;;  %v110_v15 = vunpack.c.l.bf16 %v3977_v5 }
  0x6a   :  { %1463 = vmatprep.subr.bf16.mxu0 %v3476_v16  ;;  %v112_v16 = vunpack.c.l.bf16 %v4018_v18 }
  0x6b   :  { %3269 = vperm.xlu0 %3262, %v3268_v11  }
  0x6c   :  { %1389 = vmatmul.mubr.bf16.gmra.mrb[36].mxu0 %v646_v1  ;;  %1645 = vmatmul.mubr.bf16.gmra.mrb[36].mxu1 %v650_v50  ;;  %v50_v1 = vld [vmem:[%s5060_s0 + $0x78] sm:$0xff]  ;;  %v3330_v4 = vpack.i.bf16 %v112_v16, %v111_v46 }
  0x6d   :  { %1398 = vmatprep.mubr.bf16.mxu0 %v3473_v0  ;;  %1464 = vmatpush1.bf16.msra.mxu0 %v3474_v21  ;;  %v49_v0 = vld [vmem:[%s5060_s0 + $0x70] sm:$0xff] }
  0x6e   :  { %1465 = vmatprep.subr.bf16.mxu0 %v3480_v25  ;;  %1652 = vmatprep.mubr.bf16.mxu1 %v3491_v52  ;;  %v652_v2 = vpack.c.bf16 %v50_v1, %v49_v0 }
  0x6f   :  { %3067 = vmatpush3.bf16.msra.mxu1 %v3504_v61  ;;  %3280 = vperm.xlu1 %3273, %v3268_v11  }
  0x71   :  { %1466 = vmatpush1.bf16.msra.mxu0 %v3478_v27 }
  0x72   :  { %1467 = vmatprep.subr.bf16.mxu0 %v3484_v30 }
  0x73   :  { %3289 = vset.pattern.permute.xlu1 %v3697_v60 }
  0x74   :  { %1399 = vmatmul.mubr.bf16.gmra.mrb[40].mxu0 %v647_v14  ;;  %1653 = vmatmul.mubr.bf16.gmra.mrb[40].mxu1 %v651_v62  ;;  %v105_v14 = vunpack.c.l.bf16 %v3899_v45  ;;  %v3314_v45 = vpack.i.bf16 %v110_v15, %v109_v29 }
  0x75   :  { %1408 = vmatprep.mubr.bf16.mxu0 %v3477_v13  ;;  %1468 = vmatpush1.bf16.msra.mxu0 %v3482_v38  ;;  %v104_v13 = vunpack.c.l.bf16 %v3869_v35  ;;  %v108_v35 = vunpack.c.l.bf16 %v3936_v56  ;;  %v114_v56 = vunpack.c.l.bf16 %v4059_v37 }
  0x76   :  { %1469 = vmatprep.subr.bf16.mxu0 %v3488_v41  ;;  %1660 = vmatprep.mubr.bf16.mxu1 %v3497_v63  ;;  %v3290_v28 = vpack.i.bf16 %v106_v23, %v105_v14 }
  0x77   :  { %v3284_v24 = vpack.i.bf16 %v104_v13, %v103_v12  ;;  %v3308_v19 = vpack.i.bf16 %v108_v35, %v107_v34  ;;  %v3336_v5 = vpack.i.bf16 %v114_v56, %v113_v55 }
  0x78   :  { %3291 = vperm.xlu1 %3289, %v3290_v28  }
  0x79   :  { %1470 = vmatpush1.bf16.msra.mxu0 %v3486_v43  ;;  %3285 = vperm.xlu0 %3262, %v3284_v24  }
  0x7a   :  { %1471 = vmatprep.subr.bf16.mxu0 %v3494_v48 }
  0x7c   :  { %1409 = vmatmul.mubr.bf16.gmra.mrb[44].mxu0 %v648_v22  ;;  %1661 = vmatmul.mubr.bf16.gmra.mrb[44].mxu1 %v652_v2 }
  0x7d   :  { %1418 = vmatprep.mubr.bf16.mxu0 %v3481_v26  ;;  %1472 = vmatpush1.bf16.msra.mxu0 %v3492_v51 }
  0x7e   :  { %1473 = vmatprep.subr.bf16.mxu0 %v3500_v53  ;;  %3295 = vset.pattern.permute.xlu0 %v3698_v8 }
  0x7f   :  { %3297 = vperm.xlu0 %3295, %v3284_v24   ;;  %3301 = vset.pattern.permute.xlu1 %v3698_v8 }
  0x80   :  { %3303 = vperm.xlu1 %3301, %v3290_v28  }
  0x81   :  { %1474 = vmatpush1.bf16.msra.mxu0 %v3498_v57 }
  0x83   :  { %3313 = vset.pattern.permute.xlu0 %v3697_v60 }
  0x84   :  { %1419 = vmatmul.mubr.bf16.gmra.mrb[48].mxu0 %v649_v39  ;;  %3307 = vset.pattern.permute.xlu1 %v3697_v60 }
  0x85   :  { %1428 = vmatprep.mubr.bf16.mxu0 %v3485_v40  ;;  %3315 = vperm.xlu0 %3313, %v3314_v45  }
  0x86   :  { %3309 = vperm.xlu1 %3307, %v3308_v19  }
  0x89   :  { %3331 = vperm.xlu0 %3313, %v3330_v4  }
  0x8a   :  { %3319 = vset.pattern.permute.xlu1 %v3698_v8 }
  0x8b   :  { %3321 = vperm.xlu1 %3319, %v3308_v19  }
  0x8c   :  { %1429 = vmatmul.mubr.bf16.gmra.mrb[52].mxu0 %v650_v50 }
  0x8d   :  { %1438 = vmatprep.mubr.bf16.mxu0 %v3491_v52  ;;  %3341 = vset.pattern.permute.xlu0 %v3698_v8 }
  0x8e   :  { %3343 = vperm.xlu0 %3341, %v3330_v4  }
  0x8f   :  { %3326 = vperm.xlu1 %3319, %v3314_v45  }
  0x93   :  { %3335 = vset.pattern.permute.xlu1 %v3697_v60 }
  0x94   :  { %1439 = vmatmul.mubr.bf16.gmra.mrb[56].mxu0 %v651_v62  ;;  %3337 = vperm.xlu1 %3335, %v3336_v5  }
  0x95   :  { %1448 = vmatprep.mubr.bf16.mxu0 %v3497_v63 }
  0x98   :  { %3347 = vset.pattern.permute.xlu1 %v3698_v8 }
  0x99   :  { %3349 = vperm.xlu1 %3347, %v3336_v5  }
  0x9c   :  { %1449 = vmatmul.mubr.bf16.gmra.mrb[60].mxu0 %v652_v2 }
  0x9d   :  { %1491 = vmatprep.mubr.bf16.mxu0 %v3697_v60 }
  0xf6   :  { %v2844_v17 = vpop.f32.mrb[0].mxu0  ;;  %v3038_v18 = vpop.f32.mrb[0].mxu1 }
  0xf7   :  { %v2845_v20 = vpop.f32.mrb[1].mxu0  ;;  %v566_v21 = vpop.f32.mrb[1].mxu1 }
  0xf8   :  { %v2846_v22 = vadd.f32 %v2845_v20, %v2844_v17  ;;  %v2847_v25 = vpop.f32.mrb[2].mxu0  ;;  %v3039_v26 = vpop.f32.mrb[2].mxu1 }
  0xf9   :  { %v2848_v27 = vpop.f32.mrb[3].mxu0  ;;  %v569_v36 = vpop.f32.mrb[3].mxu1 }
  0xfa   :  { %v567_v30 = vadd.f32 %v2846_v22, %v566_v21  ;;  %v2849_v37 = vadd.f32 %v2848_v27, %v2847_v25 }
  0xfc   :  { %v570_v31 = vadd.f32 %v2849_v37, %v569_v36  ;;  %v629_v32 = vmax.f32 %v567_v30, 0.0 }
  0xfe   :  { %v630_v33 = vmax.f32 %v570_v31, 0.0  ;;  %v2850_v38 = vpop.f32.mrb[4].mxu0  ;;  %v3042_v39 = vpop.f32.mrb[4].mxu1 }
  0xff   :  { %v2851_v40 = vpop.f32.mrb[5].mxu0  ;;  %v582_v41 = vpop.f32.mrb[5].mxu1 }
 0x100   :  { %v653_v42 = vpack.c.bf16 %v630_v33, %v629_v32  ;;  %v2852_v43 = vadd.f32 %v2851_v40, %v2850_v38  ;;  %v2853_v44 = vpop.f32.mrb[6].mxu0  ;;  %v3043_v47 = vpop.f32.mrb[6].mxu1 }
 0x101   :  { %v2854_v48 = vpop.f32.mrb[7].mxu0  ;;  %v585_v49 = vpop.f32.mrb[7].mxu1 }
 0x102   :  { %v575_v50 = vadd.f32 %v3038_v18, %v2852_v43  ;;  %v2855_v51 = vadd.f32 %v2854_v48, %v2853_v44  ;;  %1492 = vmatmul.mubr.bf16.vlgmr.msra.gmra.mrb[32].mxu0 %v653_v42  ;;  %3068 = vmatprep.mubr.bf16.mxu1 %v653_v42 }
 0x103   :  { %1501 = vmatprep.mubr.bf16.mxu0 %v3697_v60 }
 0x104   :  { %v578_v52 = vadd.f32 %v3039_v26, %v2855_v51  ;;  %v631_v53 = vmax.f32 %v575_v50, 0.0 }
 0x106   :  { %v632_v54 = vmax.f32 %v578_v52, 0.0  ;;  %v2856_v57 = vpop.f32.mrb[8].mxu0  ;;  %v3046_v58 = vpop.f32.mrb[8].mxu1 }
 0x107   :  { %v2857_v59 = vpop.f32.mrb[9].mxu0  ;;  %v598_v61 = vpop.f32.mrb[9].mxu1 }
 0x108   :  { %v2858_v62 = vadd.f32 %v2857_v59, %v2856_v57  ;;  %v2859_v63 = vpop.f32.mrb[10].mxu0  ;;  %v654_v0 = vpack.c.bf16 %v632_v54, %v631_v53  ;;  %v3047_v1 = vpop.f32.mrb[10].mxu1 }
 0x109   :  { %v2860_v2 = vpop.f32.mrb[11].mxu0  ;;  %v601_v3 = vpop.f32.mrb[11].mxu1 }
 0x10a   :  { %v583_v6 = vadd.f32 %v2858_v62, %v582_v41  ;;  %v2861_v7 = vadd.f32 %v2860_v2, %v2859_v63  ;;  %1502 = vmatmul.mubr.bf16.gmra.mrb[36].mxu0 %v654_v0  ;;  %3069 = vmatmul.mubr.bf16.vlgmr.msra.gmra.mrb[48].mxu1 %v654_v0 }
 0x10b   :  { %1511 = vmatprep.mubr.bf16.mxu0 %v3697_v60 }
 0x10c   :  { %v586_v8 = vadd.f32 %v2861_v7, %v585_v49  ;;  %v633_v9 = vmax.f32 %v583_v6, 0.0 }
 0x10e   :  { %v634_v10 = vmax.f32 %v586_v8, 0.0  ;;  %v2862_v11 = vpop.f32.mrb[12].mxu0  ;;  %v4274_v12 = vpop.f32.mrb[12].mxu1  ;;  %v887_v8 = vlaneseq }
 0x10f   :  { %v2863_v13 = vpop.f32.mrb[13].mxu0  ;;  %v614_v14 = vpop.f32.mrb[13].mxu1 }
 0x110   :  { %v2864_v23 = vadd.f32 %v2863_v13, %v2862_v11  ;;  %v2865_v24 = vpop.f32.mrb[14].mxu0  ;;  %v655_v28 = vpack.c.bf16 %v634_v10, %v633_v9  ;;  %v4276_v29 = vpop.f32.mrb[14].mxu1  ;;  %v4285_v9 = vshrl.u32 %v887_v8, 7 }
 0x111   :  { %v2866_v15 = vpop.f32.mrb[15].mxu0  ;;  %v617_v34 = vpop.f32.mrb[15].mxu1 }
 0x112   :  { %v591_v35 = vadd.f32 %v3042_v39, %v2864_v23  ;;  %v2867_v45 = vadd.f32 %v2866_v15, %v2865_v24  ;;  %1512 = vmatmul.mubr.bf16.gmra.mrb[40].mxu0 %v655_v28  ;;  %3072 = vmatprep.mubr.bf16.mxu1 %v655_v28  ;;  %v3276_v10 = vpop.permute.xlu1 %3275  ;;  %v4288_v11 = vsub.s32 1, %v4285_v9  ;;  %v3265_v28 = vpop.permute.xlu0 %3264 }
 0x113   :  { %1521 = vmatprep.mubr.bf16.mxu0 %v3697_v60 }
 0x114   :  { %v594_v46 = vadd.f32 %v3043_v47, %v2867_v45  ;;  %v635_v16 = vmax.f32 %v591_v35, 0.0 }
 0x116   :  { %v636_v19 = vmax.f32 %v594_v46, 0.0  ;;  %v2868_v4 = vpop.f32.mrb[16].mxu0  ;;  %v3270_v15 = vpop.permute.xlu0 %3269 }
 0x117   :  { %v2869_v55 = vpop.f32.mrb[17].mxu0 }
 0x118   :  { %v2870_v56 = vadd.f32 %v2869_v55, %v2868_v4  ;;  %v2871_v5 = vpop.f32.mrb[18].mxu0  ;;  %v656_v17 = vpack.c.bf16 %v636_v19, %v635_v16  ;;  %v2924_v4 = vpop.f32.mrb[16].mxu1  ;;  %v3505_v55 = vld [vmem:[%s5062_s7] sm:$0xff]  }
 0x119   :  { %v2872_v18 = vpop.f32.mrb[19].mxu0  ;;  %3084 = vmatprep.subr.bf16.mxu1 %v3505_v55 }
 0x11a   :  { %v599_v20 = vadd.f32 %v2870_v56, %v598_v61  ;;  %v2873_v21 = vadd.f32 %v2872_v18, %v2871_v5  ;;  %1522 = vmatmul.mubr.bf16.gmra.mrb[44].mxu0 %v656_v17  ;;  %3073 = vmatmul.mubr.bf16.gmra.mrb[52].mxu1 %v656_v17  ;;  %v4320_v16 = vpop.permute.xlu0 %3285  ;;  %v2925_v56 = vpop.f32.mrb[17].mxu1  ;;  %v897_v5 = vsub.s32 4, %v4285_v9 }
 0x11b   :  { %1531 = vmatprep.mubr.bf16.mxu0 %v3697_v60  ;;  %v2927_v18 = vpop.f32.mrb[18].mxu1  ;;  %3085 = vmatpush3.bf16.msra.mxu1 %v3505_v55 }
 0x11c   :  { %v602_v22 = vadd.f32 %v2873_v21, %v601_v3  ;;  %v637_v25 = vmax.f32 %v599_v20, 0.0  ;;  %v4331_v20 = vsub.s32 0, %v4285_v9 }
 0x11e   :  { %v638_v26 = vmax.f32 %v602_v22, 0.0  ;;  %v2874_v27 = vpop.f32.mrb[20].mxu0  ;;  %v3298_v17 = vpop.permute.xlu0 %3297 }
 0x11f   :  { %v2875_v36 = vpop.f32.mrb[21].mxu0  ;;  %v4333_v21 = vunpack.i.l.bf16 %v3298_v17  ;;  %v2928_v22 = vpop.f32.mrb[19].mxu1 }
 0x120   :  { %v2876_v30 = vadd.f32 %v2875_v36, %v2874_v27  ;;  %v2877_v37 = vpop.f32.mrb[22].mxu0  ;;  %v657_v31 = vpack.c.bf16 %v638_v26, %v637_v25  ;;  %v4336_v26 = vunpack.i.h.bf16 %v3298_v17  ;;  %v2930_v36 = vpop.f32.mrb[20].mxu1 }
 0x121   :  { %v2878_v32 = vpop.f32.mrb[23].mxu0 }
 0x122   :  { %v607_v33 = vadd.f32 %v3046_v58, %v2876_v30  ;;  %v2879_v38 = vadd.f32 %v2878_v32, %v2877_v37  ;;  %1532 = vmatmul.mubr.bf16.gmra.mrb[48].mxu0 %v657_v31  ;;  %3076 = vmatprep.mubr.bf16.mxu1 %v657_v31  ;;  %v3506_v30 = vld [vmem:[%s5062_s7 + $0x8] sm:$0xff]   ;;  %v4345_v37 = vunpack.i.h.bf16 %v3265_v28  ;;  %v4347_v31 = vunpack.i.l.bf16 %v3265_v28 }
 0x123   :  { %1541 = vmatprep.mubr.bf16.mxu0 %v3697_v60  ;;  %3086 = vmatprep.subr.bf16.mxu1 %v3506_v30 }
 0x124   :  { %v610_v39 = vadd.f32 %v3047_v1, %v2879_v38  ;;  %v639_v40 = vmax.f32 %v607_v33, 0.0  ;;  %v2931_v33 = vpop.f32.mrb[21].mxu1  ;;  %v4352_v38 = vunpack.i.h.bf16 %v3270_v15  ;;  %3087 = vmatpush3.bf16.msra.mxu1 %v3506_v30 }
 0x126   :  { %v640_v41 = vmax.f32 %v610_v39, 0.0  ;;  %v2880_v42 = vpop.f32.mrb[24].mxu0  ;;  %v4354_v39 = vunpack.i.l.bf16 %v3270_v15 }
 0x127   :  { %v2881_v43 = vpop.f32.mrb[25].mxu0 }
 0x128   :  { %v2882_v44 = vadd.f32 %v2881_v43, %v2880_v42  ;;  %v2883_v47 = vpop.f32.mrb[26].mxu0  ;;  %v658_v48 = vpack.c.bf16 %v640_v41, %v639_v40  ;;  %v2933_v41 = vpop.f32.mrb[22].mxu1  ;;  %v1840_v42 = vsub.s32 5, %v4285_v9 }
 0x129   :  { %v2884_v49 = vpop.f32.mrb[27].mxu0 }
 0x12a   :  { %v615_v50 = vadd.f32 %v2882_v44, %v614_v14  ;;  %v2885_v51 = vadd.f32 %v2884_v49, %v2883_v47  ;;  %1542 = vmatmul.mubr.bf16.gmra.mrb[52].mxu0 %v658_v48  ;;  %3077 = vmatmul.mubr.bf16.gmra.mrb[56].mxu1 %v658_v48  ;;  %v4299_v14 = vunpack.i.h.bf16 %v3276_v10  ;;  %v2926_v44 = vadd.f32 %v2925_v56, %v2924_v4  ;;  %v2934_v49 = vpop.f32.mrb[23].mxu1 }
 0x12b   :  { %1551 = vmatprep.mubr.bf16.mxu0 %v3697_v60  ;;  %v2929_v48 = vadd.f32 %v2928_v22, %v2927_v18  ;;  %v4400_v18 = vunpack.i.h.bf16 %v4320_v16  ;;  %v4403_v22 = vunpack.i.l.bf16 %v4320_v16 }
 0x12c   :  { %v618_v52 = vadd.f32 %v2885_v51, %v617_v34  ;;  %v641_v53 = vmax.f32 %v615_v50, 0.0  ;;  %v3281_v34 = vpop.permute.xlu1 %3280  ;;  %v2932_v51 = vadd.f32 %v2931_v33, %v2930_v36  ;;  %v3509_v36 = vld [vmem:[%s5062_s7 + $0x20] sm:$0xff]  }
 0x12d   :  { %v4312_v35 = vunpack.i.l.bf16 %v3281_v34  ;;  %v4314_v45 = vunpack.i.h.bf16 %v3281_v34 }
 0x12e   :  { %v642_v54 = vmax.f32 %v618_v52, 0.0  ;;  %v2886_v57 = vpop.f32.mrb[28].mxu0 }
 0x12f   :  { %v2887_v58 = vpop.f32.mrb[29].mxu0 }
 0x130   :  { %v2888_v59 = vadd.f32 %v2887_v58, %v2886_v57  ;;  %v2889_v61 = vpop.f32.mrb[30].mxu0  ;;  %v659_v62 = vpack.c.bf16 %v642_v54, %v641_v53  ;;  %v3292_v40 = vpop.permute.xlu1 %3291  ;;  %v3507_v53 = vld [vmem:[%s5062_s7 + $0x10] sm:$0xff]  }
 0x131   :  { %v2890_v63 = vpop.f32.mrb[31].mxu0  ;;  %3088 = vmatprep.subr.bf16.mxu1 %v3507_v53 }
 0x132   :  { %v623_v0 = vadd.f32 %v4274_v12, %v2888_v59  ;;  %v2891_v1 = vadd.f32 %v2890_v63, %v2889_v61  ;;  %1552 = vmatmul.mubr.bf16.gmra.mrb[56].mxu0 %v659_v62  ;;  %3080 = vmatprep.mubr.bf16.mxu1 %v659_v62  ;;  %v4293_v12 = vld [vmem:[%s5061_s6] sm:$0x3f]  ;;  %v2935_v61 = vadd.f32 %v2934_v49, %v2933_v41  ;;  %v4412_v41 = vunpack.i.h.bf16 %v3292_v40 }
 0x133   :  { %1561 = vmatprep.mubr.bf16.mxu0 %v3697_v60  ;;  %v4295_v60 = vunpack.i.l.bf16 %v3276_v10  ;;  %v1833_v13 = vrot.slane %v4293_v12, %v4288_v11  ;;  %v898_v25 = vrot.slane %v4293_v12, %v897_v5  ;;  %v1841_v63 = vrot.slane %v4293_v12, %v1840_v42  ;;  %3089 = vmatpush3.bf16.msra.mxu1 %v3507_v53 }
 0x134   :  { %v626_v2 = vadd.f32 %v4276_v29, %v2891_v1  ;;  %v643_v3 = vmax.f32 %v623_v0, 0.0  ;;  %v3304_v62 = vpop.permute.xlu1 %3303  ;;  %v2936_v1 = vpop.f32.mrb[24].mxu1  ;;  %v4414_v42 = vunpack.i.l.bf16 %v3292_v40 }
 0x135   :  { %v4302_v23 = vrot.slane %v1833_v13, %v4288_v11  ;;  %v4350_v32 = vrot.slane %v898_v25, %v4331_v20  ;;  %v4373_v0 = vunpack.i.l.bf16 %v3304_v62  ;;  %v4381_v8 = vunpack.i.h.bf16 %v3304_v62 }
 0x136   :  { %v644_v6 = vmax.f32 %v626_v2, 0.0 }
 0x137   :  { %v4306_v24 = vmul.f32 %v4295_v60, %v4302_v23  ;;  %v4310_v29 = vmul.f32 %v4299_v14, %v4302_v23  ;;  %v4318_v46 = vmul.f32 %v4312_v35, %v4302_v23  ;;  %v4324_v19 = vmul.f32 %v4314_v45, %v4302_v23 }
 0x138   :  { %v660_v7 = vpack.c.bf16 %v644_v6, %v643_v3  ;;  %v4340_v27 = vmul.f32 %v4333_v21, %v4302_v23  ;;  %v916_v43 = vmul.f32 %v4347_v31, %v4350_v32  ;;  %v919_v47 = vmul.f32 %v4345_v37, %v4350_v32  ;;  %v2937_v3 = vpop.f32.mrb[25].mxu1  ;;  %v3508_v6 = vld [vmem:[%s5062_s7 + $0x18] sm:$0xff]   ;;  %v3310_v28 = vpop.permute.xlu1 %3309 }
 0x139   :  { %v922_v50 = vmul.f32 %v4354_v39, %v4350_v32  ;;  %v4365_v52 = vmul.f32 %v4336_v26, %v4302_v23  ;;  %v925_v58 = vmul.f32 %v4352_v38, %v4350_v32  ;;  %v4385_v10 = vmul.f32 %v4373_v0, %v4302_v23  ;;  %v2939_v13 = vpop.f32.mrb[26].mxu1  ;;  %3090 = vmatprep.subr.bf16.mxu1 %v3508_v6 }
 0x13a   :  { %1562 = vmatmul.mubr.bf16.gmra.mrb[60].mxu0 %v660_v7  ;;  %3081 = vmatmul.mubr.bf16.gmra.mrb[60].mxu1 %v660_v7  ;;  %v1607_v54 = vadd.f32 %v2926_v44, %v916_v43  ;;  %v1610_v57 = vadd.f32 %v2929_v48, %v919_v47  ;;  %v4379_v7 = vrot.slane %v1841_v63, %v4288_v11  ;;  %v2940_v15 = vpop.f32.mrb[27].mxu1 }
 0x13b   :  { %v1615_v59 = vadd.f32 %v2932_v51, %v922_v50  ;;  %v1618_v2 = vadd.f32 %v2935_v61, %v925_v58  ;;  %v4393_v55 = vmul.f32 %v4381_v8, %v4302_v23  ;;  %v2942_v56 = vpop.f32.mrb[28].mxu1  ;;  %3091 = vmatpush3.bf16.msra.mxu1 %v3508_v6  ;;  %v928_v16 = vmul.f32 %v4403_v22, %v4350_v32 }
 0x13c   :  { %v1865_v34 = vmul.f32 %v4312_v35, %v4379_v7  ;;  %v1859_v4 = vmul.f32 %v4295_v60, %v4379_v7  ;;  %v1868_v5 = vmul.f32 %v4314_v45, %v4379_v7  ;;  %v1862_v17 = vmul.f32 %v4299_v14, %v4379_v7  ;;  %v2943_v25 = vpop.f32.mrb[29].mxu1  ;;  %v3322_v51 = vpop.permute.xlu1 %3321  ;;  %3092 = vmatprep.subr.bf16.mxu1 %v3509_v36 }
 0x13d   :  { %v2945_v43 = vpop.f32.mrb[30].mxu1  ;;  %v2938_v48 = vadd.f32 %v2937_v3, %v2936_v1  ;;  %v931_v49 = vmul.f32 %v4400_v18, %v4350_v32  ;;  %v2941_v50 = vadd.f32 %v2940_v15, %v2939_v13  ;;  %v934_v40 = vmul.f32 %v4414_v42, %v4350_v32  ;;  %v3510_v3 = vld [vmem:[%s5062_s7 + $0x28] sm:$0xff]  }
 0x13e   :  { %v4408_v30 = vadd.f32 %v1865_v34, %v1615_v59  ;;  %v4410_v33 = vadd.f32 %v1859_v4, %v1607_v54  ;;  %v4416_v44 = vadd.f32 %v1868_v5, %v1618_v2  ;;  %v4418_v47 = vadd.f32 %v1862_v17, %v1610_v57  ;;  %v2946_v53 = vpop.f32.mrb[31].mxu1 }
 0x13f   :  { %v2944_v54 = vadd.f32 %v2943_v25, %v2942_v56  ;;  %v4426_v58 = vunpack.i.l.bf16 %v3322_v51  ;;  %3093 = vmatpush3.bf16.msra.mxu1 %v3509_v36  ;;  %v1623_v57 = vadd.f32 %v2938_v48, %v928_v16  ;;  %v1626_v59 = vadd.f32 %v2941_v50, %v931_v49  ;;  %v2948_v17 = vpop.f32.mrb[32].mxu1  ;;  %v3511_v25 = vld [vmem:[%s5062_s7 + $0x30] sm:$0xff]   ;;  %v3316_v16 = vpop.permute.xlu0 %3315 }
 0x140   :  { %5071 = vst [vmem:[#allocation2_spill] sm:$0xff] %v4408_v30  ;;  %5072 = vst [vmem:[#allocation3_spill] sm:$0xff] %v4410_v33  ;;  %v937_v61 = vmul.f32 %v4412_v41, %v4350_v32  ;;  %v2947_v62 = vadd.f32 %v2946_v53, %v2945_v43  ;;  %v4430_v1 = vunpack.i.h.bf16 %v3322_v51  ;;  %v1871_v13 = vmul.f32 %v4333_v21, %v4379_v7  ;;  %v2949_v48 = vpop.f32.mrb[33].mxu1  ;;  %v3327_v50 = vpop.permute.xlu1 %3326 }
 0x141   :  { %5073 = vst [vmem:[#allocation4_spill] sm:$0xff] %v4416_v44  ;;  %5074 = vst [vmem:[#allocation5_spill] sm:$0xff] %v4418_v47  ;;  %v1631_v63 = vadd.f32 %v2944_v54, %v934_v40  ;;  %v4434_v2 = vmul.f32 %v4426_v58, %v4302_v23  ;;  %3094 = vmatprep.subr.bf16.mxu1 %v3510_v3  ;;  %v1877_v15 = vmul.f32 %v4373_v0, %v4379_v7  ;;  %v2951_v51 = vpop.f32.mrb[34].mxu1 }
 0x142   :  { %v1634_v6 = vadd.f32 %v2947_v62, %v937_v61  ;;  %v1880_v34 = vmul.f32 %v4381_v8, %v4379_v7  ;;  %v4447_v4 = vmul.f32 %v4430_v1, %v4302_v23  ;;  %v4449_v56 = vadd.f32 %v1871_v13, %v1623_v57  ;;  %v2952_v57 = vpop.f32.mrb[35].mxu1  ;;  %v3512_v62 = vld [vmem:[%s5062_s7 + $0x38] sm:$0xff]  }
 0x143   :  { %3095 = vmatpush3.bf16.msra.mxu1 %v3510_v3  ;;  %v1874_v5 = vmul.f32 %v4336_v26, %v4379_v7  ;;  %v4456_v36 = vadd.f32 %v1877_v15, %v1631_v63  ;;  %v4462_v53 = vunpack.i.h.bf16 %v3310_v28  ;;  %v4464_v40 = vunpack.i.l.bf16 %v3310_v28  ;;  %v2954_v61 = vpop.f32.mrb[36].mxu1 }
 0x144   :  { %5075 = vst [vmem:[#allocation6_spill] sm:$0xff] %v4449_v56  ;;  %v4458_v43 = vadd.f32 %v1880_v34, %v1634_v6  ;;  %3096 = vmatprep.subr.bf16.mxu1 %v3511_v25  ;;  %v4466_v54 = vunpack.i.l.bf16 %v3327_v50  ;;  %v2950_v63 = vadd.f32 %v2949_v48, %v2948_v17  ;;  %v4473_v3 = vunpack.i.h.bf16 %v3327_v50  ;;  %v2955_v28 = vpop.f32.mrb[37].mxu1 }
 0x145   :  { %5076 = vst [vmem:[#allocation7_spill] sm:$0xff] %v4456_v36  ;;  %v4460_v49 = vadd.f32 %v1874_v5, %v1626_v59  ;;  %v940_v59 = vmul.f32 %v4464_v40, %v4350_v32  ;;  %v943_v6 = vmul.f32 %v4462_v53, %v4350_v32  ;;  %v4477_v13 = vunpack.i.l.bf16 %v3316_v16  ;;  %v3332_v5 = vpop.permute.xlu0 %3331 }
 0x146   :  { %5077 = vst [vmem:[#allocation8_spill] sm:$0xff] %v4458_v43  ;;  %v2953_v15 = vadd.f32 %v2952_v57, %v2951_v51  ;;  %v4481_v34 = vmul.f32 %v4466_v54, %v4302_v23  ;;  %v4487_v17 = vmul.f32 %v4473_v3, %v4302_v23  ;;  %v2956_v57 = vadd.f32 %v2955_v28, %v2954_v61 }
 0x147   :  { %5078 = vst [vmem:[#allocation9_spill] sm:$0xff] %v4460_v49  ;;  %3097 = vmatpush3.bf16.msra.mxu1 %v3511_v25  ;;  %v2957_v25 = vpop.f32.mrb[38].mxu1  ;;  %v4483_v49 = vunpack.i.h.bf16 %v3316_v16  ;;  %v1639_v43 = vadd.f32 %v2950_v63, %v940_v59  ;;  %v946_v51 = vmul.f32 %v4477_v13, %v4350_v32  ;;  %v1883_v16 = vmul.f32 %v4426_v58, %v4379_v7 }
 0x148   :  { %5079 = vst [vmem:[#allocation10_spill] sm:$0xff] %v4481_v34  ;;  %3098 = vmatprep.subr.bf16.mxu1 %v3512_v62  ;;  %5080 = vst [vmem:[#allocation11_spill] sm:$0xff] %v4487_v17  ;;  %v2958_v48 = vpop.f32.mrb[39].mxu1  ;;  %v1642_v50 = vadd.f32 %v2953_v15, %v943_v6  ;;  %v1886_v44 = vmul.f32 %v4430_v1, %v4379_v7  ;;  %v4497_v33 = vunpack.i.h.bf16 %v3332_v5 }
 0x149   :  { %v949_v56 = vmul.f32 %v4483_v49, %v4350_v32  ;;  %v2959_v36 = vadd.f32 %v2958_v48, %v2957_v25  ;;  %v1647_v47 = vadd.f32 %v2956_v57, %v946_v51  ;;  %v3344_v59 = vpop.permute.xlu0 %3343  ;;  %v2960_v63 = vpop.f32.mrb[40].mxu1  ;;  %v4501_v15 = vadd.f32 %v1883_v16, %v1639_v43 }
 0x14a   :  { %5081 = vst [vmem:[#allocation12_spill] sm:$0xff] %v4497_v33  ;;  %v4499_v6 = vunpack.i.l.bf16 %v3344_v59  ;;  %v2961_v61 = vpop.f32.mrb[41].mxu1  ;;  %v1889_v28 = vmul.f32 %v4466_v54, %v4379_v7  ;;  %v1892_v25 = vmul.f32 %v4473_v3, %v4379_v7  ;;  %v4507_v48 = vadd.f32 %v1886_v44, %v1642_v50 }
 0x14b   :  { %3099 = vmatpush3.bf16.msra.mxu1 %v3512_v62  ;;  %v1650_v62 = vadd.f32 %v2959_v36, %v949_v56  ;;  %5083 = vst [vmem:[#allocation14_spill] sm:$0xff] %v4501_v15  ;;  %v4509_v51 = vunpack.i.l.bf16 %v3332_v5  ;;  %v4511_v57 = vunpack.i.h.bf16 %v3344_v59  ;;  %v2963_v30 = vpop.f32.mrb[42].mxu1  ;;  %v2962_v17 = vadd.f32 %v2961_v61, %v2960_v63  ;;  %v3338_v5 = vpop.permute.xlu1 %3337 }
 0x14c   :  { %5082 = vst [vmem:[#allocation13_spill] sm:$0xff] %v4499_v6  ;;  %5084 = vst [vmem:[#allocation15_spill] sm:$0xff] %v4507_v48  ;;  %v4515_v56 = vmul.f32 %v4499_v6, %v4302_v23  ;;  %v2964_v36 = vpop.f32.mrb[43].mxu1  ;;  %v4517_v43 = vadd.f32 %v1889_v28, %v1647_v47  ;;  %v955_v44 = vmul.f32 %v4497_v33, %v4350_v32  ;;  %v4529_v28 = vunpack.i.h.bf16 %v3338_v5 }
 0x14d   :  { %5085 = vst [vmem:[#allocation16_spill] sm:$0xff] %v4511_v57  ;;  %v4519_v16 = vadd.f32 %v1892_v25, %v1650_v62  ;;  %v952_v15 = vmul.f32 %v4509_v51, %v4350_v32  ;;  %v2965_v50 = vadd.f32 %v2964_v36, %v2963_v30  ;;  %v4527_v59 = vmul.f32 %v4511_v57, %v4302_v23 }
 0x14e   :  { %5086 = vst [vmem:[#allocation17_spill] sm:$0xff] %v4515_v56  ;;  %5087 = vst [vmem:[#allocation18_spill] sm:$0xff] %v4517_v43  ;;  %v4531_v62 = vunpack.i.l.bf16 %v3338_v5  ;;  %v1895_v61 = vmul.f32 %v4499_v6, %v4379_v7  ;;  %v1898_v30 = vmul.f32 %v4511_v57, %v4379_v7 }
 0x14f   :  { %5088 = vst [vmem:[#allocation19_spill] sm:$0xff] %v4519_v16  ;;  %5089 = vst [vmem:[#allocation20_spill] sm:$0xff] %v4527_v59  ;;  %v2966_v48 = vpop.f32.mrb[44].mxu1  ;;  %v1655_v56 = vadd.f32 %v2962_v17, %v952_v15  ;;  %v1658_v47 = vadd.f32 %v2965_v50, %v955_v44  ;;  %v3350_v16 = vpop.permute.xlu1 %3349  ;;  %v961_v44 = vmul.f32 %v4529_v28, %v4350_v32 }
 0x150   :  { %v2967_v34 = vpop.f32.mrb[45].mxu1  ;;  %v958_v36 = vmul.f32 %v4531_v62, %v4350_v32  ;;  %v4539_v17 = vunpack.i.h.bf16 %v3350_v16  ;;  %v4541_v15 = vunpack.i.l.bf16 %v3350_v16 }
 0x151   :  { %v2969_v25 = vpop.f32.mrb[46].mxu1  ;;  %v2968_v43 = vadd.f32 %v2967_v34, %v2966_v48  ;;  %v4549_v33 = vadd.f32 %v1895_v61, %v1655_v56  ;;  %v4551_v57 = vadd.f32 %v1898_v30, %v1658_v47  ;;  %v4568_v56 = vld [vmem:[%s5063_s8] sm:$0xff]   ;;  %v1836_v47 = vsub.s32 3, %v4285_v9 }
 0x152   :  { %v2970_v63 = vpop.f32.mrb[47].mxu1  ;;  %v4547_v59 = vmul.f32 %v4541_v15, %v4302_v23  ;;  %v4555_v34 = vmul.f32 %v4539_v17, %v4302_v23  ;;  %v1901_v48 = vmul.f32 %v4541_v15, %v4379_v7  ;;  %v1904_v32 = vmul.f32 %v4539_v17, %v4379_v7  ;;  %3116 = vmatprep.subr.bf16.mxu1 %v4568_v56 }
 0x153   :  { %v2971_v5 = vadd.f32 %v2970_v63, %v2969_v25  ;;  %v1663_v50 = vadd.f32 %v2968_v43, %v958_v36  ;;  %5090 = vst [vmem:[#allocation21_spill] sm:$0xff] %v4551_v57  ;;  %v893_v23 = vsub.s32 2, %v4285_v9  ;;  %v890_v25 = vrot.slane %v4293_v12, %v4331_v20 }
 0x154   :  { %v1837_v63 = vrot.slane %v4293_v12, %v1836_v47 }
 0x155   :  { %v1666_v6 = vadd.f32 %v2971_v5, %v961_v44  ;;  %v4561_v43 = vadd.f32 %v1901_v48, %v1663_v50  ;;  %v894_v7 = vrot.slane %v4293_v12, %v893_v23 }
 0x156   :  { %v4584_v30 = vrot.slane %v1837_v63, %v4288_v11 }
 0x157   :  { %v4563_v16 = vadd.f32 %v1904_v32, %v1666_v6  ;;  %v4578_v6 = vrot.slane %v890_v25, %v4331_v20  ;;  %v4581_v61 = vrot.slane %v894_v7, %v4331_v20 }
 0x158   :  { %v1858_v12 = vmul.f32 %v4295_v60, %v4584_v30  ;;  %v1861_v23 = vmul.f32 %v4299_v14, %v4584_v30 }
 0x159   :  { %v914_v36 = vmul.f32 %v4347_v31, %v4578_v6  ;;  %v915_v9 = vmul.f32 %v4347_v31, %v4581_v61  ;;  %v917_v44 = vmul.f32 %v4345_v37, %v4578_v6  ;;  %v918_v20 = vmul.f32 %v4345_v37, %v4581_v61 }
 0x15a   :  { %v920_v60 = vmul.f32 %v4354_v39, %v4578_v6  ;;  %v923_v14 = vmul.f32 %v4352_v38, %v4578_v6 }
 0x1d5   :  { %v1493_v5 = vpop.f32.mrb[32].mxu0 }
 0x1d6   :  { %v3148_v50 = vadd.f32 %v1493_v5, %v914_v36  ;;  %v1495_v48 = vpop.f32.mrb[33].mxu0  ;;  %v1864_v5 = vmul.f32 %v4312_v35, %v4584_v30 }
 0x1d7   :  { %v3149_v11 = vadd.f32 %v1495_v48, %v915_v9  ;;  %v1497_v32 = vpop.f32.mrb[34].mxu0  ;;  %v921_v9 = vmul.f32 %v4354_v39, %v4581_v61  ;;  %v1867_v39 = vmul.f32 %v4314_v45, %v4584_v30  ;;  %v929_v45 = vmul.f32 %v4400_v18, %v4578_v6 }
 0x1d8   :  { %v4599_v47 = vadd.f32 %v3148_v50, %v4306_v24  ;;  %v3150_v31 = vadd.f32 %v1497_v32, %v917_v44  ;;  %v1499_v25 = vpop.f32.mrb[35].mxu0 }
 0x1d9   :  { %v1906_v7 = vadd.f32 %v3149_v11, %v1858_v12  ;;  %v3151_v63 = vadd.f32 %v1499_v25, %v918_v20 }
 0x1da   :  { %v4602_v57 = vadd.f32 %v3150_v31, %v4310_v29  ;;  %v924_v29 = vmul.f32 %v4352_v38, %v4581_v61  ;;  %v926_v38 = vmul.f32 %v4403_v22, %v4578_v6 }
 0x1db   :  { %v2796_v37 = vmul.f32 -1.442695, %v1906_v7  ;;  %v1909_v36 = vadd.f32 %v3151_v63, %v1861_v23 }
 0x1dd   :  { %3521 = vpow2.f32 %v2796_v37  ;;  %v2797_v24 = vmul.f32 -1.442695, %v1909_v36  ;;  %v1503_v44 = vpop.f32.mrb[36].mxu0  ;;  %v1870_v36 = vmul.f32 %v4333_v21, %v4584_v30 }
 0x1de   :  { %v3152_v12 = vadd.f32 %v1503_v44, %v920_v60  ;;  %v1505_v20 = vpop.f32.mrb[37].mxu0  ;;  %v927_v60 = vmul.f32 %v4403_v22, %v4581_v61  ;;  %v1873_v22 = vmul.f32 %v4336_v26, %v4584_v30  ;;  %v933_v26 = vmul.f32 %v4414_v42, %v4581_v61 }
 0x1df   :  { %3523 = vpow2.f32 %v2797_v24  ;;  %v3153_v50 = vadd.f32 %v1505_v20, %v921_v9  ;;  %v1507_v48 = vpop.f32.mrb[38].mxu0 }
 0x1e0   :  { %v4617_v11 = vadd.f32 %v3152_v12, %v4318_v46  ;;  %v3154_v32 = vadd.f32 %v1507_v48, %v923_v14  ;;  %v1509_v23 = vpop.f32.mrb[39].mxu0 }
 0x1e1   :  { %v1912_v31 = vadd.f32 %v3153_v50, %v1864_v5  ;;  %v3155_v25 = vadd.f32 %v1509_v23, %v924_v29  ;;  %v932_v23 = vmul.f32 %v4414_v42, %v4578_v6  ;;  %v1879_v42 = vmul.f32 %v4381_v8, %v4584_v30 }
 0x1e2   :  { %v4620_v35 = vadd.f32 %v3154_v32, %v4324_v19  ;;  %v930_v19 = vmul.f32 %v4400_v18, %v4581_v61  ;;  %v939_v8 = vmul.f32 %v4464_v40, %v4581_v61 }
 0x1e3   :  { %v2798_v7 = vmul.f32 -1.442695, %v1912_v31  ;;  %v1915_v63 = vadd.f32 %v3155_v25, %v1867_v39 }
 0x1e5   :  { %3525 = vpow2.f32 %v2798_v7  ;;  %v2799_v46 = vmul.f32 -1.442695, %v1915_v63  ;;  %v1513_v37 = vpop.f32.mrb[40].mxu0  ;;  %v1876_v63 = vmul.f32 %v4373_v0, %v4584_v30 }
 0x1e6   :  { %v3156_v9 = vadd.f32 %v1513_v37, %v926_v38  ;;  %v1515_v14 = vpop.f32.mrb[41].mxu0 }
 0x1e7   :  { %v3522_v24 = vpop.eup %3521  ;;  %3527 = vpow2.f32 %v2799_v46  ;;  %v3157_v44 = vadd.f32 %v1515_v14, %v927_v60  ;;  %v1517_v5 = vpop.f32.mrb[42].mxu0 }
 0x1e8   :  { %v2097_v29 = vadd.f32 1.0, %v3522_v24  ;;  %v4635_v12 = vadd.f32 %v3156_v9, %v4340_v27  ;;  %v3158_v20 = vadd.f32 %v1517_v5, %v929_v45  ;;  %v1519_v50 = vpop.f32.mrb[43].mxu0  ;;  %v935_v27 = vmul.f32 %v4412_v41, %v4578_v6 }
 0x1e9   :  { %v3524_v48 = vpop.eup %3523  ;;  %v1918_v21 = vadd.f32 %v3157_v44, %v1870_v36  ;;  %v3159_v39 = vadd.f32 %v1519_v50, %v930_v19 }
 0x1ea   :  { %3529 = vrcp.f32 %v2097_v29  ;;  %v2098_v18 = vadd.f32 1.0, %v3524_v48  ;;  %v4638_v32 = vadd.f32 %v3158_v20, %v4365_v52  ;;  %v936_v52 = vmul.f32 %v4412_v41, %v4581_v61 }
 0x1eb   :  { %v2800_v31 = vmul.f32 -1.442695, %v1918_v21  ;;  %v1921_v25 = vadd.f32 %v3159_v39, %v1873_v22  ;;  %v938_v29 = vmul.f32 %v4464_v40, %v4578_v6  ;;  %v941_v48 = vmul.f32 %v4462_v53, %v4578_v6 }
 0x1ec   :  { %3531 = vrcp.f32 %v2098_v18  ;;  %v942_v18 = vmul.f32 %v4462_v53, %v4581_v61 }
 0x1ed   :  { %v2801_v38 = vmul.f32 -1.442695, %v1921_v25  ;;  %v1523_v7 = vpop.f32.mrb[44].mxu0  ;;  %3533 = vpow2.f32 %v2800_v31 }
 0x1ee   :  { %v3160_v60 = vadd.f32 %v1523_v7, %v932_v23  ;;  %v1525_v45 = vpop.f32.mrb[45].mxu0 }
 0x1ef   :  { %v3526_v46 = vpop.eup %3525  ;;  %v3161_v37 = vadd.f32 %v1525_v45, %v933_v26  ;;  %v1527_v36 = vpop.f32.mrb[46].mxu0  ;;  %3535 = vpow2.f32 %v2801_v38  ;;  %v4673_v38 = vld [vmem:[%s5060_s0] sm:$0xff] }
 0x1f0   :  { %v4653_v19 = vadd.f32 %v3160_v60, %v4385_v10  ;;  %v3162_v9 = vadd.f32 %v1527_v36, %v935_v27  ;;  %v1529_v14 = vpop.f32.mrb[47].mxu0  ;;  %v2099_v0 = vadd.f32 1.0, %v3526_v46  ;;  %v1885_v27 = vmul.f32 %v4430_v1, %v4584_v30 }
 0x1f1   :  { %v3528_v24 = vpop.eup %3527  ;;  %v1924_v44 = vadd.f32 %v3161_v37, %v1876_v63  ;;  %v3163_v5 = vadd.f32 %v1529_v14, %v936_v52  ;;  %v944_v14 = vmul.f32 %v4477_v13, %v4578_v6 }
 0x1f2   :  { %v2100_v41 = vadd.f32 1.0, %v3528_v24  ;;  %v4656_v22 = vadd.f32 %v3162_v9, %v4393_v55  ;;  %v1882_v55 = vmul.f32 %v4426_v58, %v4584_v30  ;;  %v4679_v58 = vld [vmem:[%s5060_s0 + $0x8] sm:$0xff]  ;;  %v945_v24 = vmul.f32 %v4477_v13, %v4581_v61 }
 0x1f3   :  { %v2802_v20 = vmul.f32 -1.442695, %v1924_v44  ;;  %v1927_v50 = vadd.f32 %v3163_v5, %v1879_v42  ;;  %v947_v5 = vmul.f32 %v4483_v49, %v4578_v6 }
 0x1f4   :  { %v3530_v10 = vpop.eup %3529  ;;  %3537 = vrcp.f32 %v2100_v41 }
 0x1f5   :  { %3539 = vrcp.f32 %v2099_v0  ;;  %v2803_v21 = vmul.f32 -1.442695, %v1927_v50  ;;  %v1533_v39 = vpop.f32.mrb[48].mxu0  ;;  %v2145_v7 = vmul.f32 %v4673_v38, %v3530_v10 }
 0x1f6   :  { %v3532_v23 = vpop.eup %3531  ;;  %3541 = vpow2.f32 %v2802_v20  ;;  %v3164_v31 = vadd.f32 %v1533_v39, %v938_v29  ;;  %v1535_v25 = vpop.f32.mrb[49].mxu0  ;;  %v948_v20 = vmul.f32 %v4483_v49, %v4581_v61  ;;  %v1891_v39 = vmul.f32 %v4473_v3, %v4584_v30  ;;  %v4706_v49 = vld [vmem:[%s5060_s0 + $0x18] sm:$0xff] }
 0x1f7   :  { %v3165_v26 = vadd.f32 %v1535_v25, %v939_v8  ;;  %v1537_v40 = vpop.f32.mrb[50].mxu0  ;;  %v2146_v53 = vmul.f32 %v4679_v58, %v3532_v23  ;;  %v3534_v63 = vpop.eup %3533  ;;  %3543 = vpow2.f32 %v2803_v21 }
 0x1f8   :  { %v4683_v52 = vadd.f32 %v3164_v31, %v4434_v2  ;;  %v3166_v1 = vadd.f32 %v1537_v40, %v941_v48  ;;  %v1539_v60 = vpop.f32.mrb[51].mxu0  ;;  %v2101_v45 = vadd.f32 1.0, %v3534_v63  ;;  %v4715_v63 = vld [vmem:[%s5060_s0 + $0x10] sm:$0xff] }
 0x1f9   :  { %v1930_v46 = vadd.f32 %v3165_v26, %v1882_v55  ;;  %v3167_v37 = vadd.f32 %v1539_v60, %v942_v18  ;;  %v2161_v36 = vpack.c.bf16 %v2146_v53, %v2145_v7  ;;  %v3536_v42 = vpop.eup %3535  ;;  %v5091_v18 = vld [vmem:[#allocation10_spill] sm:$0xff]  ;;  %v5092_v53 = vld [vmem:[#allocation11_spill] sm:$0xff]  ;;  %v950_v60 = vmul.f32 %v4509_v51, %v4578_v6 }
 0x1fa   :  { %v4686_v9 = vadd.f32 %v3166_v1, %v4447_v4  ;;  %3545 = vrcp.f32 %v2101_v45  ;;  %v2102_v0 = vadd.f32 1.0, %v3536_v42  ;;  %v1888_v4 = vmul.f32 %v4466_v54, %v4584_v30 }
 0x1fb   :  { %v2804_v2 = vmul.f32 -1.442695, %v1930_v46  ;;  %v1933_v44 = vadd.f32 %v3167_v37, %v1885_v27  ;;  %3100 = vmatprep.mubr.bf16.mxu1 %v2161_v36  ;;  %v951_v36 = vmul.f32 %v4509_v51, %v4581_v61 }
 0x1fc   :  { %3547 = vrcp.f32 %v2102_v0  ;;  %v3514_v0 = vld [vmem:[%s5063_s8 + $0x8] sm:$0xff]  }
 0x1fd   :  { %v2805_v41 = vmul.f32 -1.442695, %v1933_v44  ;;  %v1543_v29 = vpop.f32.mrb[52].mxu0  ;;  %3549 = vpow2.f32 %v2804_v2 }
 0x1fe   :  { %v3538_v50 = vpop.eup %3537  ;;  %v3168_v8 = vadd.f32 %v1543_v29, %v944_v14  ;;  %v1545_v13 = vpop.f32.mrb[53].mxu0  ;;  %v5093_v14 = vld [vmem:[#allocation12_spill] sm:$0xff] }
 0x1ff   :  { %v3540_v10 = vpop.eup %3539  ;;  %v3169_v48 = vadd.f32 %v1545_v13, %v945_v24  ;;  %v1547_v21 = vpop.f32.mrb[54].mxu0  ;;  %v2148_v54 = vmul.f32 %v4706_v49, %v3538_v50  ;;  %3551 = vpow2.f32 %v2805_v41  ;;  %v953_v24 = vmul.f32 %v5093_v14, %v4578_v6  ;;  %v5094_v41 = vld [vmem:[#allocation13_spill] sm:$0xff] }
 0x200   :  { %v3542_v55 = vpop.eup %3541  ;;  %v4701_v23 = vadd.f32 %v3168_v8, %v5091_v18  ;;  %v3170_v31 = vadd.f32 %v1547_v21, %v947_v5  ;;  %v1549_v25 = vpop.f32.mrb[55].mxu0  ;;  %v2147_v1 = vmul.f32 %v4715_v63, %v3540_v10  ;;  %v1894_v29 = vmul.f32 %v5094_v41, %v4584_v30  ;;  %v5095_v10 = vld [vmem:[#allocation16_spill] sm:$0xff]  ;;  %v5096_v21 = vld [vmem:[#allocation17_spill] sm:$0xff] }
 0x201   :  { %v2103_v26 = vadd.f32 1.0, %v3542_v55  ;;  %v1936_v40 = vadd.f32 %v3169_v48, %v1888_v4  ;;  %v3171_v27 = vadd.f32 %v1549_v25, %v948_v20  ;;  %v3544_v7 = vpop.eup %3543  ;;  %v954_v4 = vmul.f32 %v5093_v14, %v4581_v61 }
 0x202   :  { %v4710_v3 = vadd.f32 %v3170_v31, %v5092_v53  ;;  %v2104_v45 = vadd.f32 1.0, %v3544_v7  ;;  %v2162_v42 = vpack.c.bf16 %v2148_v54, %v2147_v1  ;;  %v1897_v48 = vmul.f32 %v5095_v10, %v4584_v30  ;;  %v4740_v31 = vld [vmem:[%s5060_s0 + $0x20] sm:$0xff]  ;;  %v4746_v54 = vld [vmem:[%s5060_s0 + $0x28] sm:$0xff]  ;;  %v5097_v53 = vld [vmem:[#allocation20_spill] sm:$0xff] }
 0x203   :  { %v2806_v46 = vmul.f32 -1.442695, %v1936_v40  ;;  %v1939_v37 = vadd.f32 %v3171_v27, %v1891_v39  ;;  %3553 = vrcp.f32 %v2103_v26  ;;  %v4770_v10 = vld [vmem:[%s5060_s0 + $0x38] sm:$0xff] }
 0x204   :  { %v3546_v2 = vpop.eup %3545  ;;  %3555 = vrcp.f32 %v2104_v45  ;;  %3101 = vmatmul.mubr.bf16.vlgmr.msra.gmra.mrb[48].mxu1 %v2162_v42  ;;  %v956_v45 = vmul.f32 %v4531_v62, %v4578_v6 }
 0x205   :  { %v2807_v44 = vmul.f32 -1.442695, %v1939_v37  ;;  %v1553_v5 = vpop.f32.mrb[56].mxu0  ;;  %3557 = vpow2.f32 %v2806_v46  ;;  %3117 = vmatpush3.bf16.msra.mxu1 %v4568_v56  ;;  %v2149_v25 = vmul.f32 %v4740_v31, %v3546_v2  ;;  %v1900_v2 = vmul.f32 %v4541_v15, %v4584_v30 }
 0x206   :  { %v3172_v51 = vadd.f32 %v1553_v5, %v950_v60  ;;  %v1555_v20 = vpop.f32.mrb[57].mxu0  ;;  %v3548_v50 = vpop.eup %3547  ;;  %3118 = vmatprep.subr.bf16.mxu1 %v3514_v0 }
 0x207   :  { %v3173_v8 = vadd.f32 %v1555_v20, %v951_v36  ;;  %v1557_v13 = vpop.f32.mrb[58].mxu0  ;;  %v2150_v26 = vmul.f32 %v4746_v54, %v3548_v50  ;;  %v3550_v56 = vpop.eup %3549  ;;  %3559 = vpow2.f32 %v2807_v44  ;;  %v957_v36 = vmul.f32 %v4531_v62, %v4581_v61 }
 0x208   :  { %v4735_v39 = vadd.f32 %v3172_v51, %v5096_v21  ;;  %v3174_v55 = vadd.f32 %v1557_v13, %v953_v24  ;;  %v1559_v18 = vpop.f32.mrb[59].mxu0  ;;  %v2105_v7 = vadd.f32 1.0, %v3550_v56  ;;  %v1903_v50 = vmul.f32 %v4539_v17, %v4584_v30 }
 0x209   :  { %v1942_v40 = vadd.f32 %v3173_v8, %v1894_v29  ;;  %v3175_v27 = vadd.f32 %v1559_v18, %v954_v4  ;;  %v2163_v60 = vpack.c.bf16 %v2150_v26, %v2149_v25  ;;  %v3552_v46 = vpop.eup %3551  ;;  %3119 = vmatpush3.bf16.msra.mxu1 %v3514_v0  ;;  %v959_v4 = vmul.f32 %v4529_v28, %v4578_v6 }
 0x20a   :  { %v4750_v1 = vadd.f32 %v3174_v55, %v5097_v53  ;;  %3561 = vrcp.f32 %v2105_v7  ;;  %v2106_v42 = vadd.f32 1.0, %v3552_v46  ;;  %v960_v0 = vmul.f32 %v4529_v28, %v4581_v61 }
 0x20b   :  { %v1945_v37 = vadd.f32 %v3175_v27, %v1897_v48  ;;  %v2808_v14 = vmul.f32 -1.442695, %v1942_v40  ;;  %3104 = vmatprep.mubr.bf16.mxu1 %v2163_v60  ;;  %v4791_v60 = vld [vmem:[%s5060_s0 + $0x48] sm:$0xff] }
 0x20c   :  { %3563 = vrcp.f32 %v2106_v42 }
 0x20d   :  { %v1563_v24 = vpop.f32.mrb[60].mxu0  ;;  %v3554_v44 = vpop.eup %3553  ;;  %v2809_v5 = vmul.f32 -1.442695, %v1945_v37  ;;  %3565 = vpow2.f32 %v2808_v14 }
 0x20e   :  { %v3176_v41 = vadd.f32 %v1563_v24, %v956_v45  ;;  %v1565_v29 = vpop.f32.mrb[61].mxu0  ;;  %v3556_v51 = vpop.eup %3555 }
 0x20f   :  { %v3177_v20 = vadd.f32 %v1565_v29, %v957_v36  ;;  %v1567_v62 = vpop.f32.mrb[62].mxu0  ;;  %v2152_v6 = vmul.f32 %v4770_v10, %v3556_v51  ;;  %v3558_v48 = vpop.eup %3557  ;;  %3567 = vpow2.f32 %v2809_v5 }
 0x210   :  { %v4765_v15 = vadd.f32 %v3176_v41, %v4547_v59  ;;  %v3178_v8 = vadd.f32 %v1567_v62, %v959_v4  ;;  %v1569_v13 = vpop.f32.mrb[63].mxu0  ;;  %v2107_v28 = vadd.f32 1.0, %v3558_v48  ;;  %v4779_v59 = vld [vmem:[%s5060_s0 + $0x30] sm:$0xff]  ;;  %v4803_v41 = vld [vmem:[%s5060_s0 + $0x58] sm:$0xff]  ;;  %v4815_v48 = vld [vmem:[%s5060_s0 + $0x68] sm:$0xff] }
 0x211   :  { %v1948_v21 = vadd.f32 %v3177_v20, %v1900_v2  ;;  %v3179_v55 = vadd.f32 %v1569_v13, %v960_v0  ;;  %v2151_v61 = vmul.f32 %v4779_v59, %v3554_v44  ;;  %v3560_v30 = vpop.eup %3559  ;;  %v4797_v44 = vld [vmem:[%s5060_s0 + $0x50] sm:$0xff]  ;;  %v4809_v13 = vld [vmem:[%s5060_s0 + $0x60] sm:$0xff] }
 0x212   :  { %v4774_v17 = vadd.f32 %v3178_v8, %v4555_v34  ;;  %3569 = vrcp.f32 %v2107_v28  ;;  %v2108_v25 = vadd.f32 1.0, %v3560_v30  ;;  %v4785_v34 = vld [vmem:[%s5060_s0 + $0x40] sm:$0xff]  ;;  %v4821_v30 = vld [vmem:[%s5060_s0 + $0x70] sm:$0xff] }
 0x213   :  { %v1951_v18 = vadd.f32 %v3179_v55, %v1903_v50  ;;  %v2810_v26 = vmul.f32 -1.442695, %v1948_v21  ;;  %v2164_v56 = vpack.c.bf16 %v2152_v6, %v2151_v61 }
 0x214   :  { %v3562_v40 = vpop.eup %3561  ;;  %3571 = vrcp.f32 %v2108_v25  ;;  %v4827_v25 = vld [vmem:[%s5060_s0 + $0x78] sm:$0xff] }
 0x215   :  { %v2811_v27 = vmul.f32 -1.442695, %v1951_v18  ;;  %3105 = vmatmul.mubr.bf16.gmra.mrb[52].mxu1 %v2164_v56  ;;  %3573 = vpow2.f32 %v2810_v26  ;;  %v2153_v53 = vmul.f32 %v4785_v34, %v3562_v40  ;;  %v3515_v40 = vld [vmem:[%s5063_s8 + $0x10] sm:$0xff]  }
 0x216   :  { %v3564_v7 = vpop.eup %3563  ;;  %3120 = vmatprep.subr.bf16.mxu1 %v3515_v40 }
 0x217   :  { %v2154_v45 = vmul.f32 %v4791_v60, %v3564_v7  ;;  %v3566_v46 = vpop.eup %3565  ;;  %3575 = vpow2.f32 %v2811_v27  ;;  %3121 = vmatpush3.bf16.msra.mxu1 %v3515_v40  ;;  %v3516_v27 = vld [vmem:[%s5063_s8 + $0x18] sm:$0xff]   ;;  %v3517_v7 = vld [vmem:[%s5063_s8 + $0x20] sm:$0xff]  }
 0x218   :  { %v2109_v37 = vadd.f32 1.0, %v3566_v46  ;;  %3122 = vmatprep.subr.bf16.mxu1 %v3516_v27  ;;  %v3520_v46 = vld [vmem:[%s5063_s8 + $0x38] sm:$0xff]  }
 0x219   :  { %v2165_v36 = vpack.c.bf16 %v2154_v45, %v2153_v53  ;;  %v3568_v42 = vpop.eup %3567  ;;  %v3518_v53 = vld [vmem:[%s5063_s8 + $0x28] sm:$0xff]   ;;  %v3519_v45 = vld [vmem:[%s5063_s8 + $0x30] sm:$0xff]  }
 0x21a   :  { %3577 = vrcp.f32 %v2109_v37  ;;  %v2110_v14 = vadd.f32 1.0, %v3568_v42  ;;  %v2780_v37 = vmul.f32 -1.442695, %v4599_v47  ;;  %v2783_v42 = vmul.f32 -1.442695, %v4620_v35 }
 0x21b   :  { %3108 = vmatprep.mubr.bf16.mxu1 %v2165_v36  ;;  %3123 = vmatpush3.bf16.msra.mxu1 %v3516_v27  ;;  %v2782_v36 = vmul.f32 -1.442695, %v4617_v11  ;;  %v2786_v47 = vmul.f32 -1.442695, %v4653_v19  ;;  %v2787_v35 = vmul.f32 -1.442695, %v4656_v22 }
 0x21c   :  { %v3570_v24 = vpop.eup %3569  ;;  %3579 = vrcp.f32 %v2110_v14  ;;  %3124 = vmatprep.subr.bf16.mxu1 %v3517_v7  ;;  %v2781_v14 = vmul.f32 -1.442695, %v4602_v57  ;;  %v5100_v22 = vld [vmem:[#allocation4_spill] sm:$0xff] }
 0x21d   :  { %v2155_v5 = vmul.f32 %v4797_v44, %v3570_v24 }
 0x21e   :  { %v3572_v2 = vpop.eup %3571 }
 0x21f   :  { %v2156_v29 = vmul.f32 %v4803_v41, %v3572_v2  ;;  %v3574_v4 = vpop.eup %3573  ;;  %3125 = vmatpush3.bf16.msra.mxu1 %v3517_v7 }
 0x220   :  { %v2111_v51 = vadd.f32 1.0, %v3574_v4  ;;  %3126 = vmatprep.subr.bf16.mxu1 %v3518_v53  ;;  %v2785_v4 = vmul.f32 -1.442695, %v4638_v32 }
 0x221   :  { %v2166_v20 = vpack.c.bf16 %v2156_v29, %v2155_v5  ;;  %v3576_v62 = vpop.eup %3575  ;;  %v2784_v29 = vmul.f32 -1.442695, %v4635_v12 }
 0x222   :  { %3581 = vrcp.f32 %v2111_v51  ;;  %v2112_v0 = vadd.f32 1.0, %v3576_v62 }
 0x223   :  { %3109 = vmatmul.mubr.bf16.gmra.mrb[56].mxu1 %v2166_v20 }
 0x224   :  { %v3578_v50 = vpop.eup %3577  ;;  %3583 = vrcp.f32 %v2112_v0  ;;  %3127 = vmatpush3.bf16.msra.mxu1 %v3518_v53  ;;  %v5098_v0 = vld [vmem:[#allocation2_spill] sm:$0xff]  ;;  %v2790_v53 = vmul.f32 -1.442695, %v4701_v23 }
 0x225   :  { %v2157_v6 = vmul.f32 %v4809_v13, %v3578_v50  ;;  %3128 = vmatprep.subr.bf16.mxu1 %v3519_v45  ;;  %3585 = vpow2.f32 %v2780_v37 }
 0x226   :  { %v3580_v8 = vpop.eup %3579  ;;  %3587 = vpow2.f32 %v2782_v36 }
 0x227   :  { %v2158_v21 = vmul.f32 %v4815_v48, %v3580_v8  ;;  %3589 = vpow2.f32 %v2783_v42  ;;  %v5099_v8 = vld [vmem:[#allocation3_spill] sm:$0xff] }
 0x228   :  { %3129 = vmatpush3.bf16.msra.mxu1 %v3519_v45  ;;  %3591 = vpow2.f32 %v2781_v14 }
 0x229   :  { %v2167_v55 = vpack.c.bf16 %v2158_v21, %v2157_v6  ;;  %3130 = vmatprep.subr.bf16.mxu1 %v3520_v46 }
 0x22b   :  { %3112 = vmatprep.mubr.bf16.mxu1 %v2167_v55  ;;  %v2788_v55 = vmul.f32 -1.442695, %v4683_v52  ;;  %v2791_v52 = vmul.f32 -1.442695, %v4710_v3 }
 0x22c   :  { %v3582_v28 = vpop.eup %3581  ;;  %3131 = vmatpush3.bf16.msra.mxu1 %v3520_v46 }
 0x22d   :  { %v2159_v18 = vmul.f32 %v4821_v30, %v3582_v28 }
 0x22e   :  { %v3584_v61 = vpop.eup %3583 }
 0x22f   :  { %v2160_v26 = vmul.f32 %v4827_v25, %v3584_v61  ;;  %v3586_v24 = vpop.eup %3585 }
 0x230   :  { %v2001_v2 = vadd.f32 1.0, %v3586_v24  ;;  %v3588_v5 = vpop.eup %3587 }
 0x231   :  { %v2168_v56 = vpack.c.bf16 %v2160_v26, %v2159_v18  ;;  %v3590_v51 = vpop.eup %3589  ;;  %v2003_v11 = vadd.f32 1.0, %v3588_v5  ;;  %v2789_v26 = vmul.f32 -1.442695, %v4686_v9 }
 0x232   :  { %v3592_v20 = vpop.eup %3591  ;;  %3593 = vrcp.f32 %v2001_v2  ;;  %v2004_v57 = vadd.f32 1.0, %v3590_v51 }
 0x233   :  { %3113 = vmatmul.mubr.bf16.gmra.mrb[60].mxu1 %v2168_v56  ;;  %3595 = vpow2.f32 %v2784_v29  ;;  %v2002_v62 = vadd.f32 1.0, %v3592_v20  ;;  %v5101_v56 = vld [vmem:[#allocation5_spill] sm:$0xff] }
 0x234   :  { %3597 = vpow2.f32 %v2785_v4 }
 0x235   :  { %3599 = vpow2.f32 %v2786_v47 }
 0x236   :  { %3601 = vrcp.f32 %v2003_v11 }
 0x237   :  { %3603 = vpow2.f32 %v2787_v35 }
 0x238   :  { %3605 = vrcp.f32 %v2004_v57 }
 0x239   :  { %3607 = vrcp.f32 %v2002_v62 }
 0x23c   :  { %v3594_v21 = vpop.eup %3593 }
 0x23d   :  { %v3596_v18 = vpop.eup %3595  ;;  %v2346_v2 = vsub.f32 1.0, %v3594_v21 }
 0x23e   :  { %v3598_v27 = vpop.eup %3597  ;;  %v2005_v9 = vadd.f32 1.0, %v3596_v18 }
 0x23f   :  { %v3600_v7 = vpop.eup %3599  ;;  %v2006_v29 = vadd.f32 1.0, %v3598_v27  ;;  %v2362_v11 = vmul.f32 %v4673_v38, %v2346_v2 }
 0x240   :  { %v3602_v45 = vpop.eup %3601  ;;  %v2007_v36 = vadd.f32 1.0, %v3600_v7  ;;  %v5105_v7 = vld [vmem:[#allocation9_spill] sm:$0xff] }
 0x241   :  { %v3604_v46 = vpop.eup %3603  ;;  %v2348_v14 = vsub.f32 1.0, %v3602_v45 }
 0x242   :  { %v3606_v37 = vpop.eup %3605  ;;  %v2008_v24 = vadd.f32 1.0, %v3604_v46 }
 0x243   :  { %v3608_v42 = vpop.eup %3607  ;;  %v2349_v5 = vsub.f32 1.0, %v3606_v37  ;;  %v2364_v20 = vmul.f32 %v4715_v63, %v2348_v14 }
 0x244   :  { %v2347_v23 = vsub.f32 1.0, %v3608_v42 }
 0x2d7   :  { %v3102_v12 = vpop.f32.mrb[48].mxu1 }
 0x2d8   :  { %v3181_v32 = vadd.f32 %v5098_v0, %v3102_v12  ;;  %v2267_v50 = vpop.f32.mrb[49].mxu1  ;;  %v2365_v0 = vmul.f32 %v4706_v49, %v2349_v5  ;;  %v5104_v49 = vld [vmem:[#allocation8_spill] sm:$0xff] }
 0x2d9   :  { %v3183_v19 = vadd.f32 %v5099_v8, %v2267_v50  ;;  %v3103_v6 = vpop.f32.mrb[50].mxu1  ;;  %v5102_v8 = vld [vmem:[#allocation7_spill] sm:$0xff] }
 0x2da   :  { %3609 = vtanh.f32 %v3181_v32  ;;  %v3185_v28 = vadd.f32 %v5100_v22, %v3103_v6  ;;  %v2270_v61 = vpop.f32.mrb[51].mxu1 }
 0x2db   :  { %3611 = vtanh.f32 %v3183_v19  ;;  %v3187_v40 = vadd.f32 %v5101_v56, %v2270_v61  ;;  %v5103_v61 = vld [vmem:[#allocation6_spill] sm:$0xff] }
 0x2dc   :  { %3613 = vtanh.f32 %v3185_v28 }
 0x2dd   :  { %3615 = vtanh.f32 %v3187_v40 }
 0x2de   :  { %3617 = vpow2.f32 %v2788_v55  ;;  %v2363_v55 = vmul.f32 %v4679_v58, %v2347_v23 }
 0x2df   :  { %3619 = vpow2.f32 %v2789_v26 }
 0x2e0   :  { %3621 = vpow2.f32 %v2790_v53 }
 0x2e1   :  { %3623 = vpow2.f32 %v2791_v52 }
 0x2e2   :  { %3625 = vrcp.f32 %v2007_v36  ;;  %v2792_v36 = vmul.f32 -1.442695, %v4735_v39  ;;  %v2793_v39 = vmul.f32 -1.442695, %v4750_v1 }
 0x2e3   :  { %3627 = vrcp.f32 %v2005_v9 }
 0x2e4   :  { %v3610_v4 = vpop.eup %3609  ;;  %3629 = vrcp.f32 %v2008_v24  ;;  %v2794_v24 = vmul.f32 -1.442695, %v4765_v15 }
 0x2e5   :  { %v3612_v51 = vpop.eup %3611  ;;  %v2380_v47 = vmul.f32 %v3610_v4, %v3602_v45  ;;  %3631 = vrcp.f32 %v2006_v29  ;;  %v2795_v4 = vmul.f32 -1.442695, %v4774_v17 }
 0x2e6   :  { %v3614_v3 = vpop.eup %3613  ;;  %v2378_v35 = vmul.f32 %v3612_v51, %v3594_v21 }
 0x2e7   :  { %v3616_v57 = vpop.eup %3615  ;;  %v2381_v62 = vmul.f32 %v3614_v3, %v3606_v37  ;;  %v2396_v32 = vadd.f32 %v2380_v47, %v2364_v20 }
 0x2e8   :  { %v3106_v12 = vpop.f32.mrb[52].mxu1  ;;  %v3618_v50 = vpop.eup %3617  ;;  %v2379_v22 = vmul.f32 %v3616_v57, %v3608_v42  ;;  %v2394_v63 = vadd.f32 %v2378_v35, %v2362_v11 }
 0x2e9   :  { %v3189_v19 = vadd.f32 %v5102_v8, %v3106_v12  ;;  %v2283_v6 = vpop.f32.mrb[53].mxu1  ;;  %v3620_v28 = vpop.eup %3619  ;;  %v2397_v21 = vadd.f32 %v2381_v62, %v2365_v0  ;;  %2412 = vst [vmem:[%s5064_s9 + $0x10] sm:$0xff] %v2396_v32  ;;  %v2009_v27 = vadd.f32 1.0, %v3618_v50 }
 0x2ea   :  { %v3191_v18 = vadd.f32 %v5103_v61, %v2283_v6  ;;  %v3107_v38 = vpop.f32.mrb[54].mxu1  ;;  %v2395_v40 = vadd.f32 %v2379_v22, %v2363_v55  ;;  %2410 = vst [vmem:[%s5064_s9] sm:$0xff] %v2394_v63  ;;  %v3622_v58 = vpop.eup %3621  ;;  %v2010_v46 = vadd.f32 1.0, %v3620_v28  ;;  %v5107_v55 = vld [vmem:[#allocation14_spill] sm:$0xff] }
 0x2eb   :  { %3633 = vtanh.f32 %v3189_v19  ;;  %v3193_v26 = vadd.f32 %v5104_v49, %v3107_v38  ;;  %v2286_v56 = vpop.f32.mrb[55].mxu1  ;;  %2413 = vst [vmem:[%s5064_s9 + $0x18] sm:$0xff] %v2397_v21  ;;  %v2427_v45 = vpack.c.bf16 %v2397_v21, %v2396_v32  ;;  %v3624_v37 = vpop.eup %3623  ;;  %v2011_v14 = vadd.f32 1.0, %v3622_v58  ;;  %v5106_v32 = vld [vmem:[#allocation18_spill] sm:$0xff]  ;;  %v5108_v38 = vld [vmem:[#allocation19_spill] sm:$0xff] }
 0x2ec   :  { %3635 = vtanh.f32 %v3191_v18  ;;  %v3195_v53 = vadd.f32 %v5105_v7, %v2286_v56  ;;  %2411 = vst [vmem:[%s5064_s9 + $0x8] sm:$0xff] %v2395_v40  ;;  %v2426_v52 = vpack.c.bf16 %v2395_v40, %v2394_v63  ;;  %v3626_v42 = vpop.eup %3625  ;;  %v2012_v5 = vadd.f32 1.0, %v3624_v37 }
 0x2ed   :  { %3637 = vtanh.f32 %v3193_v26  ;;  %v3628_v9 = vpop.eup %3627  ;;  %v2352_v23 = vsub.f32 1.0, %v3626_v42  ;;  %v5109_v26 = vld [vmem:[#allocation15_spill] sm:$0xff] }
 0x2ee   :  { %3639 = vtanh.f32 %v3195_v53  ;;  %3132 = vmatprep.mubr.bf16.mxu1 %v2426_v52  ;;  %v3630_v2 = vpop.eup %3629  ;;  %v2350_v51 = vsub.f32 1.0, %v3628_v9 }
 0x2ef   :  { %3641 = vrcp.f32 %v2009_v27  ;;  %3133 = vmatmul.mubr.bf16.vlgmr.msra.gmra.mrb[64].mxu1 %v2427_v45  ;;  %v3632_v29 = vpop.eup %3631  ;;  %v2353_v47 = vsub.f32 1.0, %v3630_v2  ;;  %v2368_v15 = vmul.f32 %v4779_v59, %v2352_v23 }
 0x2f0   :  { %3643 = vrcp.f32 %v2010_v46  ;;  %v2351_v3 = vsub.f32 1.0, %v3632_v29  ;;  %v2366_v17 = vmul.f32 %v4740_v31, %v2350_v51 }
 0x2f1   :  { %3645 = vpow2.f32 %v2792_v36  ;;  %v2369_v8 = vmul.f32 %v4770_v10, %v2353_v47 }
 0x2f2   :  { %3647 = vrcp.f32 %v2011_v14  ;;  %v2367_v59 = vmul.f32 %v4746_v54, %v2351_v3 }
 0x2f3   :  { %3649 = vpow2.f32 %v2794_v24 }
 0x2f4   :  { %3651 = vrcp.f32 %v2012_v5 }
 0x2f5   :  { %v3634_v20 = vpop.eup %3633  ;;  %3653 = vpow2.f32 %v2795_v4 }
 0x2f6   :  { %v3636_v11 = vpop.eup %3635  ;;  %v2384_v35 = vmul.f32 %v3634_v20, %v3626_v42  ;;  %3655 = vpow2.f32 %v2793_v39  ;;  %v3110_v62 = vpop.f32.mrb[56].mxu1 }
 0x2f7   :  { %v3638_v57 = vpop.eup %3637  ;;  %v2382_v12 = vmul.f32 %v3636_v11, %v3628_v9  ;;  %v3197_v1 = vadd.f32 %v5106_v32, %v3110_v62  ;;  %v2299_v50 = vpop.f32.mrb[57].mxu1 }
 0x2f8   :  { %v3640_v0 = vpop.eup %3639  ;;  %v2385_v19 = vmul.f32 %v3638_v57, %v3630_v2  ;;  %v2400_v6 = vadd.f32 %v2384_v35, %v2368_v15  ;;  %v3199_v22 = vadd.f32 %v5107_v55, %v2299_v50  ;;  %v3111_v63 = vpop.f32.mrb[58].mxu1 }
 0x2f9   :  { %v2383_v28 = vmul.f32 %v3640_v0, %v3632_v29  ;;  %v2398_v61 = vadd.f32 %v2382_v12, %v2366_v17  ;;  %v3642_v18 = vpop.eup %3641  ;;  %3657 = vtanh.f32 %v3197_v1  ;;  %v3201_v31 = vadd.f32 %v5108_v38, %v3111_v63  ;;  %v2302_v21 = vpop.f32.mrb[59].mxu1 }
 0x2fa   :  { %v2401_v49 = vadd.f32 %v2385_v19, %v2369_v8  ;;  %2416 = vst [vmem:[%s5064_s9 + $0x30] sm:$0xff] %v2400_v6  ;;  %v3644_v10 = vpop.eup %3643  ;;  %3659 = vtanh.f32 %v3199_v22  ;;  %v3203_v56 = vadd.f32 %v5109_v26, %v2302_v21  ;;  %v2354_v14 = vsub.f32 1.0, %v3642_v18  ;;  %v5110_v8 = vld [vmem:[#allocation21_spill] sm:$0xff] }
 0x2fb   :  { %v2399_v40 = vadd.f32 %v2383_v28, %v2367_v59  ;;  %2414 = vst [vmem:[%s5064_s9 + $0x20] sm:$0xff] %v2398_v61  ;;  %v3646_v54 = vpop.eup %3645  ;;  %3661 = vtanh.f32 %v3201_v31  ;;  %v2355_v29 = vsub.f32 1.0, %v3644_v10 }
 0x2fc   :  { %2417 = vst [vmem:[%s5064_s9 + $0x38] sm:$0xff] %v2401_v49  ;;  %v2429_v58 = vpack.c.bf16 %v2401_v49, %v2400_v6  ;;  %v3648_v27 = vpop.eup %3647  ;;  %3663 = vtanh.f32 %v3203_v56  ;;  %v2013_v42 = vadd.f32 1.0, %v3646_v54  ;;  %v2370_v47 = vmul.f32 %v4785_v34, %v2354_v14  ;;  %v2596_v14 = vld [vmem:[%s5065_s3 + $0x8] sm:$0xff] }
 0x2fd   :  { %2415 = vst [vmem:[%s5064_s9 + $0x28] sm:$0xff] %v2399_v40  ;;  %v2428_v7 = vpack.c.bf16 %v2399_v40, %v2398_v61  ;;  %v3650_v53 = vpop.eup %3649  ;;  %v2356_v36 = vsub.f32 1.0, %v3648_v27  ;;  %v2371_v62 = vmul.f32 %v4791_v60, %v2355_v29 }
 0x2fe   :  { %v3652_v45 = vpop.eup %3651  ;;  %v2015_v37 = vadd.f32 1.0, %v3650_v53 }
 0x2ff   :  { %3136 = vmatprep.mubr.bf16.mxu1 %v2428_v7  ;;  %v3654_v46 = vpop.eup %3653  ;;  %v2357_v24 = vsub.f32 1.0, %v3652_v45  ;;  %v2372_v23 = vmul.f32 %v4797_v44, %v2356_v36 }
 0x300   :  { %3137 = vmatmul.mubr.bf16.gmra.mrb[68].mxu1 %v2429_v58  ;;  %v3656_v52 = vpop.eup %3655  ;;  %v2016_v9 = vadd.f32 1.0, %v3654_v46  ;;  %3665 = vrcp.f32 %v2015_v37  ;;  %v2595_v46 = vld [vmem:[%s5065_s3] sm:$0xff]  ;;  %v2598_v37 = vld [vmem:[%s5065_s3 + $0x18] sm:$0xff] }
 0x301   :  { %v2014_v5 = vadd.f32 1.0, %v3656_v52  ;;  %3667 = vrcp.f32 %v2013_v42  ;;  %v2373_v11 = vmul.f32 %v4803_v41, %v2357_v24 }
 0x302   :  { %3669 = vrcp.f32 %v2016_v9 }
 0x303   :  { %v3658_v2 = vpop.eup %3657  ;;  %3671 = vrcp.f32 %v2014_v5 }
 0x304   :  { %v3660_v4 = vpop.eup %3659  ;;  %v2388_v39 = vmul.f32 %v3658_v2, %v3648_v27 }
 0x305   :  { %v3662_v51 = vpop.eup %3661  ;;  %v2386_v20 = vmul.f32 %v3660_v4, %v3642_v18 }
 0x306   :  { %v3664_v3 = vpop.eup %3663  ;;  %v2389_v15 = vmul.f32 %v3662_v51, %v3652_v45  ;;  %v2404_v35 = vadd.f32 %v2388_v39, %v2372_v23  ;;  %v3114_v57 = vpop.f32.mrb[60].mxu1 }
 0x307   :  { %v2387_v17 = vmul.f32 %v3664_v3, %v3644_v10  ;;  %v2402_v12 = vadd.f32 %v2386_v20, %v2370_v47  ;;  %v3205_v44 = vadd.f32 %v4561_v43, %v3114_v57  ;;  %v2315_v0 = vpop.f32.mrb[61].mxu1 }
 0x308   :  { %v2405_v32 = vadd.f32 %v2389_v15, %v2373_v11  ;;  %2420 = vst [vmem:[%s5064_s9 + $0x50] sm:$0xff] %v2404_v35  ;;  %v3207_v34 = vadd.f32 %v4549_v33, %v2315_v0  ;;  %v3115_v1 = vpop.f32.mrb[62].mxu1 }
 0x309   :  { %v2403_v41 = vadd.f32 %v2387_v17, %v2371_v62  ;;  %2418 = vst [vmem:[%s5064_s9 + $0x40] sm:$0xff] %v2402_v12  ;;  %3673 = vtanh.f32 %v3205_v44  ;;  %v3209_v60 = vadd.f32 %v4563_v16, %v3115_v1  ;;  %v2318_v50 = vpop.f32.mrb[63].mxu1 }
 0x30a   :  { %2421 = vst [vmem:[%s5064_s9 + $0x58] sm:$0xff] %v2405_v32  ;;  %v2431_v43 = vpack.c.bf16 %v2405_v32, %v2404_v35  ;;  %3675 = vtanh.f32 %v3207_v34  ;;  %v3211_v19 = vadd.f32 %v5110_v8, %v2318_v50  ;;  %v3666_v6 = vpop.eup %3665 }
 0x30b   :  { %2419 = vst [vmem:[%s5064_s9 + $0x48] sm:$0xff] %v2403_v41  ;;  %v2430_v33 = vpack.c.bf16 %v2403_v41, %v2402_v12  ;;  %3677 = vtanh.f32 %v3209_v60  ;;  %v3668_v16 = vpop.eup %3667  ;;  %v2360_v63 = vsub.f32 1.0, %v3666_v6 }
 0x30c   :  { %3679 = vtanh.f32 %v3211_v19  ;;  %v3670_v55 = vpop.eup %3669  ;;  %v2358_v59 = vsub.f32 1.0, %v3668_v16 }
 0x30d   :  { %3140 = vmatprep.mubr.bf16.mxu1 %v2430_v33  ;;  %v3672_v22 = vpop.eup %3671  ;;  %v2361_v28 = vsub.f32 1.0, %v3670_v55  ;;  %v2376_v31 = vmul.f32 %v4821_v30, %v2360_v63 }
 0x30e   :  { %3141 = vmatmul.mubr.bf16.gmra.mrb[72].mxu1 %v2431_v43  ;;  %v2359_v18 = vsub.f32 1.0, %v3672_v22  ;;  %v2374_v10 = vmul.f32 %v4809_v13, %v2358_v59 }
 0x30f   :  { %v2377_v40 = vmul.f32 %v4827_v25, %v2361_v28  ;;  %v2597_v25 = vld [vmem:[%s5065_s3 + $0x10] sm:$0xff] }
 0x310   :  { %v2375_v27 = vmul.f32 %v4815_v48, %v2359_v18 }
 0x313   :  { %v3674_v61 = vpop.eup %3673 }
 0x314   :  { %v3676_v38 = vpop.eup %3675  ;;  %v2392_v21 = vmul.f32 %v3674_v61, %v3666_v6 }
 0x315   :  { %v3678_v49 = vpop.eup %3677  ;;  %v2390_v26 = vmul.f32 %v3676_v38, %v3668_v16 }
 0x316   :  { %v3680_v56 = vpop.eup %3679  ;;  %v2393_v54 = vmul.f32 %v3678_v49, %v3670_v55  ;;  %v2408_v58 = vadd.f32 %v2392_v21, %v2376_v31 }
 0x317   :  { %v2391_v7 = vmul.f32 %v3680_v56, %v3672_v22  ;;  %v2406_v53 = vadd.f32 %v2390_v26, %v2374_v10 }
 0x318   :  { %v2409_v45 = vadd.f32 %v2393_v54, %v2377_v40  ;;  %2424 = vst [vmem:[%s5064_s9 + $0x70] sm:$0xff] %v2408_v58 }
 0x319   :  { %v2407_v30 = vadd.f32 %v2391_v7, %v2375_v27  ;;  %2422 = vst [vmem:[%s5064_s9 + $0x60] sm:$0xff] %v2406_v53 }
 0x31a   :  { %2425 = vst [vmem:[%s5064_s9 + $0x78] sm:$0xff] %v2409_v45  ;;  %v2433_v13 = vpack.c.bf16 %v2409_v45, %v2408_v58 }
 0x31b   :  { %2423 = vst [vmem:[%s5064_s9 + $0x68] sm:$0xff] %v2407_v30  ;;  %v2432_v48 = vpack.c.bf16 %v2407_v30, %v2406_v53 }
 0x31d   :  { %3144 = vmatprep.mubr.bf16.mxu1 %v2432_v48 }
 0x31e   :  { %3145 = vmatmul.mubr.bf16.gmra.mrb[76].mxu1 %v2433_v13 }
 0x3c2   :  { %v3134_v52 = vpop.f32.mrb[64].mxu1 }
 0x3c3   :  { %v2613_v36 = vadd.f32 %v3134_v52, %v2597_v25  ;;  %v2532_v42 = vpop.f32.mrb[65].mxu1 }
 0x3c4   :  { %v2611_v9 = vadd.f32 %v2595_v46, %v2532_v42  ;;  %v3135_v24 = vpop.f32.mrb[66].mxu1 }
 0x3c5   :  { %2630 = vst.msk [vmem:[%s5066_s10 + $0x10] sm:$0xff] %vm2627_vm0, %v2613_v36  ;;  %v2614_v2 = vadd.f32 %v3135_v24, %v2598_v37  ;;  %v2535_v5 = vpop.f32.mrb[67].mxu1 }
 0x3c6   :  { %2628 = vst.msk [vmem:[%s5066_s10] sm:$0xff] %vm2627_vm0, %v2611_v9  ;;  %v2612_v29 = vadd.f32 %v2596_v14, %v2535_v5 }
 0x3c7   :  { %2631 = vst.msk [vmem:[%s5066_s10 + $0x18] sm:$0xff] %vm2627_vm0, %v2614_v2 }
 0x3c8   :  { %2629 = vst.msk [vmem:[%s5066_s10 + $0x8] sm:$0xff] %vm2627_vm0, %v2612_v29 }
 0x3cf   :  { %v2601_v4 = vld [vmem:[%s5065_s3 + $0x30] sm:$0xff]  ;;  %v2599_v23 = vld [vmem:[%s5065_s3 + $0x20] sm:$0xff]  ;;  %v2602_v51 = vld [vmem:[%s5065_s3 + $0x38] sm:$0xff] }
 0x3d0   :  { %v2600_v3 = vld [vmem:[%s5065_s3 + $0x28] sm:$0xff] }
 0x3d3   :  { %v3138_v39 = vpop.f32.mrb[68].mxu1 }
 0x3d4   :  { %v2617_v47 = vadd.f32 %v3138_v39, %v2601_v4  ;;  %v2548_v20 = vpop.f32.mrb[69].mxu1 }
 0x3d5   :  { %v2615_v11 = vadd.f32 %v2599_v23, %v2548_v20  ;;  %v3139_v15 = vpop.f32.mrb[70].mxu1 }
 0x3d6   :  { %2634 = vst.msk [vmem:[%s5066_s10 + $0x30] sm:$0xff] %vm2627_vm0, %v2617_v47  ;;  %v2618_v35 = vadd.f32 %v3139_v15, %v2602_v51  ;;  %v2551_v57 = vpop.f32.mrb[71].mxu1 }
 0x3d7   :  { %2632 = vst.msk [vmem:[%s5066_s10 + $0x20] sm:$0xff] %vm2627_vm0, %v2615_v11  ;;  %v2616_v62 = vadd.f32 %v2600_v3, %v2551_v57 }
 0x3d8   :  { %2635 = vst.msk [vmem:[%s5066_s10 + $0x38] sm:$0xff] %vm2627_vm0, %v2618_v35 }
 0x3d9   :  { %2633 = vst.msk [vmem:[%s5066_s10 + $0x28] sm:$0xff] %vm2627_vm0, %v2616_v62 }
 0x3e0   :  { %v2605_v17 = vld [vmem:[%s5065_s3 + $0x50] sm:$0xff]  ;;  %v2603_v12 = vld [vmem:[%s5065_s3 + $0x40] sm:$0xff]  ;;  %v2606_v0 = vld [vmem:[%s5065_s3 + $0x58] sm:$0xff] }
 0x3e1   :  { %v3142_v44 = vpop.f32.mrb[72].mxu1  ;;  %v2604_v1 = vld [vmem:[%s5065_s3 + $0x48] sm:$0xff] }
 0x3e2   :  { %v2621_v32 = vadd.f32 %v3142_v44, %v2605_v17  ;;  %v2564_v34 = vpop.f32.mrb[73].mxu1 }
 0x3e3   :  { %v2619_v41 = vadd.f32 %v2603_v12, %v2564_v34  ;;  %v3143_v60 = vpop.f32.mrb[74].mxu1 }
 0x3e4   :  { %2638 = vst.msk [vmem:[%s5066_s10 + $0x50] sm:$0xff] %vm2627_vm0, %v2621_v32  ;;  %v2622_v50 = vadd.f32 %v3143_v60, %v2606_v0  ;;  %v2567_v43 = vpop.f32.mrb[75].mxu1 }
 0x3e5   :  { %2636 = vst.msk [vmem:[%s5066_s10 + $0x40] sm:$0xff] %vm2627_vm0, %v2619_v41  ;;  %v2620_v8 = vadd.f32 %v2604_v1, %v2567_v43 }
 0x3e6   :  { %2639 = vst.msk [vmem:[%s5066_s10 + $0x58] sm:$0xff] %vm2627_vm0, %v2622_v50 }
 0x3e7   :  { %2637 = vst.msk [vmem:[%s5066_s10 + $0x48] sm:$0xff] %vm2627_vm0, %v2620_v8 }
 0x3ee   :  { %v2609_v19 = vld [vmem:[%s5065_s3 + $0x70] sm:$0xff]  ;;  %v2607_v33 = vld [vmem:[%s5065_s3 + $0x60] sm:$0xff]  ;;  %v2610_v16 = vld [vmem:[%s5065_s3 + $0x78] sm:$0xff] }
 0x3ef   :  { %v2608_v63 = vld [vmem:[%s5065_s3 + $0x68] sm:$0xff] }
 0x3f1   :  { %v3146_v6 = vpop.f32.mrb[76].mxu1 }
 0x3f2   :  { %v2625_v55 = vadd.f32 %v3146_v6, %v2609_v19  ;;  %v2580_v22 = vpop.f32.mrb[77].mxu1 }
 0x3f3   :  { %v2623_v59 = vadd.f32 %v2607_v33, %v2580_v22  ;;  %v3147_v28 = vpop.f32.mrb[78].mxu1 }
 0x3f4   :  { %2642 = vst.msk [vmem:[%s5066_s10 + $0x70] sm:$0xff] %vm2627_vm0, %v2625_v55  ;;  %v2626_v61 = vadd.f32 %v3147_v28, %v2610_v16  ;;  %v2583_v18 = vpop.f32.mrb[79].mxu1 }
 0x3f5   :  { %2640 = vst.msk [vmem:[%s5066_s10 + $0x60] sm:$0xff] %vm2627_vm0, %v2623_v59  ;;  %v2624_v38 = vadd.f32 %v2608_v63, %v2583_v18 }
 0x3f6   :  { %2643 = vst.msk [vmem:[%s5066_s10 + $0x78] sm:$0xff] %vm2627_vm0, %v2626_v61 }
 0x3f7   :  { %2641 = vst.msk [vmem:[%s5066_s10 + $0x68] sm:$0xff] %vm2627_vm0, %v2624_v38 }

</bundles_post_ra>
